<compile_context>
chip_gen: v6e
topology: v6e:2x2x1
jax: 0.10.0
libtpu: 0.0.40
codegen_flags: <defaults>
</compile_context>

<pallas_src>
import math
from functools import partial

import jax
import jax.numpy as jnp
from jax import lax
from jax.experimental import pallas as pl
from jax.experimental.pallas import tpu as pltpu  # noqa: F401  (TPU backend)

D_MODEL = 32
N_HEAD = 4
HEAD_DIM = D_MODEL // N_HEAD
D_FF = 64
NUM_LAYERS = 2
EPS = 1e-5
NEG_INF = -1e9
MM_DTYPE = jnp.bfloat16   # MXU input dtype (f32 accumulate; f32 softmax/LN).

VEC_ROWS_PER_LAYER = 10   # [bcq, bo_self, bo_cross, bff2, n1g,n1b, n2g,n2b, n3g,n3b]


# ------------------------------- fused kernel -------------------------------

def decoder_kernel(tgt_ref, mem_ref, mask_ref,
                   wsqkv_ref, wcq_ref, wckv_ref, wo_ref, wff1_ref, wff2_ref,
                   wbias_ref, vec_ref, out_ref, *, apply_norm):
    D = D_MODEL
    BT = tgt_ref.shape[0]            # B*T query rows
    BS = mem_ref.shape[0]            # B*S memory rows
    L = wsqkv_ref.shape[0]

    x = tgt_ref[...]                 # (BT, D) f32, resident for all layers
    mem = mem_ref[...]               # (BS, D) f32

    masks = mask_ref[...]            # (BT, BT + BS) f32, built wrapper-side
    self_mask = masks[:, :BT]        # block-diagonal + key padding
    cross_mask = masks[:, BT:BT + BS]

    wb = wbias_ref[...]              # (2L+1, 128) f32 wide-bias slab
    vec = vec_ref[...]               # (L*10 + 2, D) f32 row slab

    scale = 1.0 / math.sqrt(HEAD_DIM)

    def row(r):                      # (1, D) row from the vec slab
        return vec[r:r + 1, :]

    def layer_norm(v, g, b):
        mu = jnp.mean(v, axis=-1, keepdims=True)
        var = jnp.mean(jnp.square(v - mu), axis=-1, keepdims=True)
        return (v - mu) * lax.rsqrt(var + EPS) * g + b

    def softmax(s):
        m = jnp.max(s, axis=-1, keepdims=True)
        e = jnp.exp(s - m)
        return e * pl.reciprocal(jnp.sum(e, axis=-1, keepdims=True), approx=True)

    # Cross-attention K/V for ALL layers in one lane-dense dot (memory is
    # layer-invariant): (BS, D) @ (D, L*2D) -> (BS, L*2D).
    ckv_all = jnp.dot(mem.astype(MM_DTYPE), wckv_ref[...],
                      preferred_element_type=jnp.float32) \
        + wb[2 * L:2 * L + 1, :2 * L * D]

    def mha(q, k, v, mask, wo, bo):
        """Block-diagonal batched multi-head attention over all B rows."""
        qb = q.astype(MM_DTYPE)      # hoisted casts (once per attention)
        kb = k.astype(MM_DTYPE)
        vb = v.astype(MM_DTYPE)
        ctx = []
        for h in range(N_HEAD):      # static head unroll; lane slices only
            lo = h * HEAD_DIM
            s = lax.dot_general(qb[:, lo:lo + HEAD_DIM], kb[:, lo:lo + HEAD_DIM],
                                (((1,), (1,)), ((), ())),
                                preferred_element_type=jnp.float32) * scale
            p = softmax(s + mask)    # f32, off-diagonal batch blocks masked
            ctx.append(jnp.dot(p.astype(MM_DTYPE), vb[:, lo:lo + HEAD_DIM],
                               preferred_element_type=jnp.float32))
        c = jnp.concatenate(ctx, axis=1).astype(MM_DTYPE)     # (BT, D)
        return jnp.dot(c, wo, preferred_element_type=jnp.float32) + bo

    for l in range(L):               # static unroll over layers
        base = l * VEC_ROWS_PER_LAYER

        # ---- self attention: fused QKV in ONE dot ---------------------------
        qkv = jnp.dot(x.astype(MM_DTYPE), wsqkv_ref[l],
                      preferred_element_type=jnp.float32) + wb[l:l + 1, :3 * D]
        sa = mha(qkv[:, :D], qkv[:, D:2 * D], qkv[:, 2 * D:],
                 self_mask, wo_ref[2 * l], row(base + 1))
        x = layer_norm(x + sa, row(base + 4), row(base + 5))

        # ---- cross attention: Q from x, K/V precomputed ----------------------
        q_c = jnp.dot(x.astype(MM_DTYPE), wcq_ref[l],
                      preferred_element_type=jnp.float32) + row(base + 0)
        k_c = ckv_all[:, l * 2 * D:l * 2 * D + D]
        v_c = ckv_all[:, l * 2 * D + D:(l + 1) * 2 * D]
        ca = mha(q_c, k_c, v_c, cross_mask, wo_ref[2 * l + 1], row(base + 2))
        x = layer_norm(x + ca, row(base + 6), row(base + 7))

        # ---- position-wise feed forward (ReLU) -------------------------------
        h1 = jnp.maximum(
            jnp.dot(x.astype(MM_DTYPE), wff1_ref[l],
                    preferred_element_type=jnp.float32)
            + wb[L + l:L + l + 1, :D_FF], 0.0)
        ff = jnp.dot(h1.astype(MM_DTYPE), wff2_ref[l],
                     preferred_element_type=jnp.float32) + row(base + 3)
        x = layer_norm(x + ff, row(base + 8), row(base + 9))

    if apply_norm:                   # static flag (norm is Optional)
        fbase = L * VEC_ROWS_PER_LAYER
        x = layer_norm(x, vec[fbase:fbase + 1, :], vec[fbase + 1:fbase + 2, :])

    # Output stays (B*T, 32); fused output is tiny, lane-dense reshape not worth it.
    out_ref[...] = x


# --------------------------------- wrapper ----------------------------------

def _additive(m, shape):
    """Convert an optional bool/float mask into an additive f32 mask."""
    if m is None:
        return jnp.zeros(shape, jnp.float32)
    m = jnp.asarray(m)
    if jnp.issubdtype(m.dtype, jnp.bool_):
        return jnp.where(m, NEG_INF, 0.0).astype(jnp.float32)
    return m.astype(jnp.float32)


def decoder_forward(tgt, memory, packed, tgt_mask=None, tgt_padding_mask=None,
                    memory_mask=None, memory_padding_mask=None):
    B, T, D = tgt.shape
    S = memory.shape[1]

    attn = _additive(tgt_mask, (T, T))            # (T, T)
    memm = _additive(memory_mask, (T, S))         # (T, S)
    tpad = _additive(tgt_padding_mask, (B, T))    # (B, T) key padding (additive)
    mpad = _additive(memory_padding_mask, (B, S))  # (B, S)

    # Block-diagonal batched masks: one attention over all B*T (B*S) keys.
    # Off-diagonal batch blocks are fully masked so batches never mix.
    self_full = jnp.full((B * T, B * T), NEG_INF, jnp.float32)
    cross_full = jnp.full((B * T, B * S), NEG_INF, jnp.float32)
    for b in range(B):
        self_full = self_full.at[b * T:(b + 1) * T, b * T:(b + 1) * T].set(
            attn + tpad[b][None, :])
        cross_full = cross_full.at[b * T:(b + 1) * T, b * S:(b + 1) * S].set(
            memm + mpad[b][None, :])
    mask_slab = jnp.concatenate([self_full, cross_full], axis=1)   # (BT, BT+BS)

    kernel = partial(decoder_kernel, apply_norm=packed["apply_norm"])
    # Single fused gridless invocation: every array mapped in whole (default
    # BlockSpecs); total resident footprint is well under VMEM on v5e/v6e/v7x.
    out2d = pl.pallas_call(
        kernel,
        out_shape=jax.ShapeDtypeStruct((B * T, D), jnp.float32),
    )(tgt.reshape(B * T, D), memory.reshape(B * S, D), mask_slab,
      packed["wsqkv"], packed["wcq"], packed["wckv"], packed["wo"],
      packed["wff1"], packed["wff2"], packed["wbias"], packed["vec"])
    return out2d.reshape(B, T, D)


# --------------------------- parameter init / pack ---------------------------

def init_layer_params(key):
    ks = jax.random.split(key, 10)

    def lin(k, fan_in, shape):
        return jax.random.normal(k, shape, jnp.float32) / math.sqrt(fan_in)

    zrow = jnp.zeros((1, D_MODEL), jnp.float32)
    ones = jnp.ones((1, D_MODEL), jnp.float32)
    return dict(
        sa_wq=lin(ks[0], D_MODEL, (D_MODEL, D_MODEL)), sa_bq=zrow,
        sa_wk=lin(ks[1], D_MODEL, (D_MODEL, D_MODEL)), sa_bk=zrow,
        sa_wv=lin(ks[2], D_MODEL, (D_MODEL, D_MODEL)), sa_bv=zrow,
        sa_wo=lin(ks[3], D_MODEL, (D_MODEL, D_MODEL)), sa_bo=zrow,
        ca_wq=lin(ks[4], D_MODEL, (D_MODEL, D_MODEL)), ca_bq=zrow,
        ca_wk=lin(ks[5], D_MODEL, (D_MODEL, D_MODEL)), ca_bk=zrow,
        ca_wv=lin(ks[6], D_MODEL, (D_MODEL, D_MODEL)), ca_bv=zrow,
        ca_wo=lin(ks[7], D_MODEL, (D_MODEL, D_MODEL)), ca_bo=zrow,
        ff_w1=lin(ks[8], D_MODEL, (D_MODEL, D_FF)),
        ff_b1=jnp.zeros((1, D_FF), jnp.float32),
        ff_w2=lin(ks[9], D_FF, (D_FF, D_MODEL)), ff_b2=zrow,
        n1_g=ones, n1_b=zrow, n2_g=ones, n2_b=zrow, n3_g=ones, n3_b=zrow,
    )


def init_decoder_params(key, num_layers):
    layer = init_layer_params(key)
    # _get_clones uses deepcopy -> every layer starts with identical weights.
    layers = [layer for _ in range(num_layers)]
    norm = (jnp.ones((1, D_MODEL), jnp.float32),
            jnp.zeros((1, D_MODEL), jnp.float32))
    return {"layers": layers, "norm": norm}


def pack_decoder_params(params):
    """Pack per-layer parameter dicts into a few stacked slabs (wrapper-side)."""
    layers = params["layers"]
    L = len(layers)
    D = D_MODEL

    # Self-attention fused QKV weight (L, D, 3D) and cross-attention split
    # wq (L, D, D) / layer-stacked wkv (D, L*2D) so the kernel never
    # lane-slices a weight ref used as an MXU operand.
    wsqkv = jnp.stack([jnp.concatenate([p["sa_wq"], p["sa_wk"], p["sa_wv"]], 1)
                       for p in layers], 0).astype(MM_DTYPE)          # (L, D, 3D)
    wcq = jnp.stack([p["ca_wq"] for p in layers], 0).astype(MM_DTYPE)  # (L, D, D)
    wckv = jnp.concatenate([jnp.concatenate([p["ca_wk"], p["ca_wv"]], 1)
                            for p in layers], 1).astype(MM_DTYPE)     # (D, L*2D)
    wo = jnp.stack([p[pre + "wo"] for p in layers for pre in ("sa_", "ca_")],
                   0).astype(MM_DTYPE)                                 # (2L, D, D)
    wff1 = jnp.stack([p["ff_w1"] for p in layers], 0).astype(MM_DTYPE)  # (L, D, DFF)
    wff2 = jnp.stack([p["ff_w2"] for p in layers], 0).astype(MM_DTYPE)  # (L, DFF, D)

    # Wide-bias slab, f32, padded to a common lane width.  Layout (rows):
    #   0 .. L-1   : fused self QKV bias  (3D lanes)
    #   L .. 2L-1  : FF1 bias             (DFF lanes)
    #   2L         : layer-stacked cross KV bias (2*L*D lanes)
    W = max(3 * D, D_FF, 2 * L * D)

    def padw(v):
        return jnp.pad(v, ((0, 0), (0, W - v.shape[1])))

    rows = [padw(jnp.concatenate([p["sa_bq"], p["sa_bk"], p["sa_bv"]], 1))
            for p in layers]
    rows += [padw(p["ff_b1"]) for p in layers]
    rows.append(padw(jnp.concatenate(
        [jnp.concatenate([p["ca_bk"], p["ca_bv"]], 1) for p in layers], 1)))
    wbias = jnp.concatenate(rows, 0)                                   # (2L+1, W)

    # D-wide row slab (per layer 10 rows, then 2 final-norm rows):
    # [bcq, bo_self, bo_cross, bff2, n1_g, n1_b, n2_g, n2_b, n3_g, n3_b]
    vec_rows = []
    for p in layers:
        vec_rows += [p["ca_bq"], p["sa_bo"], p["ca_bo"], p["ff_b2"],
                     p["n1_g"], p["n1_b"], p["n2_g"], p["n2_b"],
                     p["n3_g"], p["n3_b"]]
    norm = params["norm"]
    if norm is None:
        vec_rows += [jnp.ones((1, D), jnp.float32), jnp.zeros((1, D), jnp.float32)]
    else:
        vec_rows += [norm[0], norm[1]]
    vec = jnp.concatenate(vec_rows, 0)                                 # (L*10+2, D)

    return dict(wsqkv=wsqkv, wcq=wcq, wckv=wckv, wo=wo, wff1=wff1, wff2=wff2,
                wbias=wbias, vec=vec, apply_norm=norm is not None)


# ----------------------------------- main ------------------------------------

if __name__ == "__main__":
    key = jax.random.PRNGKey(0)
    k_tgt, k_mem, k_par = jax.random.split(key, 3)

    B, T, S = 2, 8, 8
    tgt = jax.random.normal(k_tgt, (B, T, D_MODEL), jnp.float32)
    memory = jax.random.normal(k_mem, (B, S, D_MODEL), jnp.float32)

    # causal additive tgt mask + some boolean key-padding masks
    tgt_mask = jnp.where(jnp.triu(jnp.ones((T, T), jnp.bool_), k=1), NEG_INF, 0.0)
    tgt_padding_mask = jnp.zeros((B, T), jnp.bool_).at[1, -2:].set(True)
    memory_padding_mask = jnp.zeros((B, S), jnp.bool_).at[1, -1:].set(True)

    params = init_decoder_params(k_par, NUM_LAYERS)
    packed = pack_decoder_params(params)

    out = decoder_forward(tgt, memory, packed,
                          tgt_mask=tgt_mask,
                          tgt_padding_mask=tgt_padding_mask,
                          memory_mask=None,
                          memory_padding_mask=memory_padding_mask)
    out = jax.block_until_ready(out)
    assert out.shape == (B, T, D_MODEL)
    assert bool(jnp.all(jnp.isfinite(out)))
    print("KERNEL_OK")
</pallas_src>

<mosaic_0001>
module attributes {stable_mosaic.version = 11 : i64} {
  func.func @decoder_kernel(%arg0: memref<16x32xf32, #tpu.memory_space<vmem>>, %arg1: memref<16x32xf32, #tpu.memory_space<vmem>>, %arg2: memref<16x32xf32, #tpu.memory_space<vmem>>, %arg3: memref<2x32x96xbf16, #tpu.memory_space<vmem>>, %arg4: memref<2x32x32xbf16, #tpu.memory_space<vmem>>, %arg5: memref<32x128xbf16, #tpu.memory_space<vmem>>, %arg6: memref<4x32x32xbf16, #tpu.memory_space<vmem>>, %arg7: memref<2x32x64xbf16, #tpu.memory_space<vmem>>, %arg8: memref<2x64x32xbf16, #tpu.memory_space<vmem>>, %arg9: memref<5x128xf32, #tpu.memory_space<vmem>>, %arg10: memref<22x32xf32, #tpu.memory_space<vmem>>, %arg11: memref<16x32xf32, #tpu.memory_space<vmem>>) attributes {dimension_semantics = [], scalar_prefetch = 0 : i64, scratch_operands = 0 : i64, tpu.core_type = #tpu.core_type<tc>} {
    %c0 = arith.constant 0 : index
    %c0_0 = arith.constant 0 : index
    %0 = vector.load %arg0[%c0, %c0_0] : memref<16x32xf32, #tpu.memory_space<vmem>>, vector<16x32xf32>
    %c0_1 = arith.constant 0 : index
    %c0_2 = arith.constant 0 : index
    %1 = vector.load %arg1[%c0_1, %c0_2] : memref<16x32xf32, #tpu.memory_space<vmem>>, vector<16x32xf32>
    %c0_3 = arith.constant 0 : index
    %c0_4 = arith.constant 0 : index
    %2 = vector.load %arg2[%c0_3, %c0_4] : memref<16x32xf32, #tpu.memory_space<vmem>>, vector<16x32xf32>
    %3 = vector.extract_strided_slice %2 {offsets = [0, 0], sizes = [16, 16], strides = [1, 1]} : vector<16x32xf32> to vector<16x16xf32>
    %4 = vector.extract_strided_slice %2 {offsets = [0, 16], sizes = [16, 16], strides = [1, 1]} : vector<16x32xf32> to vector<16x16xf32>
    %c0_5 = arith.constant 0 : index
    %c0_6 = arith.constant 0 : index
    %5 = vector.load %arg9[%c0_5, %c0_6] : memref<5x128xf32, #tpu.memory_space<vmem>>, vector<5x128xf32>
    %c0_7 = arith.constant 0 : index
    %c0_8 = arith.constant 0 : index
    %6 = vector.load %arg10[%c0_7, %c0_8] : memref<22x32xf32, #tpu.memory_space<vmem>>, vector<22x32xf32>
    %7 = arith.truncf %1 : vector<16x32xf32> to vector<16x32xbf16>
    %c0_9 = arith.constant 0 : index
    %c0_10 = arith.constant 0 : index
    %8 = vector.load %arg5[%c0_9, %c0_10] : memref<32x128xbf16, #tpu.memory_space<vmem>>, vector<32x128xbf16>
    %cst = arith.constant dense<0.000000e+00> : vector<16x128xf32>
    %9 = tpu.matmul %7, %8, %cst {dimension_numbers = #tpu.dot_dimension_numbers<[1], [0], [0], [1], [0, 0, 1, 1], [], []>} : vector<16x32xbf16>, vector<32x128xbf16>, vector<16x128xf32> -> vector<16x128xf32>
    %10 = vector.extract_strided_slice %5 {offsets = [4, 0], sizes = [1, 128], strides = [1, 1]} : vector<5x128xf32> to vector<1x128xf32>
    %11 = vector.broadcast %10 : vector<1x128xf32> to vector<16x128xf32>
    %12 = arith.addf %9, %11 : vector<16x128xf32>
    %13 = arith.truncf %0 : vector<16x32xf32> to vector<16x32xbf16>
    %c0_11 = arith.constant 0 : index
    %c0_12 = arith.constant 0 : index
    %c0_13 = arith.constant 0 : index
    %14 = vector.load %arg3[%c0_11, %c0_12, %c0_13] : memref<2x32x96xbf16, #tpu.memory_space<vmem>>, vector<1x32x96xbf16>
    %15 = vector.shape_cast %14 : vector<1x32x96xbf16> to vector<32x96xbf16>
    %cst_14 = arith.constant dense<0.000000e+00> : vector<16x96xf32>
    %16 = tpu.matmul %13, %15, %cst_14 {dimension_numbers = #tpu.dot_dimension_numbers<[1], [0], [0], [1], [0, 0, 1, 1], [], []>} : vector<16x32xbf16>, vector<32x96xbf16>, vector<16x96xf32> -> vector<16x96xf32>
    %17 = vector.extract_strided_slice %5 {offsets = [0, 0], sizes = [1, 96], strides = [1, 1]} : vector<5x128xf32> to vector<1x96xf32>
    %18 = vector.broadcast %17 : vector<1x96xf32> to vector<16x96xf32>
    %19 = arith.addf %16, %18 : vector<16x96xf32>
    %20 = vector.extract_strided_slice %19 {offsets = [0, 0], sizes = [16, 32], strides = [1, 1]} : vector<16x96xf32> to vector<16x32xf32>
    %21 = vector.extract_strided_slice %19 {offsets = [0, 32], sizes = [16, 32], strides = [1, 1]} : vector<16x96xf32> to vector<16x32xf32>
    %22 = vector.extract_strided_slice %19 {offsets = [0, 64], sizes = [16, 32], strides = [1, 1]} : vector<16x96xf32> to vector<16x32xf32>
    %c0_15 = arith.constant 0 : index
    %c0_16 = arith.constant 0 : index
    %c0_17 = arith.constant 0 : index
    %23 = vector.load %arg6[%c0_15, %c0_16, %c0_17] : memref<4x32x32xbf16, #tpu.memory_space<vmem>>, vector<1x32x32xbf16>
    %24 = vector.shape_cast %23 : vector<1x32x32xbf16> to vector<32x32xbf16>
    %25 = vector.extract_strided_slice %6 {offsets = [1, 0], sizes = [1, 32], strides = [1, 1]} : vector<22x32xf32> to vector<1x32xf32>
    %26 = arith.truncf %20 : vector<16x32xf32> to vector<16x32xbf16>
    %27 = arith.truncf %21 : vector<16x32xf32> to vector<16x32xbf16>
    %28 = arith.truncf %22 : vector<16x32xf32> to vector<16x32xbf16>
    %29 = vector.extract_strided_slice %26 {offsets = [0, 0], sizes = [16, 8], strides = [1, 1]} : vector<16x32xbf16> to vector<16x8xbf16>
    %30 = vector.extract_strided_slice %27 {offsets = [0, 0], sizes = [16, 8], strides = [1, 1]} : vector<16x32xbf16> to vector<16x8xbf16>
    %cst_18 = arith.constant dense<0.000000e+00> : vector<16x16xf32>
    %31 = tpu.matmul %29, %30, %cst_18 {dimension_numbers = #tpu.dot_dimension_numbers<[1], [1], [0], [0], [0, 0, 1, 0], [], []>} : vector<16x8xbf16>, vector<16x8xbf16>, vector<16x16xf32> -> vector<16x16xf32>
    %cst_19 = arith.constant 0.353553385 : f32
    %32 = vector.broadcast %cst_19 : f32 to vector<16x16xf32>
    %33 = arith.mulf %31, %32 : vector<16x16xf32>
    %34 = arith.addf %33, %3 : vector<16x16xf32>
    %cst_20 = arith.constant dense<0xFF800000> : vector<16xf32>
    %35 = vector.multi_reduction <maximumf>, %34, %cst_20 [1] : vector<16x16xf32> to vector<16xf32>
    %36 = vector.shape_cast %35 : vector<16xf32> to vector<16x1xf32>
    %37 = vector.broadcast %36 : vector<16x1xf32> to vector<16x16xf32>
    %38 = arith.subf %34, %37 : vector<16x16xf32>
    %39 = math.exp %38 : vector<16x16xf32>
    %cst_21 = arith.constant dense<0.000000e+00> : vector<16xf32>
    %40 = vector.multi_reduction <add>, %39, %cst_21 [1] : vector<16x16xf32> to vector<16xf32>
    %41 = vector.shape_cast %40 : vector<16xf32> to vector<16x1xf32>
    %42 = tpu.reciprocal %41 {approx = true} : vector<16x1xf32> -> vector<16x1xf32>
    %43 = vector.broadcast %42 : vector<16x1xf32> to vector<16x16xf32>
    %44 = arith.mulf %39, %43 : vector<16x16xf32>
    %45 = arith.truncf %44 : vector<16x16xf32> to vector<16x16xbf16>
    %46 = vector.extract_strided_slice %28 {offsets = [0, 0], sizes = [16, 8], strides = [1, 1]} : vector<16x32xbf16> to vector<16x8xbf16>
    %cst_22 = arith.constant dense<0.000000e+00> : vector<16x8xf32>
    %47 = tpu.matmul %45, %46, %cst_22 {dimension_numbers = #tpu.dot_dimension_numbers<[1], [0], [0], [1], [0, 0, 1, 1], [], []>} : vector<16x16xbf16>, vector<16x8xbf16>, vector<16x8xf32> -> vector<16x8xf32>
    %48 = vector.extract_strided_slice %26 {offsets = [0, 8], sizes = [16, 8], strides = [1, 1]} : vector<16x32xbf16> to vector<16x8xbf16>
    %49 = vector.extract_strided_slice %27 {offsets = [0, 8], sizes = [16, 8], strides = [1, 1]} : vector<16x32xbf16> to vector<16x8xbf16>
    %cst_23 = arith.constant dense<0.000000e+00> : vector<16x16xf32>
    %50 = tpu.matmul %48, %49, %cst_23 {dimension_numbers = #tpu.dot_dimension_numbers<[1], [1], [0], [0], [0, 0, 1, 0], [], []>} : vector<16x8xbf16>, vector<16x8xbf16>, vector<16x16xf32> -> vector<16x16xf32>
    %cst_24 = arith.constant 0.353553385 : f32
    %51 = vector.broadcast %cst_24 : f32 to vector<16x16xf32>
    %52 = arith.mulf %50, %51 : vector<16x16xf32>
    %53 = arith.addf %52, %3 : vector<16x16xf32>
    %cst_25 = arith.constant dense<0xFF800000> : vector<16xf32>
    %54 = vector.multi_reduction <maximumf>, %53, %cst_25 [1] : vector<16x16xf32> to vector<16xf32>
    %55 = vector.shape_cast %54 : vector<16xf32> to vector<16x1xf32>
    %56 = vector.broadcast %55 : vector<16x1xf32> to vector<16x16xf32>
    %57 = arith.subf %53, %56 : vector<16x16xf32>
    %58 = math.exp %57 : vector<16x16xf32>
    %cst_26 = arith.constant dense<0.000000e+00> : vector<16xf32>
    %59 = vector.multi_reduction <add>, %58, %cst_26 [1] : vector<16x16xf32> to vector<16xf32>
    %60 = vector.shape_cast %59 : vector<16xf32> to vector<16x1xf32>
    %61 = tpu.reciprocal %60 {approx = true} : vector<16x1xf32> -> vector<16x1xf32>
    %62 = vector.broadcast %61 : vector<16x1xf32> to vector<16x16xf32>
    %63 = arith.mulf %58, %62 : vector<16x16xf32>
    %64 = arith.truncf %63 : vector<16x16xf32> to vector<16x16xbf16>
    %65 = vector.extract_strided_slice %28 {offsets = [0, 8], sizes = [16, 8], strides = [1, 1]} : vector<16x32xbf16> to vector<16x8xbf16>
    %cst_27 = arith.constant dense<0.000000e+00> : vector<16x8xf32>
    %66 = tpu.matmul %64, %65, %cst_27 {dimension_numbers = #tpu.dot_dimension_numbers<[1], [0], [0], [1], [0, 0, 1, 1], [], []>} : vector<16x16xbf16>, vector<16x8xbf16>, vector<16x8xf32> -> vector<16x8xf32>
    %67 = vector.extract_strided_slice %26 {offsets = [0, 16], sizes = [16, 8], strides = [1, 1]} : vector<16x32xbf16> to vector<16x8xbf16>
    %68 = vector.extract_strided_slice %27 {offsets = [0, 16], sizes = [16, 8], strides = [1, 1]} : vector<16x32xbf16> to vector<16x8xbf16>
    %cst_28 = arith.constant dense<0.000000e+00> : vector<16x16xf32>
    %69 = tpu.matmul %67, %68, %cst_28 {dimension_numbers = #tpu.dot_dimension_numbers<[1], [1], [0], [0], [0, 0, 1, 0], [], []>} : vector<16x8xbf16>, vector<16x8xbf16>, vector<16x16xf32> -> vector<16x16xf32>
    %cst_29 = arith.constant 0.353553385 : f32
    %70 = vector.broadcast %cst_29 : f32 to vector<16x16xf32>
    %71 = arith.mulf %69, %70 : vector<16x16xf32>
    %72 = arith.addf %71, %3 : vector<16x16xf32>
    %cst_30 = arith.constant dense<0xFF800000> : vector<16xf32>
    %73 = vector.multi_reduction <maximumf>, %72, %cst_30 [1] : vector<16x16xf32> to vector<16xf32>
    %74 = vector.shape_cast %73 : vector<16xf32> to vector<16x1xf32>
    %75 = vector.broadcast %74 : vector<16x1xf32> to vector<16x16xf32>
    %76 = arith.subf %72, %75 : vector<16x16xf32>
    %77 = math.exp %76 : vector<16x16xf32>
    %cst_31 = arith.constant dense<0.000000e+00> : vector<16xf32>
    %78 = vector.multi_reduction <add>, %77, %cst_31 [1] : vector<16x16xf32> to vector<16xf32>
    %79 = vector.shape_cast %78 : vector<16xf32> to vector<16x1xf32>
    %80 = tpu.reciprocal %79 {approx = true} : vector<16x1xf32> -> vector<16x1xf32>
    %81 = vector.broadcast %80 : vector<16x1xf32> to vector<16x16xf32>
    %82 = arith.mulf %77, %81 : vector<16x16xf32>
    %83 = arith.truncf %82 : vector<16x16xf32> to vector<16x16xbf16>
    %84 = vector.extract_strided_slice %28 {offsets = [0, 16], sizes = [16, 8], strides = [1, 1]} : vector<16x32xbf16> to vector<16x8xbf16>
    %cst_32 = arith.constant dense<0.000000e+00> : vector<16x8xf32>
    %85 = tpu.matmul %83, %84, %cst_32 {dimension_numbers = #tpu.dot_dimension_numbers<[1], [0], [0], [1], [0, 0, 1, 1], [], []>} : vector<16x16xbf16>, vector<16x8xbf16>, vector<16x8xf32> -> vector<16x8xf32>
    %86 = vector.extract_strided_slice %26 {offsets = [0, 24], sizes = [16, 8], strides = [1, 1]} : vector<16x32xbf16> to vector<16x8xbf16>
    %87 = vector.extract_strided_slice %27 {offsets = [0, 24], sizes = [16, 8], strides = [1, 1]} : vector<16x32xbf16> to vector<16x8xbf16>
    %cst_33 = arith.constant dense<0.000000e+00> : vector<16x16xf32>
    %88 = tpu.matmul %86, %87, %cst_33 {dimension_numbers = #tpu.dot_dimension_numbers<[1], [1], [0], [0], [0, 0, 1, 0], [], []>} : vector<16x8xbf16>, vector<16x8xbf16>, vector<16x16xf32> -> vector<16x16xf32>
    %cst_34 = arith.constant 0.353553385 : f32
    %89 = vector.broadcast %cst_34 : f32 to vector<16x16xf32>
    %90 = arith.mulf %88, %89 : vector<16x16xf32>
    %91 = arith.addf %90, %3 : vector<16x16xf32>
    %cst_35 = arith.constant dense<0xFF800000> : vector<16xf32>
    %92 = vector.multi_reduction <maximumf>, %91, %cst_35 [1] : vector<16x16xf32> to vector<16xf32>
    %93 = vector.shape_cast %92 : vector<16xf32> to vector<16x1xf32>
    %94 = vector.broadcast %93 : vector<16x1xf32> to vector<16x16xf32>
    %95 = arith.subf %91, %94 : vector<16x16xf32>
    %96 = math.exp %95 : vector<16x16xf32>
    %cst_36 = arith.constant dense<0.000000e+00> : vector<16xf32>
    %97 = vector.multi_reduction <add>, %96, %cst_36 [1] : vector<16x16xf32> to vector<16xf32>
    %98 = vector.shape_cast %97 : vector<16xf32> to vector<16x1xf32>
    %99 = tpu.reciprocal %98 {approx = true} : vector<16x1xf32> -> vector<16x1xf32>
    %100 = vector.broadcast %99 : vector<16x1xf32> to vector<16x16xf32>
    %101 = arith.mulf %96, %100 : vector<16x16xf32>
    %102 = arith.truncf %101 : vector<16x16xf32> to vector<16x16xbf16>
    %103 = vector.extract_strided_slice %28 {offsets = [0, 24], sizes = [16, 8], strides = [1, 1]} : vector<16x32xbf16> to vector<16x8xbf16>
    %cst_37 = arith.constant dense<0.000000e+00> : vector<16x8xf32>
    %104 = tpu.matmul %102, %103, %cst_37 {dimension_numbers = #tpu.dot_dimension_numbers<[1], [0], [0], [1], [0, 0, 1, 1], [], []>} : vector<16x16xbf16>, vector<16x8xbf16>, vector<16x8xf32> -> vector<16x8xf32>
    %105 = tpu.concatenate %47, %66, %85, %104 in 1 : vector<16x8xf32>, vector<16x8xf32>, vector<16x8xf32>, vector<16x8xf32> -> vector<16x32xf32>
    %106 = arith.truncf %105 : vector<16x32xf32> to vector<16x32xbf16>
    %cst_38 = arith.constant dense<0.000000e+00> : vector<16x32xf32>
    %107 = tpu.matmul %106, %24, %cst_38 {dimension_numbers = #tpu.dot_dimension_numbers<[1], [0], [0], [1], [0, 0, 1, 1], [], []>} : vector<16x32xbf16>, vector<32x32xbf16>, vector<16x32xf32> -> vector<16x32xf32>
    %108 = vector.broadcast %25 : vector<1x32xf32> to vector<16x32xf32>
    %109 = arith.addf %107, %108 : vector<16x32xf32>
    %110 = arith.addf %0, %109 : vector<16x32xf32>
    %111 = vector.extract_strided_slice %6 {offsets = [4, 0], sizes = [1, 32], strides = [1, 1]} : vector<22x32xf32> to vector<1x32xf32>
    %112 = vector.extract_strided_slice %6 {offsets = [5, 0], sizes = [1, 32], strides = [1, 1]} : vector<22x32xf32> to vector<1x32xf32>
    %cst_39 = arith.constant dense<0.000000e+00> : vector<16xf32>
    %113 = vector.multi_reduction <add>, %110, %cst_39 [1] : vector<16x32xf32> to vector<16xf32>
    %114 = vector.shape_cast %113 : vector<16xf32> to vector<16x1xf32>
    %cst_40 = arith.constant 3.200000e+01 : f32
    %115 = vector.broadcast %cst_40 : f32 to vector<16x1xf32>
    %116 = arith.divf %114, %115 : vector<16x1xf32>
    %117 = vector.broadcast %116 : vector<16x1xf32> to vector<16x32xf32>
    %118 = arith.subf %110, %117 : vector<16x32xf32>
    %119 = arith.mulf %118, %118 : vector<16x32xf32>
    %cst_41 = arith.constant dense<0.000000e+00> : vector<16xf32>
    %120 = vector.multi_reduction <add>, %119, %cst_41 [1] : vector<16x32xf32> to vector<16xf32>
    %121 = vector.shape_cast %120 : vector<16xf32> to vector<16x1xf32>
    %cst_42 = arith.constant 3.200000e+01 : f32
    %122 = vector.broadcast %cst_42 : f32 to vector<16x1xf32>
    %123 = arith.divf %121, %122 : vector<16x1xf32>
    %124 = vector.broadcast %116 : vector<16x1xf32> to vector<16x32xf32>
    %125 = arith.subf %110, %124 : vector<16x32xf32>
    %cst_43 = arith.constant 9.99999974E-6 : f32
    %126 = vector.broadcast %cst_43 : f32 to vector<16x1xf32>
    %127 = arith.addf %123, %126 : vector<16x1xf32>
    %128 = math.rsqrt %127 : vector<16x1xf32>
    %129 = vector.broadcast %128 : vector<16x1xf32> to vector<16x32xf32>
    %130 = arith.mulf %125, %129 : vector<16x32xf32>
    %131 = vector.broadcast %111 : vector<1x32xf32> to vector<16x32xf32>
    %132 = arith.mulf %130, %131 : vector<16x32xf32>
    %133 = vector.broadcast %112 : vector<1x32xf32> to vector<16x32xf32>
    %134 = arith.addf %132, %133 : vector<16x32xf32>
    %135 = arith.truncf %134 : vector<16x32xf32> to vector<16x32xbf16>
    %c0_44 = arith.constant 0 : index
    %c0_45 = arith.constant 0 : index
    %c0_46 = arith.constant 0 : index
    %136 = vector.load %arg4[%c0_44, %c0_45, %c0_46] : memref<2x32x32xbf16, #tpu.memory_space<vmem>>, vector<1x32x32xbf16>
    %137 = vector.shape_cast %136 : vector<1x32x32xbf16> to vector<32x32xbf16>
    %cst_47 = arith.constant dense<0.000000e+00> : vector<16x32xf32>
    %138 = tpu.matmul %135, %137, %cst_47 {dimension_numbers = #tpu.dot_dimension_numbers<[1], [0], [0], [1], [0, 0, 1, 1], [], []>} : vector<16x32xbf16>, vector<32x32xbf16>, vector<16x32xf32> -> vector<16x32xf32>
    %139 = vector.extract_strided_slice %6 {offsets = [0, 0], sizes = [1, 32], strides = [1, 1]} : vector<22x32xf32> to vector<1x32xf32>
    %140 = vector.broadcast %139 : vector<1x32xf32> to vector<16x32xf32>
    %141 = arith.addf %138, %140 : vector<16x32xf32>
    %142 = vector.extract_strided_slice %12 {offsets = [0, 0], sizes = [16, 32], strides = [1, 1]} : vector<16x128xf32> to vector<16x32xf32>
    %143 = vector.extract_strided_slice %12 {offsets = [0, 32], sizes = [16, 32], strides = [1, 1]} : vector<16x128xf32> to vector<16x32xf32>
    %c1 = arith.constant 1 : index
    %c0_48 = arith.constant 0 : index
    %c0_49 = arith.constant 0 : index
    %144 = vector.load %arg6[%c1, %c0_48, %c0_49] : memref<4x32x32xbf16, #tpu.memory_space<vmem>>, vector<1x32x32xbf16>
    %145 = vector.shape_cast %144 : vector<1x32x32xbf16> to vector<32x32xbf16>
    %146 = vector.extract_strided_slice %6 {offsets = [2, 0], sizes = [1, 32], strides = [1, 1]} : vector<22x32xf32> to vector<1x32xf32>
    %147 = arith.truncf %141 : vector<16x32xf32> to vector<16x32xbf16>
    %148 = arith.truncf %142 : vector<16x32xf32> to vector<16x32xbf16>
    %149 = arith.truncf %143 : vector<16x32xf32> to vector<16x32xbf16>
    %150 = vector.extract_strided_slice %147 {offsets = [0, 0], sizes = [16, 8], strides = [1, 1]} : vector<16x32xbf16> to vector<16x8xbf16>
    %151 = vector.extract_strided_slice %148 {offsets = [0, 0], sizes = [16, 8], strides = [1, 1]} : vector<16x32xbf16> to vector<16x8xbf16>
    %cst_50 = arith.constant dense<0.000000e+00> : vector<16x16xf32>
    %152 = tpu.matmul %150, %151, %cst_50 {dimension_numbers = #tpu.dot_dimension_numbers<[1], [1], [0], [0], [0, 0, 1, 0], [], []>} : vector<16x8xbf16>, vector<16x8xbf16>, vector<16x16xf32> -> vector<16x16xf32>
    %cst_51 = arith.constant 0.353553385 : f32
    %153 = vector.broadcast %cst_51 : f32 to vector<16x16xf32>
    %154 = arith.mulf %152, %153 : vector<16x16xf32>
    %155 = arith.addf %154, %4 : vector<16x16xf32>
    %cst_52 = arith.constant dense<0xFF800000> : vector<16xf32>
    %156 = vector.multi_reduction <maximumf>, %155, %cst_52 [1] : vector<16x16xf32> to vector<16xf32>
    %157 = vector.shape_cast %156 : vector<16xf32> to vector<16x1xf32>
    %158 = vector.broadcast %157 : vector<16x1xf32> to vector<16x16xf32>
    %159 = arith.subf %155, %158 : vector<16x16xf32>
    %160 = math.exp %159 : vector<16x16xf32>
    %cst_53 = arith.constant dense<0.000000e+00> : vector<16xf32>
    %161 = vector.multi_reduction <add>, %160, %cst_53 [1] : vector<16x16xf32> to vector<16xf32>
    %162 = vector.shape_cast %161 : vector<16xf32> to vector<16x1xf32>
    %163 = tpu.reciprocal %162 {approx = true} : vector<16x1xf32> -> vector<16x1xf32>
    %164 = vector.broadcast %163 : vector<16x1xf32> to vector<16x16xf32>
    %165 = arith.mulf %160, %164 : vector<16x16xf32>
    %166 = arith.truncf %165 : vector<16x16xf32> to vector<16x16xbf16>
    %167 = vector.extract_strided_slice %149 {offsets = [0, 0], sizes = [16, 8], strides = [1, 1]} : vector<16x32xbf16> to vector<16x8xbf16>
    %cst_54 = arith.constant dense<0.000000e+00> : vector<16x8xf32>
    %168 = tpu.matmul %166, %167, %cst_54 {dimension_numbers = #tpu.dot_dimension_numbers<[1], [0], [0], [1], [0, 0, 1, 1], [], []>} : vector<16x16xbf16>, vector<16x8xbf16>, vector<16x8xf32> -> vector<16x8xf32>
    %169 = vector.extract_strided_slice %147 {offsets = [0, 8], sizes = [16, 8], strides = [1, 1]} : vector<16x32xbf16> to vector<16x8xbf16>
    %170 = vector.extract_strided_slice %148 {offsets = [0, 8], sizes = [16, 8], strides = [1, 1]} : vector<16x32xbf16> to vector<16x8xbf16>
    %cst_55 = arith.constant dense<0.000000e+00> : vector<16x16xf32>
    %171 = tpu.matmul %169, %170, %cst_55 {dimension_numbers = #tpu.dot_dimension_numbers<[1], [1], [0], [0], [0, 0, 1, 0], [], []>} : vector<16x8xbf16>, vector<16x8xbf16>, vector<16x16xf32> -> vector<16x16xf32>
    %cst_56 = arith.constant 0.353553385 : f32
    %172 = vector.broadcast %cst_56 : f32 to vector<16x16xf32>
    %173 = arith.mulf %171, %172 : vector<16x16xf32>
    %174 = arith.addf %173, %4 : vector<16x16xf32>
    %cst_57 = arith.constant dense<0xFF800000> : vector<16xf32>
    %175 = vector.multi_reduction <maximumf>, %174, %cst_57 [1] : vector<16x16xf32> to vector<16xf32>
    %176 = vector.shape_cast %175 : vector<16xf32> to vector<16x1xf32>
    %177 = vector.broadcast %176 : vector<16x1xf32> to vector<16x16xf32>
    %178 = arith.subf %174, %177 : vector<16x16xf32>
    %179 = math.exp %178 : vector<16x16xf32>
    %cst_58 = arith.constant dense<0.000000e+00> : vector<16xf32>
    %180 = vector.multi_reduction <add>, %179, %cst_58 [1] : vector<16x16xf32> to vector<16xf32>
    %181 = vector.shape_cast %180 : vector<16xf32> to vector<16x1xf32>
    %182 = tpu.reciprocal %181 {approx = true} : vector<16x1xf32> -> vector<16x1xf32>
    %183 = vector.broadcast %182 : vector<16x1xf32> to vector<16x16xf32>
    %184 = arith.mulf %179, %183 : vector<16x16xf32>
    %185 = arith.truncf %184 : vector<16x16xf32> to vector<16x16xbf16>
    %186 = vector.extract_strided_slice %149 {offsets = [0, 8], sizes = [16, 8], strides = [1, 1]} : vector<16x32xbf16> to vector<16x8xbf16>
    %cst_59 = arith.constant dense<0.000000e+00> : vector<16x8xf32>
    %187 = tpu.matmul %185, %186, %cst_59 {dimension_numbers = #tpu.dot_dimension_numbers<[1], [0], [0], [1], [0, 0, 1, 1], [], []>} : vector<16x16xbf16>, vector<16x8xbf16>, vector<16x8xf32> -> vector<16x8xf32>
    %188 = vector.extract_strided_slice %147 {offsets = [0, 16], sizes = [16, 8], strides = [1, 1]} : vector<16x32xbf16> to vector<16x8xbf16>
    %189 = vector.extract_strided_slice %148 {offsets = [0, 16], sizes = [16, 8], strides = [1, 1]} : vector<16x32xbf16> to vector<16x8xbf16>
    %cst_60 = arith.constant dense<0.000000e+00> : vector<16x16xf32>
    %190 = tpu.matmul %188, %189, %cst_60 {dimension_numbers = #tpu.dot_dimension_numbers<[1], [1], [0], [0], [0, 0, 1, 0], [], []>} : vector<16x8xbf16>, vector<16x8xbf16>, vector<16x16xf32> -> vector<16x16xf32>
    %cst_61 = arith.constant 0.353553385 : f32
    %191 = vector.broadcast %cst_61 : f32 to vector<16x16xf32>
    %192 = arith.mulf %190, %191 : vector<16x16xf32>
    %193 = arith.addf %192, %4 : vector<16x16xf32>
    %cst_62 = arith.constant dense<0xFF800000> : vector<16xf32>
    %194 = vector.multi_reduction <maximumf>, %193, %cst_62 [1] : vector<16x16xf32> to vector<16xf32>
    %195 = vector.shape_cast %194 : vector<16xf32> to vector<16x1xf32>
    %196 = vector.broadcast %195 : vector<16x1xf32> to vector<16x16xf32>
    %197 = arith.subf %193, %196 : vector<16x16xf32>
    %198 = math.exp %197 : vector<16x16xf32>
    %cst_63 = arith.constant dense<0.000000e+00> : vector<16xf32>
    %199 = vector.multi_reduction <add>, %198, %cst_63 [1] : vector<16x16xf32> to vector<16xf32>
    %200 = vector.shape_cast %199 : vector<16xf32> to vector<16x1xf32>
    %201 = tpu.reciprocal %200 {approx = true} : vector<16x1xf32> -> vector<16x1xf32>
    %202 = vector.broadcast %201 : vector<16x1xf32> to vector<16x16xf32>
    %203 = arith.mulf %198, %202 : vector<16x16xf32>
    %204 = arith.truncf %203 : vector<16x16xf32> to vector<16x16xbf16>
    %205 = vector.extract_strided_slice %149 {offsets = [0, 16], sizes = [16, 8], strides = [1, 1]} : vector<16x32xbf16> to vector<16x8xbf16>
    %cst_64 = arith.constant dense<0.000000e+00> : vector<16x8xf32>
    %206 = tpu.matmul %204, %205, %cst_64 {dimension_numbers = #tpu.dot_dimension_numbers<[1], [0], [0], [1], [0, 0, 1, 1], [], []>} : vector<16x16xbf16>, vector<16x8xbf16>, vector<16x8xf32> -> vector<16x8xf32>
    %207 = vector.extract_strided_slice %147 {offsets = [0, 24], sizes = [16, 8], strides = [1, 1]} : vector<16x32xbf16> to vector<16x8xbf16>
    %208 = vector.extract_strided_slice %148 {offsets = [0, 24], sizes = [16, 8], strides = [1, 1]} : vector<16x32xbf16> to vector<16x8xbf16>
    %cst_65 = arith.constant dense<0.000000e+00> : vector<16x16xf32>
    %209 = tpu.matmul %207, %208, %cst_65 {dimension_numbers = #tpu.dot_dimension_numbers<[1], [1], [0], [0], [0, 0, 1, 0], [], []>} : vector<16x8xbf16>, vector<16x8xbf16>, vector<16x16xf32> -> vector<16x16xf32>
    %cst_66 = arith.constant 0.353553385 : f32
    %210 = vector.broadcast %cst_66 : f32 to vector<16x16xf32>
    %211 = arith.mulf %209, %210 : vector<16x16xf32>
    %212 = arith.addf %211, %4 : vector<16x16xf32>
    %cst_67 = arith.constant dense<0xFF800000> : vector<16xf32>
    %213 = vector.multi_reduction <maximumf>, %212, %cst_67 [1] : vector<16x16xf32> to vector<16xf32>
    %214 = vector.shape_cast %213 : vector<16xf32> to vector<16x1xf32>
    %215 = vector.broadcast %214 : vector<16x1xf32> to vector<16x16xf32>
    %216 = arith.subf %212, %215 : vector<16x16xf32>
    %217 = math.exp %216 : vector<16x16xf32>
    %cst_68 = arith.constant dense<0.000000e+00> : vector<16xf32>
    %218 = vector.multi_reduction <add>, %217, %cst_68 [1] : vector<16x16xf32> to vector<16xf32>
    %219 = vector.shape_cast %218 : vector<16xf32> to vector<16x1xf32>
    %220 = tpu.reciprocal %219 {approx = true} : vector<16x1xf32> -> vector<16x1xf32>
    %221 = vector.broadcast %220 : vector<16x1xf32> to vector<16x16xf32>
    %222 = arith.mulf %217, %221 : vector<16x16xf32>
    %223 = arith.truncf %222 : vector<16x16xf32> to vector<16x16xbf16>
    %224 = vector.extract_strided_slice %149 {offsets = [0, 24], sizes = [16, 8], strides = [1, 1]} : vector<16x32xbf16> to vector<16x8xbf16>
    %cst_69 = arith.constant dense<0.000000e+00> : vector<16x8xf32>
    %225 = tpu.matmul %223, %224, %cst_69 {dimension_numbers = #tpu.dot_dimension_numbers<[1], [0], [0], [1], [0, 0, 1, 1], [], []>} : vector<16x16xbf16>, vector<16x8xbf16>, vector<16x8xf32> -> vector<16x8xf32>
    %226 = tpu.concatenate %168, %187, %206, %225 in 1 : vector<16x8xf32>, vector<16x8xf32>, vector<16x8xf32>, vector<16x8xf32> -> vector<16x32xf32>
    %227 = arith.truncf %226 : vector<16x32xf32> to vector<16x32xbf16>
    %cst_70 = arith.constant dense<0.000000e+00> : vector<16x32xf32>
    %228 = tpu.matmul %227, %145, %cst_70 {dimension_numbers = #tpu.dot_dimension_numbers<[1], [0], [0], [1], [0, 0, 1, 1], [], []>} : vector<16x32xbf16>, vector<32x32xbf16>, vector<16x32xf32> -> vector<16x32xf32>
    %229 = vector.broadcast %146 : vector<1x32xf32> to vector<16x32xf32>
    %230 = arith.addf %228, %229 : vector<16x32xf32>
    %231 = arith.addf %134, %230 : vector<16x32xf32>
    %232 = vector.extract_strided_slice %6 {offsets = [6, 0], sizes = [1, 32], strides = [1, 1]} : vector<22x32xf32> to vector<1x32xf32>
    %233 = vector.extract_strided_slice %6 {offsets = [7, 0], sizes = [1, 32], strides = [1, 1]} : vector<22x32xf32> to vector<1x32xf32>
    %cst_71 = arith.constant dense<0.000000e+00> : vector<16xf32>
    %234 = vector.multi_reduction <add>, %231, %cst_71 [1] : vector<16x32xf32> to vector<16xf32>
    %235 = vector.shape_cast %234 : vector<16xf32> to vector<16x1xf32>
    %cst_72 = arith.constant 3.200000e+01 : f32
    %236 = vector.broadcast %cst_72 : f32 to vector<16x1xf32>
    %237 = arith.divf %235, %236 : vector<16x1xf32>
    %238 = vector.broadcast %237 : vector<16x1xf32> to vector<16x32xf32>
    %239 = arith.subf %231, %238 : vector<16x32xf32>
    %240 = arith.mulf %239, %239 : vector<16x32xf32>
    %cst_73 = arith.constant dense<0.000000e+00> : vector<16xf32>
    %241 = vector.multi_reduction <add>, %240, %cst_73 [1] : vector<16x32xf32> to vector<16xf32>
    %242 = vector.shape_cast %241 : vector<16xf32> to vector<16x1xf32>
    %cst_74 = arith.constant 3.200000e+01 : f32
    %243 = vector.broadcast %cst_74 : f32 to vector<16x1xf32>
    %244 = arith.divf %242, %243 : vector<16x1xf32>
    %245 = vector.broadcast %237 : vector<16x1xf32> to vector<16x32xf32>
    %246 = arith.subf %231, %245 : vector<16x32xf32>
    %cst_75 = arith.constant 9.99999974E-6 : f32
    %247 = vector.broadcast %cst_75 : f32 to vector<16x1xf32>
    %248 = arith.addf %244, %247 : vector<16x1xf32>
    %249 = math.rsqrt %248 : vector<16x1xf32>
    %250 = vector.broadcast %249 : vector<16x1xf32> to vector<16x32xf32>
    %251 = arith.mulf %246, %250 : vector<16x32xf32>
    %252 = vector.broadcast %232 : vector<1x32xf32> to vector<16x32xf32>
    %253 = arith.mulf %251, %252 : vector<16x32xf32>
    %254 = vector.broadcast %233 : vector<1x32xf32> to vector<16x32xf32>
    %255 = arith.addf %253, %254 : vector<16x32xf32>
    %256 = arith.truncf %255 : vector<16x32xf32> to vector<16x32xbf16>
    %c0_76 = arith.constant 0 : index
    %c0_77 = arith.constant 0 : index
    %c0_78 = arith.constant 0 : index
    %257 = vector.load %arg7[%c0_76, %c0_77, %c0_78] : memref<2x32x64xbf16, #tpu.memory_space<vmem>>, vector<1x32x64xbf16>
    %258 = vector.shape_cast %257 : vector<1x32x64xbf16> to vector<32x64xbf16>
    %cst_79 = arith.constant dense<0.000000e+00> : vector<16x64xf32>
    %259 = tpu.matmul %256, %258, %cst_79 {dimension_numbers = #tpu.dot_dimension_numbers<[1], [0], [0], [1], [0, 0, 1, 1], [], []>} : vector<16x32xbf16>, vector<32x64xbf16>, vector<16x64xf32> -> vector<16x64xf32>
    %260 = vector.extract_strided_slice %5 {offsets = [2, 0], sizes = [1, 64], strides = [1, 1]} : vector<5x128xf32> to vector<1x64xf32>
    %261 = vector.broadcast %260 : vector<1x64xf32> to vector<16x64xf32>
    %262 = arith.addf %259, %261 : vector<16x64xf32>
    %cst_80 = arith.constant 0.000000e+00 : f32
    %263 = vector.broadcast %cst_80 : f32 to vector<16x64xf32>
    %264 = arith.maximumf %262, %263 : vector<16x64xf32>
    %265 = arith.truncf %264 : vector<16x64xf32> to vector<16x64xbf16>
    %c0_81 = arith.constant 0 : index
    %c0_82 = arith.constant 0 : index
    %c0_83 = arith.constant 0 : index
    %266 = vector.load %arg8[%c0_81, %c0_82, %c0_83] : memref<2x64x32xbf16, #tpu.memory_space<vmem>>, vector<1x64x32xbf16>
    %267 = vector.shape_cast %266 : vector<1x64x32xbf16> to vector<64x32xbf16>
    %cst_84 = arith.constant dense<0.000000e+00> : vector<16x32xf32>
    %268 = tpu.matmul %265, %267, %cst_84 {dimension_numbers = #tpu.dot_dimension_numbers<[1], [0], [0], [1], [0, 0, 1, 1], [], []>} : vector<16x64xbf16>, vector<64x32xbf16>, vector<16x32xf32> -> vector<16x32xf32>
    %269 = vector.extract_strided_slice %6 {offsets = [3, 0], sizes = [1, 32], strides = [1, 1]} : vector<22x32xf32> to vector<1x32xf32>
    %270 = vector.broadcast %269 : vector<1x32xf32> to vector<16x32xf32>
    %271 = arith.addf %268, %270 : vector<16x32xf32>
    %272 = arith.addf %255, %271 : vector<16x32xf32>
    %273 = vector.extract_strided_slice %6 {offsets = [8, 0], sizes = [1, 32], strides = [1, 1]} : vector<22x32xf32> to vector<1x32xf32>
    %274 = vector.extract_strided_slice %6 {offsets = [9, 0], sizes = [1, 32], strides = [1, 1]} : vector<22x32xf32> to vector<1x32xf32>
    %cst_85 = arith.constant dense<0.000000e+00> : vector<16xf32>
    %275 = vector.multi_reduction <add>, %272, %cst_85 [1] : vector<16x32xf32> to vector<16xf32>
    %276 = vector.shape_cast %275 : vector<16xf32> to vector<16x1xf32>
    %cst_86 = arith.constant 3.200000e+01 : f32
    %277 = vector.broadcast %cst_86 : f32 to vector<16x1xf32>
    %278 = arith.divf %276, %277 : vector<16x1xf32>
    %279 = vector.broadcast %278 : vector<16x1xf32> to vector<16x32xf32>
    %280 = arith.subf %272, %279 : vector<16x32xf32>
    %281 = arith.mulf %280, %280 : vector<16x32xf32>
    %cst_87 = arith.constant dense<0.000000e+00> : vector<16xf32>
    %282 = vector.multi_reduction <add>, %281, %cst_87 [1] : vector<16x32xf32> to vector<16xf32>
    %283 = vector.shape_cast %282 : vector<16xf32> to vector<16x1xf32>
    %cst_88 = arith.constant 3.200000e+01 : f32
    %284 = vector.broadcast %cst_88 : f32 to vector<16x1xf32>
    %285 = arith.divf %283, %284 : vector<16x1xf32>
    %286 = vector.broadcast %278 : vector<16x1xf32> to vector<16x32xf32>
    %287 = arith.subf %272, %286 : vector<16x32xf32>
    %cst_89 = arith.constant 9.99999974E-6 : f32
    %288 = vector.broadcast %cst_89 : f32 to vector<16x1xf32>
    %289 = arith.addf %285, %288 : vector<16x1xf32>
    %290 = math.rsqrt %289 : vector<16x1xf32>
    %291 = vector.broadcast %290 : vector<16x1xf32> to vector<16x32xf32>
    %292 = arith.mulf %287, %291 : vector<16x32xf32>
    %293 = vector.broadcast %273 : vector<1x32xf32> to vector<16x32xf32>
    %294 = arith.mulf %292, %293 : vector<16x32xf32>
    %295 = vector.broadcast %274 : vector<1x32xf32> to vector<16x32xf32>
    %296 = arith.addf %294, %295 : vector<16x32xf32>
    %297 = arith.truncf %296 : vector<16x32xf32> to vector<16x32xbf16>
    %c1_90 = arith.constant 1 : index
    %c0_91 = arith.constant 0 : index
    %c0_92 = arith.constant 0 : index
    %298 = vector.load %arg3[%c1_90, %c0_91, %c0_92] : memref<2x32x96xbf16, #tpu.memory_space<vmem>>, vector<1x32x96xbf16>
    %299 = vector.shape_cast %298 : vector<1x32x96xbf16> to vector<32x96xbf16>
    %cst_93 = arith.constant dense<0.000000e+00> : vector<16x96xf32>
    %300 = tpu.matmul %297, %299, %cst_93 {dimension_numbers = #tpu.dot_dimension_numbers<[1], [0], [0], [1], [0, 0, 1, 1], [], []>} : vector<16x32xbf16>, vector<32x96xbf16>, vector<16x96xf32> -> vector<16x96xf32>
    %301 = vector.extract_strided_slice %5 {offsets = [1, 0], sizes = [1, 96], strides = [1, 1]} : vector<5x128xf32> to vector<1x96xf32>
    %302 = vector.broadcast %301 : vector<1x96xf32> to vector<16x96xf32>
    %303 = arith.addf %300, %302 : vector<16x96xf32>
    %304 = vector.extract_strided_slice %303 {offsets = [0, 0], sizes = [16, 32], strides = [1, 1]} : vector<16x96xf32> to vector<16x32xf32>
    %305 = vector.extract_strided_slice %303 {offsets = [0, 32], sizes = [16, 32], strides = [1, 1]} : vector<16x96xf32> to vector<16x32xf32>
    %306 = vector.extract_strided_slice %303 {offsets = [0, 64], sizes = [16, 32], strides = [1, 1]} : vector<16x96xf32> to vector<16x32xf32>
    %c2 = arith.constant 2 : index
    %c0_94 = arith.constant 0 : index
    %c0_95 = arith.constant 0 : index
    %307 = vector.load %arg6[%c2, %c0_94, %c0_95] : memref<4x32x32xbf16, #tpu.memory_space<vmem>>, vector<1x32x32xbf16>
    %308 = vector.shape_cast %307 : vector<1x32x32xbf16> to vector<32x32xbf16>
    %309 = vector.extract_strided_slice %6 {offsets = [11, 0], sizes = [1, 32], strides = [1, 1]} : vector<22x32xf32> to vector<1x32xf32>
    %310 = arith.truncf %304 : vector<16x32xf32> to vector<16x32xbf16>
    %311 = arith.truncf %305 : vector<16x32xf32> to vector<16x32xbf16>
    %312 = arith.truncf %306 : vector<16x32xf32> to vector<16x32xbf16>
    %313 = vector.extract_strided_slice %310 {offsets = [0, 0], sizes = [16, 8], strides = [1, 1]} : vector<16x32xbf16> to vector<16x8xbf16>
    %314 = vector.extract_strided_slice %311 {offsets = [0, 0], sizes = [16, 8], strides = [1, 1]} : vector<16x32xbf16> to vector<16x8xbf16>
    %cst_96 = arith.constant dense<0.000000e+00> : vector<16x16xf32>
    %315 = tpu.matmul %313, %314, %cst_96 {dimension_numbers = #tpu.dot_dimension_numbers<[1], [1], [0], [0], [0, 0, 1, 0], [], []>} : vector<16x8xbf16>, vector<16x8xbf16>, vector<16x16xf32> -> vector<16x16xf32>
    %cst_97 = arith.constant 0.353553385 : f32
    %316 = vector.broadcast %cst_97 : f32 to vector<16x16xf32>
    %317 = arith.mulf %315, %316 : vector<16x16xf32>
    %318 = arith.addf %317, %3 : vector<16x16xf32>
    %cst_98 = arith.constant dense<0xFF800000> : vector<16xf32>
    %319 = vector.multi_reduction <maximumf>, %318, %cst_98 [1] : vector<16x16xf32> to vector<16xf32>
    %320 = vector.shape_cast %319 : vector<16xf32> to vector<16x1xf32>
    %321 = vector.broadcast %320 : vector<16x1xf32> to vector<16x16xf32>
    %322 = arith.subf %318, %321 : vector<16x16xf32>
    %323 = math.exp %322 : vector<16x16xf32>
    %cst_99 = arith.constant dense<0.000000e+00> : vector<16xf32>
    %324 = vector.multi_reduction <add>, %323, %cst_99 [1] : vector<16x16xf32> to vector<16xf32>
    %325 = vector.shape_cast %324 : vector<16xf32> to vector<16x1xf32>
    %326 = tpu.reciprocal %325 {approx = true} : vector<16x1xf32> -> vector<16x1xf32>
    %327 = vector.broadcast %326 : vector<16x1xf32> to vector<16x16xf32>
    %328 = arith.mulf %323, %327 : vector<16x16xf32>
    %329 = arith.truncf %328 : vector<16x16xf32> to vector<16x16xbf16>
    %330 = vector.extract_strided_slice %312 {offsets = [0, 0], sizes = [16, 8], strides = [1, 1]} : vector<16x32xbf16> to vector<16x8xbf16>
    %cst_100 = arith.constant dense<0.000000e+00> : vector<16x8xf32>
    %331 = tpu.matmul %329, %330, %cst_100 {dimension_numbers = #tpu.dot_dimension_numbers<[1], [0], [0], [1], [0, 0, 1, 1], [], []>} : vector<16x16xbf16>, vector<16x8xbf16>, vector<16x8xf32> -> vector<16x8xf32>
    %332 = vector.extract_strided_slice %310 {offsets = [0, 8], sizes = [16, 8], strides = [1, 1]} : vector<16x32xbf16> to vector<16x8xbf16>
    %333 = vector.extract_strided_slice %311 {offsets = [0, 8], sizes = [16, 8], strides = [1, 1]} : vector<16x32xbf16> to vector<16x8xbf16>
    %cst_101 = arith.constant dense<0.000000e+00> : vector<16x16xf32>
    %334 = tpu.matmul %332, %333, %cst_101 {dimension_numbers = #tpu.dot_dimension_numbers<[1], [1], [0], [0], [0, 0, 1, 0], [], []>} : vector<16x8xbf16>, vector<16x8xbf16>, vector<16x16xf32> -> vector<16x16xf32>
    %cst_102 = arith.constant 0.353553385 : f32
    %335 = vector.broadcast %cst_102 : f32 to vector<16x16xf32>
    %336 = arith.mulf %334, %335 : vector<16x16xf32>
    %337 = arith.addf %336, %3 : vector<16x16xf32>
    %cst_103 = arith.constant dense<0xFF800000> : vector<16xf32>
    %338 = vector.multi_reduction <maximumf>, %337, %cst_103 [1] : vector<16x16xf32> to vector<16xf32>
    %339 = vector.shape_cast %338 : vector<16xf32> to vector<16x1xf32>
    %340 = vector.broadcast %339 : vector<16x1xf32> to vector<16x16xf32>
    %341 = arith.subf %337, %340 : vector<16x16xf32>
    %342 = math.exp %341 : vector<16x16xf32>
    %cst_104 = arith.constant dense<0.000000e+00> : vector<16xf32>
    %343 = vector.multi_reduction <add>, %342, %cst_104 [1] : vector<16x16xf32> to vector<16xf32>
    %344 = vector.shape_cast %343 : vector<16xf32> to vector<16x1xf32>
    %345 = tpu.reciprocal %344 {approx = true} : vector<16x1xf32> -> vector<16x1xf32>
    %346 = vector.broadcast %345 : vector<16x1xf32> to vector<16x16xf32>
    %347 = arith.mulf %342, %346 : vector<16x16xf32>
    %348 = arith.truncf %347 : vector<16x16xf32> to vector<16x16xbf16>
    %349 = vector.extract_strided_slice %312 {offsets = [0, 8], sizes = [16, 8], strides = [1, 1]} : vector<16x32xbf16> to vector<16x8xbf16>
    %cst_105 = arith.constant dense<0.000000e+00> : vector<16x8xf32>
    %350 = tpu.matmul %348, %349, %cst_105 {dimension_numbers = #tpu.dot_dimension_numbers<[1], [0], [0], [1], [0, 0, 1, 1], [], []>} : vector<16x16xbf16>, vector<16x8xbf16>, vector<16x8xf32> -> vector<16x8xf32>
    %351 = vector.extract_strided_slice %310 {offsets = [0, 16], sizes = [16, 8], strides = [1, 1]} : vector<16x32xbf16> to vector<16x8xbf16>
    %352 = vector.extract_strided_slice %311 {offsets = [0, 16], sizes = [16, 8], strides = [1, 1]} : vector<16x32xbf16> to vector<16x8xbf16>
    %cst_106 = arith.constant dense<0.000000e+00> : vector<16x16xf32>
    %353 = tpu.matmul %351, %352, %cst_106 {dimension_numbers = #tpu.dot_dimension_numbers<[1], [1], [0], [0], [0, 0, 1, 0], [], []>} : vector<16x8xbf16>, vector<16x8xbf16>, vector<16x16xf32> -> vector<16x16xf32>
    %cst_107 = arith.constant 0.353553385 : f32
    %354 = vector.broadcast %cst_107 : f32 to vector<16x16xf32>
    %355 = arith.mulf %353, %354 : vector<16x16xf32>
    %356 = arith.addf %355, %3 : vector<16x16xf32>
    %cst_108 = arith.constant dense<0xFF800000> : vector<16xf32>
    %357 = vector.multi_reduction <maximumf>, %356, %cst_108 [1] : vector<16x16xf32> to vector<16xf32>
    %358 = vector.shape_cast %357 : vector<16xf32> to vector<16x1xf32>
    %359 = vector.broadcast %358 : vector<16x1xf32> to vector<16x16xf32>
    %360 = arith.subf %356, %359 : vector<16x16xf32>
    %361 = math.exp %360 : vector<16x16xf32>
    %cst_109 = arith.constant dense<0.000000e+00> : vector<16xf32>
    %362 = vector.multi_reduction <add>, %361, %cst_109 [1] : vector<16x16xf32> to vector<16xf32>
    %363 = vector.shape_cast %362 : vector<16xf32> to vector<16x1xf32>
    %364 = tpu.reciprocal %363 {approx = true} : vector<16x1xf32> -> vector<16x1xf32>
    %365 = vector.broadcast %364 : vector<16x1xf32> to vector<16x16xf32>
    %366 = arith.mulf %361, %365 : vector<16x16xf32>
    %367 = arith.truncf %366 : vector<16x16xf32> to vector<16x16xbf16>
    %368 = vector.extract_strided_slice %312 {offsets = [0, 16], sizes = [16, 8], strides = [1, 1]} : vector<16x32xbf16> to vector<16x8xbf16>
    %cst_110 = arith.constant dense<0.000000e+00> : vector<16x8xf32>
    %369 = tpu.matmul %367, %368, %cst_110 {dimension_numbers = #tpu.dot_dimension_numbers<[1], [0], [0], [1], [0, 0, 1, 1], [], []>} : vector<16x16xbf16>, vector<16x8xbf16>, vector<16x8xf32> -> vector<16x8xf32>
    %370 = vector.extract_strided_slice %310 {offsets = [0, 24], sizes = [16, 8], strides = [1, 1]} : vector<16x32xbf16> to vector<16x8xbf16>
    %371 = vector.extract_strided_slice %311 {offsets = [0, 24], sizes = [16, 8], strides = [1, 1]} : vector<16x32xbf16> to vector<16x8xbf16>
    %cst_111 = arith.constant dense<0.000000e+00> : vector<16x16xf32>
    %372 = tpu.matmul %370, %371, %cst_111 {dimension_numbers = #tpu.dot_dimension_numbers<[1], [1], [0], [0], [0, 0, 1, 0], [], []>} : vector<16x8xbf16>, vector<16x8xbf16>, vector<16x16xf32> -> vector<16x16xf32>
    %cst_112 = arith.constant 0.353553385 : f32
    %373 = vector.broadcast %cst_112 : f32 to vector<16x16xf32>
    %374 = arith.mulf %372, %373 : vector<16x16xf32>
    %375 = arith.addf %374, %3 : vector<16x16xf32>
    %cst_113 = arith.constant dense<0xFF800000> : vector<16xf32>
    %376 = vector.multi_reduction <maximumf>, %375, %cst_113 [1] : vector<16x16xf32> to vector<16xf32>
    %377 = vector.shape_cast %376 : vector<16xf32> to vector<16x1xf32>
    %378 = vector.broadcast %377 : vector<16x1xf32> to vector<16x16xf32>
    %379 = arith.subf %375, %378 : vector<16x16xf32>
    %380 = math.exp %379 : vector<16x16xf32>
    %cst_114 = arith.constant dense<0.000000e+00> : vector<16xf32>
    %381 = vector.multi_reduction <add>, %380, %cst_114 [1] : vector<16x16xf32> to vector<16xf32>
    %382 = vector.shape_cast %381 : vector<16xf32> to vector<16x1xf32>
    %383 = tpu.reciprocal %382 {approx = true} : vector<16x1xf32> -> vector<16x1xf32>
    %384 = vector.broadcast %383 : vector<16x1xf32> to vector<16x16xf32>
    %385 = arith.mulf %380, %384 : vector<16x16xf32>
    %386 = arith.truncf %385 : vector<16x16xf32> to vector<16x16xbf16>
    %387 = vector.extract_strided_slice %312 {offsets = [0, 24], sizes = [16, 8], strides = [1, 1]} : vector<16x32xbf16> to vector<16x8xbf16>
    %cst_115 = arith.constant dense<0.000000e+00> : vector<16x8xf32>
    %388 = tpu.matmul %386, %387, %cst_115 {dimension_numbers = #tpu.dot_dimension_numbers<[1], [0], [0], [1], [0, 0, 1, 1], [], []>} : vector<16x16xbf16>, vector<16x8xbf16>, vector<16x8xf32> -> vector<16x8xf32>
    %389 = tpu.concatenate %331, %350, %369, %388 in 1 : vector<16x8xf32>, vector<16x8xf32>, vector<16x8xf32>, vector<16x8xf32> -> vector<16x32xf32>
    %390 = arith.truncf %389 : vector<16x32xf32> to vector<16x32xbf16>
    %cst_116 = arith.constant dense<0.000000e+00> : vector<16x32xf32>
    %391 = tpu.matmul %390, %308, %cst_116 {dimension_numbers = #tpu.dot_dimension_numbers<[1], [0], [0], [1], [0, 0, 1, 1], [], []>} : vector<16x32xbf16>, vector<32x32xbf16>, vector<16x32xf32> -> vector<16x32xf32>
    %392 = vector.broadcast %309 : vector<1x32xf32> to vector<16x32xf32>
    %393 = arith.addf %391, %392 : vector<16x32xf32>
    %394 = arith.addf %296, %393 : vector<16x32xf32>
    %395 = vector.extract_strided_slice %6 {offsets = [14, 0], sizes = [1, 32], strides = [1, 1]} : vector<22x32xf32> to vector<1x32xf32>
    %396 = vector.extract_strided_slice %6 {offsets = [15, 0], sizes = [1, 32], strides = [1, 1]} : vector<22x32xf32> to vector<1x32xf32>
    %cst_117 = arith.constant dense<0.000000e+00> : vector<16xf32>
    %397 = vector.multi_reduction <add>, %394, %cst_117 [1] : vector<16x32xf32> to vector<16xf32>
    %398 = vector.shape_cast %397 : vector<16xf32> to vector<16x1xf32>
    %cst_118 = arith.constant 3.200000e+01 : f32
    %399 = vector.broadcast %cst_118 : f32 to vector<16x1xf32>
    %400 = arith.divf %398, %399 : vector<16x1xf32>
    %401 = vector.broadcast %400 : vector<16x1xf32> to vector<16x32xf32>
    %402 = arith.subf %394, %401 : vector<16x32xf32>
    %403 = arith.mulf %402, %402 : vector<16x32xf32>
    %cst_119 = arith.constant dense<0.000000e+00> : vector<16xf32>
    %404 = vector.multi_reduction <add>, %403, %cst_119 [1] : vector<16x32xf32> to vector<16xf32>
    %405 = vector.shape_cast %404 : vector<16xf32> to vector<16x1xf32>
    %cst_120 = arith.constant 3.200000e+01 : f32
    %406 = vector.broadcast %cst_120 : f32 to vector<16x1xf32>
    %407 = arith.divf %405, %406 : vector<16x1xf32>
    %408 = vector.broadcast %400 : vector<16x1xf32> to vector<16x32xf32>
    %409 = arith.subf %394, %408 : vector<16x32xf32>
    %cst_121 = arith.constant 9.99999974E-6 : f32
    %410 = vector.broadcast %cst_121 : f32 to vector<16x1xf32>
    %411 = arith.addf %407, %410 : vector<16x1xf32>
    %412 = math.rsqrt %411 : vector<16x1xf32>
    %413 = vector.broadcast %412 : vector<16x1xf32> to vector<16x32xf32>
    %414 = arith.mulf %409, %413 : vector<16x32xf32>
    %415 = vector.broadcast %395 : vector<1x32xf32> to vector<16x32xf32>
    %416 = arith.mulf %414, %415 : vector<16x32xf32>
    %417 = vector.broadcast %396 : vector<1x32xf32> to vector<16x32xf32>
    %418 = arith.addf %416, %417 : vector<16x32xf32>
    %419 = arith.truncf %418 : vector<16x32xf32> to vector<16x32xbf16>
    %c1_122 = arith.constant 1 : index
    %c0_123 = arith.constant 0 : index
    %c0_124 = arith.constant 0 : index
    %420 = vector.load %arg4[%c1_122, %c0_123, %c0_124] : memref<2x32x32xbf16, #tpu.memory_space<vmem>>, vector<1x32x32xbf16>
    %421 = vector.shape_cast %420 : vector<1x32x32xbf16> to vector<32x32xbf16>
    %cst_125 = arith.constant dense<0.000000e+00> : vector<16x32xf32>
    %422 = tpu.matmul %419, %421, %cst_125 {dimension_numbers = #tpu.dot_dimension_numbers<[1], [0], [0], [1], [0, 0, 1, 1], [], []>} : vector<16x32xbf16>, vector<32x32xbf16>, vector<16x32xf32> -> vector<16x32xf32>
    %423 = vector.extract_strided_slice %6 {offsets = [10, 0], sizes = [1, 32], strides = [1, 1]} : vector<22x32xf32> to vector<1x32xf32>
    %424 = vector.broadcast %423 : vector<1x32xf32> to vector<16x32xf32>
    %425 = arith.addf %422, %424 : vector<16x32xf32>
    %426 = vector.extract_strided_slice %12 {offsets = [0, 64], sizes = [16, 32], strides = [1, 1]} : vector<16x128xf32> to vector<16x32xf32>
    %427 = vector.extract_strided_slice %12 {offsets = [0, 96], sizes = [16, 32], strides = [1, 1]} : vector<16x128xf32> to vector<16x32xf32>
    %c3 = arith.constant 3 : index
    %c0_126 = arith.constant 0 : index
    %c0_127 = arith.constant 0 : index
    %428 = vector.load %arg6[%c3, %c0_126, %c0_127] : memref<4x32x32xbf16, #tpu.memory_space<vmem>>, vector<1x32x32xbf16>
    %429 = vector.shape_cast %428 : vector<1x32x32xbf16> to vector<32x32xbf16>
    %430 = vector.extract_strided_slice %6 {offsets = [12, 0], sizes = [1, 32], strides = [1, 1]} : vector<22x32xf32> to vector<1x32xf32>
    %431 = arith.truncf %425 : vector<16x32xf32> to vector<16x32xbf16>
    %432 = arith.truncf %426 : vector<16x32xf32> to vector<16x32xbf16>
    %433 = arith.truncf %427 : vector<16x32xf32> to vector<16x32xbf16>
    %434 = vector.extract_strided_slice %431 {offsets = [0, 0], sizes = [16, 8], strides = [1, 1]} : vector<16x32xbf16> to vector<16x8xbf16>
    %435 = vector.extract_strided_slice %432 {offsets = [0, 0], sizes = [16, 8], strides = [1, 1]} : vector<16x32xbf16> to vector<16x8xbf16>
    %cst_128 = arith.constant dense<0.000000e+00> : vector<16x16xf32>
    %436 = tpu.matmul %434, %435, %cst_128 {dimension_numbers = #tpu.dot_dimension_numbers<[1], [1], [0], [0], [0, 0, 1, 0], [], []>} : vector<16x8xbf16>, vector<16x8xbf16>, vector<16x16xf32> -> vector<16x16xf32>
    %cst_129 = arith.constant 0.353553385 : f32
    %437 = vector.broadcast %cst_129 : f32 to vector<16x16xf32>
    %438 = arith.mulf %436, %437 : vector<16x16xf32>
    %439 = arith.addf %438, %4 : vector<16x16xf32>
    %cst_130 = arith.constant dense<0xFF800000> : vector<16xf32>
    %440 = vector.multi_reduction <maximumf>, %439, %cst_130 [1] : vector<16x16xf32> to vector<16xf32>
    %441 = vector.shape_cast %440 : vector<16xf32> to vector<16x1xf32>
    %442 = vector.broadcast %441 : vector<16x1xf32> to vector<16x16xf32>
    %443 = arith.subf %439, %442 : vector<16x16xf32>
    %444 = math.exp %443 : vector<16x16xf32>
    %cst_131 = arith.constant dense<0.000000e+00> : vector<16xf32>
    %445 = vector.multi_reduction <add>, %444, %cst_131 [1] : vector<16x16xf32> to vector<16xf32>
    %446 = vector.shape_cast %445 : vector<16xf32> to vector<16x1xf32>
    %447 = tpu.reciprocal %446 {approx = true} : vector<16x1xf32> -> vector<16x1xf32>
    %448 = vector.broadcast %447 : vector<16x1xf32> to vector<16x16xf32>
    %449 = arith.mulf %444, %448 : vector<16x16xf32>
    %450 = arith.truncf %449 : vector<16x16xf32> to vector<16x16xbf16>
    %451 = vector.extract_strided_slice %433 {offsets = [0, 0], sizes = [16, 8], strides = [1, 1]} : vector<16x32xbf16> to vector<16x8xbf16>
    %cst_132 = arith.constant dense<0.000000e+00> : vector<16x8xf32>
    %452 = tpu.matmul %450, %451, %cst_132 {dimension_numbers = #tpu.dot_dimension_numbers<[1], [0], [0], [1], [0, 0, 1, 1], [], []>} : vector<16x16xbf16>, vector<16x8xbf16>, vector<16x8xf32> -> vector<16x8xf32>
    %453 = vector.extract_strided_slice %431 {offsets = [0, 8], sizes = [16, 8], strides = [1, 1]} : vector<16x32xbf16> to vector<16x8xbf16>
    %454 = vector.extract_strided_slice %432 {offsets = [0, 8], sizes = [16, 8], strides = [1, 1]} : vector<16x32xbf16> to vector<16x8xbf16>
    %cst_133 = arith.constant dense<0.000000e+00> : vector<16x16xf32>
    %455 = tpu.matmul %453, %454, %cst_133 {dimension_numbers = #tpu.dot_dimension_numbers<[1], [1], [0], [0], [0, 0, 1, 0], [], []>} : vector<16x8xbf16>, vector<16x8xbf16>, vector<16x16xf32> -> vector<16x16xf32>
    %cst_134 = arith.constant 0.353553385 : f32
    %456 = vector.broadcast %cst_134 : f32 to vector<16x16xf32>
    %457 = arith.mulf %455, %456 : vector<16x16xf32>
    %458 = arith.addf %457, %4 : vector<16x16xf32>
    %cst_135 = arith.constant dense<0xFF800000> : vector<16xf32>
    %459 = vector.multi_reduction <maximumf>, %458, %cst_135 [1] : vector<16x16xf32> to vector<16xf32>
    %460 = vector.shape_cast %459 : vector<16xf32> to vector<16x1xf32>
    %461 = vector.broadcast %460 : vector<16x1xf32> to vector<16x16xf32>
    %462 = arith.subf %458, %461 : vector<16x16xf32>
    %463 = math.exp %462 : vector<16x16xf32>
    %cst_136 = arith.constant dense<0.000000e+00> : vector<16xf32>
    %464 = vector.multi_reduction <add>, %463, %cst_136 [1] : vector<16x16xf32> to vector<16xf32>
    %465 = vector.shape_cast %464 : vector<16xf32> to vector<16x1xf32>
    %466 = tpu.reciprocal %465 {approx = true} : vector<16x1xf32> -> vector<16x1xf32>
    %467 = vector.broadcast %466 : vector<16x1xf32> to vector<16x16xf32>
    %468 = arith.mulf %463, %467 : vector<16x16xf32>
    %469 = arith.truncf %468 : vector<16x16xf32> to vector<16x16xbf16>
    %470 = vector.extract_strided_slice %433 {offsets = [0, 8], sizes = [16, 8], strides = [1, 1]} : vector<16x32xbf16> to vector<16x8xbf16>
    %cst_137 = arith.constant dense<0.000000e+00> : vector<16x8xf32>
    %471 = tpu.matmul %469, %470, %cst_137 {dimension_numbers = #tpu.dot_dimension_numbers<[1], [0], [0], [1], [0, 0, 1, 1], [], []>} : vector<16x16xbf16>, vector<16x8xbf16>, vector<16x8xf32> -> vector<16x8xf32>
    %472 = vector.extract_strided_slice %431 {offsets = [0, 16], sizes = [16, 8], strides = [1, 1]} : vector<16x32xbf16> to vector<16x8xbf16>
    %473 = vector.extract_strided_slice %432 {offsets = [0, 16], sizes = [16, 8], strides = [1, 1]} : vector<16x32xbf16> to vector<16x8xbf16>
    %cst_138 = arith.constant dense<0.000000e+00> : vector<16x16xf32>
    %474 = tpu.matmul %472, %473, %cst_138 {dimension_numbers = #tpu.dot_dimension_numbers<[1], [1], [0], [0], [0, 0, 1, 0], [], []>} : vector<16x8xbf16>, vector<16x8xbf16>, vector<16x16xf32> -> vector<16x16xf32>
    %cst_139 = arith.constant 0.353553385 : f32
    %475 = vector.broadcast %cst_139 : f32 to vector<16x16xf32>
    %476 = arith.mulf %474, %475 : vector<16x16xf32>
    %477 = arith.addf %476, %4 : vector<16x16xf32>
    %cst_140 = arith.constant dense<0xFF800000> : vector<16xf32>
    %478 = vector.multi_reduction <maximumf>, %477, %cst_140 [1] : vector<16x16xf32> to vector<16xf32>
    %479 = vector.shape_cast %478 : vector<16xf32> to vector<16x1xf32>
    %480 = vector.broadcast %479 : vector<16x1xf32> to vector<16x16xf32>
    %481 = arith.subf %477, %480 : vector<16x16xf32>
    %482 = math.exp %481 : vector<16x16xf32>
    %cst_141 = arith.constant dense<0.000000e+00> : vector<16xf32>
    %483 = vector.multi_reduction <add>, %482, %cst_141 [1] : vector<16x16xf32> to vector<16xf32>
    %484 = vector.shape_cast %483 : vector<16xf32> to vector<16x1xf32>
    %485 = tpu.reciprocal %484 {approx = true} : vector<16x1xf32> -> vector<16x1xf32>
    %486 = vector.broadcast %485 : vector<16x1xf32> to vector<16x16xf32>
    %487 = arith.mulf %482, %486 : vector<16x16xf32>
    %488 = arith.truncf %487 : vector<16x16xf32> to vector<16x16xbf16>
    %489 = vector.extract_strided_slice %433 {offsets = [0, 16], sizes = [16, 8], strides = [1, 1]} : vector<16x32xbf16> to vector<16x8xbf16>
    %cst_142 = arith.constant dense<0.000000e+00> : vector<16x8xf32>
    %490 = tpu.matmul %488, %489, %cst_142 {dimension_numbers = #tpu.dot_dimension_numbers<[1], [0], [0], [1], [0, 0, 1, 1], [], []>} : vector<16x16xbf16>, vector<16x8xbf16>, vector<16x8xf32> -> vector<16x8xf32>
    %491 = vector.extract_strided_slice %431 {offsets = [0, 24], sizes = [16, 8], strides = [1, 1]} : vector<16x32xbf16> to vector<16x8xbf16>
    %492 = vector.extract_strided_slice %432 {offsets = [0, 24], sizes = [16, 8], strides = [1, 1]} : vector<16x32xbf16> to vector<16x8xbf16>
    %cst_143 = arith.constant dense<0.000000e+00> : vector<16x16xf32>
    %493 = tpu.matmul %491, %492, %cst_143 {dimension_numbers = #tpu.dot_dimension_numbers<[1], [1], [0], [0], [0, 0, 1, 0], [], []>} : vector<16x8xbf16>, vector<16x8xbf16>, vector<16x16xf32> -> vector<16x16xf32>
    %cst_144 = arith.constant 0.353553385 : f32
    %494 = vector.broadcast %cst_144 : f32 to vector<16x16xf32>
    %495 = arith.mulf %493, %494 : vector<16x16xf32>
    %496 = arith.addf %495, %4 : vector<16x16xf32>
    %cst_145 = arith.constant dense<0xFF800000> : vector<16xf32>
    %497 = vector.multi_reduction <maximumf>, %496, %cst_145 [1] : vector<16x16xf32> to vector<16xf32>
    %498 = vector.shape_cast %497 : vector<16xf32> to vector<16x1xf32>
    %499 = vector.broadcast %498 : vector<16x1xf32> to vector<16x16xf32>
    %500 = arith.subf %496, %499 : vector<16x16xf32>
    %501 = math.exp %500 : vector<16x16xf32>
    %cst_146 = arith.constant dense<0.000000e+00> : vector<16xf32>
    %502 = vector.multi_reduction <add>, %501, %cst_146 [1] : vector<16x16xf32> to vector<16xf32>
    %503 = vector.shape_cast %502 : vector<16xf32> to vector<16x1xf32>
    %504 = tpu.reciprocal %503 {approx = true} : vector<16x1xf32> -> vector<16x1xf32>
    %505 = vector.broadcast %504 : vector<16x1xf32> to vector<16x16xf32>
    %506 = arith.mulf %501, %505 : vector<16x16xf32>
    %507 = arith.truncf %506 : vector<16x16xf32> to vector<16x16xbf16>
    %508 = vector.extract_strided_slice %433 {offsets = [0, 24], sizes = [16, 8], strides = [1, 1]} : vector<16x32xbf16> to vector<16x8xbf16>
    %cst_147 = arith.constant dense<0.000000e+00> : vector<16x8xf32>
    %509 = tpu.matmul %507, %508, %cst_147 {dimension_numbers = #tpu.dot_dimension_numbers<[1], [0], [0], [1], [0, 0, 1, 1], [], []>} : vector<16x16xbf16>, vector<16x8xbf16>, vector<16x8xf32> -> vector<16x8xf32>
    %510 = tpu.concatenate %452, %471, %490, %509 in 1 : vector<16x8xf32>, vector<16x8xf32>, vector<16x8xf32>, vector<16x8xf32> -> vector<16x32xf32>
    %511 = arith.truncf %510 : vector<16x32xf32> to vector<16x32xbf16>
    %cst_148 = arith.constant dense<0.000000e+00> : vector<16x32xf32>
    %512 = tpu.matmul %511, %429, %cst_148 {dimension_numbers = #tpu.dot_dimension_numbers<[1], [0], [0], [1], [0, 0, 1, 1], [], []>} : vector<16x32xbf16>, vector<32x32xbf16>, vector<16x32xf32> -> vector<16x32xf32>
    %513 = vector.broadcast %430 : vector<1x32xf32> to vector<16x32xf32>
    %514 = arith.addf %512, %513 : vector<16x32xf32>
    %515 = arith.addf %418, %514 : vector<16x32xf32>
    %516 = vector.extract_strided_slice %6 {offsets = [16, 0], sizes = [1, 32], strides = [1, 1]} : vector<22x32xf32> to vector<1x32xf32>
    %517 = vector.extract_strided_slice %6 {offsets = [17, 0], sizes = [1, 32], strides = [1, 1]} : vector<22x32xf32> to vector<1x32xf32>
    %cst_149 = arith.constant dense<0.000000e+00> : vector<16xf32>
    %518 = vector.multi_reduction <add>, %515, %cst_149 [1] : vector<16x32xf32> to vector<16xf32>
    %519 = vector.shape_cast %518 : vector<16xf32> to vector<16x1xf32>
    %cst_150 = arith.constant 3.200000e+01 : f32
    %520 = vector.broadcast %cst_150 : f32 to vector<16x1xf32>
    %521 = arith.divf %519, %520 : vector<16x1xf32>
    %522 = vector.broadcast %521 : vector<16x1xf32> to vector<16x32xf32>
    %523 = arith.subf %515, %522 : vector<16x32xf32>
    %524 = arith.mulf %523, %523 : vector<16x32xf32>
    %cst_151 = arith.constant dense<0.000000e+00> : vector<16xf32>
    %525 = vector.multi_reduction <add>, %524, %cst_151 [1] : vector<16x32xf32> to vector<16xf32>
    %526 = vector.shape_cast %525 : vector<16xf32> to vector<16x1xf32>
    %cst_152 = arith.constant 3.200000e+01 : f32
    %527 = vector.broadcast %cst_152 : f32 to vector<16x1xf32>
    %528 = arith.divf %526, %527 : vector<16x1xf32>
    %529 = vector.broadcast %521 : vector<16x1xf32> to vector<16x32xf32>
    %530 = arith.subf %515, %529 : vector<16x32xf32>
    %cst_153 = arith.constant 9.99999974E-6 : f32
    %531 = vector.broadcast %cst_153 : f32 to vector<16x1xf32>
    %532 = arith.addf %528, %531 : vector<16x1xf32>
    %533 = math.rsqrt %532 : vector<16x1xf32>
    %534 = vector.broadcast %533 : vector<16x1xf32> to vector<16x32xf32>
    %535 = arith.mulf %530, %534 : vector<16x32xf32>
    %536 = vector.broadcast %516 : vector<1x32xf32> to vector<16x32xf32>
    %537 = arith.mulf %535, %536 : vector<16x32xf32>
    %538 = vector.broadcast %517 : vector<1x32xf32> to vector<16x32xf32>
    %539 = arith.addf %537, %538 : vector<16x32xf32>
    %540 = arith.truncf %539 : vector<16x32xf32> to vector<16x32xbf16>
    %c1_154 = arith.constant 1 : index
    %c0_155 = arith.constant 0 : index
    %c0_156 = arith.constant 0 : index
    %541 = vector.load %arg7[%c1_154, %c0_155, %c0_156] : memref<2x32x64xbf16, #tpu.memory_space<vmem>>, vector<1x32x64xbf16>
    %542 = vector.shape_cast %541 : vector<1x32x64xbf16> to vector<32x64xbf16>
    %cst_157 = arith.constant dense<0.000000e+00> : vector<16x64xf32>
    %543 = tpu.matmul %540, %542, %cst_157 {dimension_numbers = #tpu.dot_dimension_numbers<[1], [0], [0], [1], [0, 0, 1, 1], [], []>} : vector<16x32xbf16>, vector<32x64xbf16>, vector<16x64xf32> -> vector<16x64xf32>
    %544 = vector.extract_strided_slice %5 {offsets = [3, 0], sizes = [1, 64], strides = [1, 1]} : vector<5x128xf32> to vector<1x64xf32>
    %545 = vector.broadcast %544 : vector<1x64xf32> to vector<16x64xf32>
    %546 = arith.addf %543, %545 : vector<16x64xf32>
    %cst_158 = arith.constant 0.000000e+00 : f32
    %547 = vector.broadcast %cst_158 : f32 to vector<16x64xf32>
    %548 = arith.maximumf %546, %547 : vector<16x64xf32>
    %549 = arith.truncf %548 : vector<16x64xf32> to vector<16x64xbf16>
    %c1_159 = arith.constant 1 : index
    %c0_160 = arith.constant 0 : index
    %c0_161 = arith.constant 0 : index
    %550 = vector.load %arg8[%c1_159, %c0_160, %c0_161] : memref<2x64x32xbf16, #tpu.memory_space<vmem>>, vector<1x64x32xbf16>
    %551 = vector.shape_cast %550 : vector<1x64x32xbf16> to vector<64x32xbf16>
    %cst_162 = arith.constant dense<0.000000e+00> : vector<16x32xf32>
    %552 = tpu.matmul %549, %551, %cst_162 {dimension_numbers = #tpu.dot_dimension_numbers<[1], [0], [0], [1], [0, 0, 1, 1], [], []>} : vector<16x64xbf16>, vector<64x32xbf16>, vector<16x32xf32> -> vector<16x32xf32>
    %553 = vector.extract_strided_slice %6 {offsets = [13, 0], sizes = [1, 32], strides = [1, 1]} : vector<22x32xf32> to vector<1x32xf32>
    %554 = vector.broadcast %553 : vector<1x32xf32> to vector<16x32xf32>
    %555 = arith.addf %552, %554 : vector<16x32xf32>
    %556 = arith.addf %539, %555 : vector<16x32xf32>
    %557 = vector.extract_strided_slice %6 {offsets = [18, 0], sizes = [1, 32], strides = [1, 1]} : vector<22x32xf32> to vector<1x32xf32>
    %558 = vector.extract_strided_slice %6 {offsets = [19, 0], sizes = [1, 32], strides = [1, 1]} : vector<22x32xf32> to vector<1x32xf32>
    %cst_163 = arith.constant dense<0.000000e+00> : vector<16xf32>
    %559 = vector.multi_reduction <add>, %556, %cst_163 [1] : vector<16x32xf32> to vector<16xf32>
    %560 = vector.shape_cast %559 : vector<16xf32> to vector<16x1xf32>
    %cst_164 = arith.constant 3.200000e+01 : f32
    %561 = vector.broadcast %cst_164 : f32 to vector<16x1xf32>
    %562 = arith.divf %560, %561 : vector<16x1xf32>
    %563 = vector.broadcast %562 : vector<16x1xf32> to vector<16x32xf32>
    %564 = arith.subf %556, %563 : vector<16x32xf32>
    %565 = arith.mulf %564, %564 : vector<16x32xf32>
    %cst_165 = arith.constant dense<0.000000e+00> : vector<16xf32>
    %566 = vector.multi_reduction <add>, %565, %cst_165 [1] : vector<16x32xf32> to vector<16xf32>
    %567 = vector.shape_cast %566 : vector<16xf32> to vector<16x1xf32>
    %cst_166 = arith.constant 3.200000e+01 : f32
    %568 = vector.broadcast %cst_166 : f32 to vector<16x1xf32>
    %569 = arith.divf %567, %568 : vector<16x1xf32>
    %570 = vector.broadcast %562 : vector<16x1xf32> to vector<16x32xf32>
    %571 = arith.subf %556, %570 : vector<16x32xf32>
    %cst_167 = arith.constant 9.99999974E-6 : f32
    %572 = vector.broadcast %cst_167 : f32 to vector<16x1xf32>
    %573 = arith.addf %569, %572 : vector<16x1xf32>
    %574 = math.rsqrt %573 : vector<16x1xf32>
    %575 = vector.broadcast %574 : vector<16x1xf32> to vector<16x32xf32>
    %576 = arith.mulf %571, %575 : vector<16x32xf32>
    %577 = vector.broadcast %557 : vector<1x32xf32> to vector<16x32xf32>
    %578 = arith.mulf %576, %577 : vector<16x32xf32>
    %579 = vector.broadcast %558 : vector<1x32xf32> to vector<16x32xf32>
    %580 = arith.addf %578, %579 : vector<16x32xf32>
    %581 = vector.extract_strided_slice %6 {offsets = [20, 0], sizes = [1, 32], strides = [1, 1]} : vector<22x32xf32> to vector<1x32xf32>
    %582 = vector.extract_strided_slice %6 {offsets = [21, 0], sizes = [1, 32], strides = [1, 1]} : vector<22x32xf32> to vector<1x32xf32>
    %cst_168 = arith.constant dense<0.000000e+00> : vector<16xf32>
    %583 = vector.multi_reduction <add>, %580, %cst_168 [1] : vector<16x32xf32> to vector<16xf32>
    %584 = vector.shape_cast %583 : vector<16xf32> to vector<16x1xf32>
    %cst_169 = arith.constant 3.200000e+01 : f32
    %585 = vector.broadcast %cst_169 : f32 to vector<16x1xf32>
    %586 = arith.divf %584, %585 : vector<16x1xf32>
    %587 = vector.broadcast %586 : vector<16x1xf32> to vector<16x32xf32>
    %588 = arith.subf %580, %587 : vector<16x32xf32>
    %589 = arith.mulf %588, %588 : vector<16x32xf32>
    %cst_170 = arith.constant dense<0.000000e+00> : vector<16xf32>
    %590 = vector.multi_reduction <add>, %589, %cst_170 [1] : vector<16x32xf32> to vector<16xf32>
    %591 = vector.shape_cast %590 : vector<16xf32> to vector<16x1xf32>
    %cst_171 = arith.constant 3.200000e+01 : f32
    %592 = vector.broadcast %cst_171 : f32 to vector<16x1xf32>
    %593 = arith.divf %591, %592 : vector<16x1xf32>
    %594 = vector.broadcast %586 : vector<16x1xf32> to vector<16x32xf32>
    %595 = arith.subf %580, %594 : vector<16x32xf32>
    %cst_172 = arith.constant 9.99999974E-6 : f32
    %596 = vector.broadcast %cst_172 : f32 to vector<16x1xf32>
    %597 = arith.addf %593, %596 : vector<16x1xf32>
    %598 = math.rsqrt %597 : vector<16x1xf32>
    %599 = vector.broadcast %598 : vector<16x1xf32> to vector<16x32xf32>
    %600 = arith.mulf %595, %599 : vector<16x32xf32>
    %601 = vector.broadcast %581 : vector<1x32xf32> to vector<16x32xf32>
    %602 = arith.mulf %600, %601 : vector<16x32xf32>
    %603 = vector.broadcast %582 : vector<1x32xf32> to vector<16x32xf32>
    %604 = arith.addf %602, %603 : vector<16x32xf32>
    %c0_173 = arith.constant 0 : index
    %c0_174 = arith.constant 0 : index
    %605 = vector.load %arg11[%c0_173, %c0_174] : memref<16x32xf32, #tpu.memory_space<vmem>>, vector<16x32xf32>
    tpu.vector_store %arg11[%c0_173, %c0_174], %604 {strides = array<i32>} : memref<16x32xf32, #tpu.memory_space<vmem>>, vector<16x32xf32>,
    return
  }
}

</mosaic_0001>

<bundles_post_ra>
// kernel: tpu_custom_call.1
= control target key start
LH: loop header
LB: loop body
LE: loop exit
PB: predicated region body
PF: predicated region fallthrough
CT: control target
= control target key end

     0   :  { %16 = vsyncpa [#allocation3], 0  ;;  %s5231_s0 = inlined_call_operand.hbm [shape: f32[16,32], index: 0, kind: input, shape index: {}]   ;;  %s5232_s1 = inlined_call_operand.hbm [shape: f32[16,32], index: 1, kind: input, shape index: {}]   ;;  %s5233_s2 = inlined_call_operand.hbm [shape: f32[16,32], index: 2, kind: input, shape index: {}]   ;;  %s5234_s3 = inlined_call_operand.vmem [shape: bf16[2,32,96], index: 3, kind: input, shape index: {}]   ;;  %s5235_s4 = inlined_call_operand.hbm [shape: bf16[2,32,32], index: 4, kind: input, shape index: {}]   ;;  %s5236_s5 = inlined_call_operand.hbm [shape: bf16[32,128], index: 5, kind: input, shape index: {}]   ;;  %s5237_s6 = inlined_call_operand.vmem [shape: bf16[4,32,32], index: 6, kind: input, shape index: {}]   ;;  %s5238_s7 = inlined_call_operand.hbm [shape: bf16[2,32,64], index: 7, kind: input, shape index: {}]   ;;  %s5239_s8 = inlined_call_operand.vmem [shape: bf16[2,64,32], index: 8, kind: input, shape index: {}]   ;;  %s5240_s9 = inlined_call_operand.vmem [shape: f32[5,128], index: 9, kind: input, shape index: {}]   ;;  %s5241_s10 = inlined_call_operand.hbm [shape: f32[22,32], index: 10, kind: input, shape index: {}]   ;;  %s5242_s11 = inlined_call_operand.hbm [shape: f32[16,32], index: 11, kind: output, shape index: {}]  }
   0x1   :  { %17 = vsyncpa [#allocation6], 0 }
   0x2   :  { %18 = vsyncpa [#allocation9], 0 }
   0x3   :  { %19 = vsyncpa [#allocation12], 0 }
   0x4   :  { %20 = vsyncpa [#allocation4], 0  ;;  %s4425_s17 = smov [#allocation5]   ;;  %s4426_s19 = smov [#allocation8]  }
   0x5   :  { %s38_s18 = sshll.u32 %s4425_s17, 4  ;;  %s64_s20 = sshll.u32 %s4426_s19, 4  ;;  %s39_s18 = int_to_ptr.vmem [resolvable:$true] %s38_s18  ;;  %s65_s20 = int_to_ptr.vmem [resolvable:$true] %s64_s20 }
   0x6   :  { %s4263_s21 = scalar_lea.vmem %s39_s18, 256  ;;  %p4268_p1 = scmp.lt.s32.totalorder %s39_s18, %s39_s18 }
   0x7   :  { %p4264_p0 = scmp.ne.s32.totalorder %s39_s18, %s4263_s21  ;;  %p4269_p2 = scmp.lt.s32.totalorder %s4263_s21, %s4263_s21 }
   0x9   :  { %p4270_p3 = por %p4269_p2, %p4268_p1 }
   0xb   :  { %p4271_p4 = pnand %p4270_p3, %p4264_p0 }
   0xd   :  { %4274 = shalt.err (!%p4271_p4)
}
   0xe   :  { %s4427_s22 = smov 128   ;;  %s4428_s23 = smov 8  }
   0xf   :  { %44 = dma.hbm_to_vmem [thread:$0]  %s5232_s1, 256, %s39_s18, [#allocation6], %s4427_s22, %s4427_s22, %s4428_s23  }
  0x10   :  { %s4283_s26 = scalar_lea.vmem %s65_s20, 512  ;;  %p4288_p6 = scmp.lt.s32.totalorder %s65_s20, %s65_s20 }
  0x11   :  { %p4284_p5 = scmp.ne.s32.totalorder %s65_s20, %s4283_s26  ;;  %p4289_p7 = scmp.lt.s32.totalorder %s4283_s26, %s4283_s26 }
  0x13   :  { %p4290_p8 = por %p4289_p7, %p4288_p6 }
  0x15   :  { %p4291_p9 = pnand %p4290_p8, %p4284_p5 }
  0x17   :  { %4294 = shalt.err (!%p4291_p9)
}
  0x18   :  { %s4429_s27 = smov 64   ;;  %s4430_s28 = smov 4  }
  0x19   :  { %70 = dma.hbm_to_vmem [thread:$0]  %s5235_s4, 512, %s65_s20, [#allocation9], %s4429_s27, %s4429_s27, %s4430_s28  }
  0x1a   :  { %s4431_s12 = smov [#allocation11]   ;;  %s4432_s14 = smov [#allocation2]  }
  0x1b   :  { %s90_s13 = sshll.u32 %s4431_s12, 4  ;;  %s26_s1 = sshll.u32 %s4432_s14, 4  ;;  %s91_s13 = int_to_ptr.vmem [resolvable:$true] %s90_s13  ;;  %s27_s1 = int_to_ptr.vmem [resolvable:$true] %s26_s1 }
  0x1c   :  { %s4303_s15 = scalar_lea.vmem %s91_s13, 512  ;;  %p4308_p11 = scmp.lt.s32.totalorder %s91_s13, %s91_s13 }
  0x1d   :  { %p4304_p10 = scmp.ne.s32.totalorder %s91_s13, %s4303_s15  ;;  %p4309_p12 = scmp.lt.s32.totalorder %s4303_s15, %s4303_s15 }
  0x1f   :  { %p4310_p13 = por %p4309_p12, %p4308_p11 }
  0x21   :  { %p4311_p0 = pnand %p4310_p13, %p4304_p10 }
  0x23   :  { %4314 = shalt.err (!%p4311_p0)
}
  0x24   :  { %96 = dma.hbm_to_vmem [thread:$0]  %s5238_s7, 512, %s91_s13, [#allocation12], %s4429_s27, %s4429_s27, %s4430_s28  }
  0x25   :  { %s4323_s4 = scalar_lea.vmem %s27_s1, 256  ;;  %p4328_p2 = scmp.lt.s32.totalorder %s27_s1, %s27_s1 }
  0x26   :  { %p4324_p1 = scmp.ne.s32.totalorder %s27_s1, %s4323_s4  ;;  %p4329_p3 = scmp.lt.s32.totalorder %s4323_s4, %s4323_s4 }
  0x28   :  { %p4330_p4 = por %p4329_p3, %p4328_p2 }
  0x2a   :  { %p4331_p5 = pnand %p4330_p4, %p4324_p1 }
  0x2c   :  { %4334 = shalt.err (!%p4331_p5)
}
  0x2d   :  { %32 = dma.hbm_to_vmem [thread:$0]  %s5231_s0, 256, %s27_s1, [#allocation3], %s4427_s22, %s4427_s22, %s4428_s23  }
  0x2e   :  { %s4433_s20 = smov [#allocation7]   ;;  %s4434_s24 = smov [#allocation10]  }
  0x2f   :  { %s50_s21 = sshll.u32 %s4433_s20, 4  ;;  %s76_s25 = sshll.u32 %s4434_s24, 4  ;;  %s51_s21 = int_to_ptr.vmem [resolvable:$true] %s50_s21  ;;  %s77_s25 = int_to_ptr.vmem [resolvable:$true] %s76_s25 }
  0x30   :  { %s4343_s7 = scalar_lea.vmem %s51_s21, 256  ;;  %p4348_p7 = scmp.lt.s32.totalorder %s51_s21, %s51_s21 }
  0x31   :  { %p4344_p6 = scmp.ne.s32.totalorder %s51_s21, %s4343_s7  ;;  %p4349_p8 = scmp.lt.s32.totalorder %s4343_s7, %s4343_s7 }
  0x33   :  { %p4350_p9 = por %p4349_p8, %p4348_p7 }
  0x35   :  { %p4351_p10 = pnand %p4350_p9, %p4344_p6 }
  0x37   :  { %4354 = shalt.err (!%p4351_p10)
}
  0x38   :  { %56 = dma.hbm_to_vmem [thread:$0]  %s5233_s2, 256, %s51_s21, [#allocation6], %s4427_s22, %s4427_s22, %s4428_s23  }
  0x39   :  { %s4363_s0 = scalar_lea.vmem %s77_s25, 256  ;;  %p4368_p12 = scmp.lt.s32.totalorder %s77_s25, %s77_s25 }
  0x3a   :  { %p4364_p11 = scmp.ne.s32.totalorder %s77_s25, %s4363_s0  ;;  %p4369_p13 = scmp.lt.s32.totalorder %s4363_s0, %s4363_s0 }
  0x3c   :  { %p4370_p0 = por %p4369_p13, %p4368_p12 }
  0x3e   :  { %p4371_p1 = pnand %p4370_p0, %p4364_p11 }
  0x40   :  { %4374 = shalt.err (!%p4371_p1)
}
  0x41   :  { %82 = dma.hbm_to_vmem [thread:$0]  %s5236_s5, 256, %s77_s25, [#allocation9], %s4429_s27, %s4429_s27, %s4430_s28  }
  0x42   :  { %s4435_s13 = smov [#allocation13]  }
  0x43   :  { %s106_s14 = sshll.u32 %s4435_s13, 4  ;;  %s107_s14 = int_to_ptr.vmem [resolvable:$true] %s106_s14 }
  0x44   :  { %s4383_s1 = scalar_lea.vmem %s107_s14, 384  ;;  %p4388_p3 = scmp.lt.s32.totalorder %s107_s14, %s107_s14 }
  0x45   :  { %p4384_p2 = scmp.ne.s32.totalorder %s107_s14, %s4383_s1  ;;  %p4389_p4 = scmp.lt.s32.totalorder %s4383_s1, %s4383_s1 }
  0x47   :  { %p4390_p5 = por %p4389_p4, %p4388_p3 }
  0x49   :  { %p4391_p6 = pnand %p4390_p5, %p4384_p2 }
  0x4b   :  { %4394 = shalt.err (!%p4391_p6)
}
  0x4c   :  { %112 = dma.hbm_to_vmem [thread:$0]  %s5241_s10, 384, %s107_s14, [#allocation12], %s4427_s22, %s4427_s22, %s4428_s23  }
  0x4d   :  { %4415 = dma.done.wait [#allocation3], 256  }
  0x4e   :  { %4416 = vsyncadd [#allocation3], 4294967040 }
  0x4f   :  { %4417 = dma.done.wait [#allocation6], 512  }
  0x50   :  { %4418 = vsyncadd [#allocation6], 4294966784 }
  0x51   :  { %4419 = dma.done.wait [#allocation9], 768  }
  0x52   :  { %4420 = vsyncadd [#allocation9], 4294966528 }
  0x53   :  { %4421 = dma.done.wait [#allocation12], 896  }
  0x54   :  { %4422 = vsyncadd [#allocation12], 4294966400  ;;  %v4436_v0 = vmov 0.0   ;;  %vm4437_vm0 = vmmov 0   ;;  %v4064_v1 = vld [vmem:[%s5234_s3 + $0x8] sm:$0xff]   ;;  %v4065_v2 = vld [vmem:[%s5234_s3] sm:$0xff]   ;;  %v150_v11 = vlaneseq }
  0x55   :  { %3681 = vmatprep.subr.bf16.mxu1 %v4436_v0  ;;  %3685 = vmatprep.mubr.msk.bf16.mxu1 %vm4437_vm0, %v4436_v0  ;;  %v4566_v3 = vld [vmem:[#allocation2] sm:$0xff]  ;;  %v4568_v4 = vld [vmem:[#allocation2 + $0x8] sm:$0xff]  ;;  %vm166_vm1 = vcmask 261120   ;;  %v4066_v6 = vld [vmem:[#allocation10 + $0x8] sm:$0xff]   ;;  %s4438_s18 = smov 120   ;;  %s4439_s19 = smov 96  }
  0x56   :  { %3673 = vmatprep.subr.bf16.mxu0 %v4436_v0  ;;  %3677 = vmatprep.mubr.msk.bf16.mxu0 %vm4437_vm0, %v4436_v0  ;;  %v211_v5 = vpack.c.bf16 %v4568_v4, %v4566_v3  ;;  %v4067_v7 = vld [vmem:[#allocation10] sm:$0xff]   ;;  %v138_v9 = vld [vmem:[#allocation5 + $0x8] sm:$0xff]  ;;  %v4582_v12 = vshrl.u32 %v150_v11, 7  ;;  %v141_v14 = vld [vmem:[%s5240_s9] sm:$0x1f]  ;;  %s4440_s20 = smov 80  }
  0x57   :  { %3682 = vmatpush3.bf16.msra.mxu1 %v4064_v1  ;;  %3674 = vmatpush3.bf16.msra.mxu0 %v4066_v6  ;;  %v137_v8 = vld [vmem:[#allocation5] sm:$0xff]  ;;  %s4441_s21 = smov 88   ;;  %s4442_s24 = smov 72   ;;  %vm284_vm2 = vcmask 64512   ;;  %v4634_v44 = vld [vmem:[#allocation7] sm:$0xff]  ;;  %vm336_vm3 = vcmask 130048  }
  0x58   :  { %3683 = vmatprep.subr.bf16.mxu1 %v4436_v0  ;;  %3675 = vmatprep.subr.bf16.mxu0 %v4436_v0  ;;  %v145_v10 = vpack.c.bf16 %v138_v9, %v137_v8  ;;  %v4585_v13 = vsub.s32 0, %v4582_v12  ;;  %s4443_s25 = smov 112   ;;  %s4444_s7 = smov 104   ;;  %v4608_v23 = vsub.s32 4, %v4582_v12  ;;  %v4637_v49 = vld [vmem:[#allocation7 + $0x8] sm:$0xff]  ;;  %vm810_vm4 = vcmask 195584  }
  0x59   :  { %s4445_s26 = smov 56   ;;  %s4446_s29 = smov 48   ;;  %vm1728_vm5 = vcmask 523264  }
  0x5a   :  { %v219_v16 = vrot.slane %v141_v14, %v4585_v13  ;;  %v153_v24 = vrot.slane %v141_v14, %v4608_v23  ;;  %s4447_s0 = smov 40   ;;  %s4448_s1 = smov 16  }
  0x5b   :  { %3684 = vmatpush3.bf16.msra.mxu1 %v4065_v2  ;;  %3676 = vmatpush3.bf16.msra.mxu0 %v4067_v7  ;;  %s4449_s2 = smov 24  }
  0x5c   :  { %3695 = vmatprep.subr.bf16.mxu1 %v4436_v0  ;;  %3689 = vmatprep.subr.bf16.mxu0 %v4436_v0 }
  0x5e   :  { %3686 = vmatmul.mubr.msk.bf16.vlgmr.msra.gmra.mxu1 %vm166_vm1, %v211_v5  ;;  %3678 = vmatmul.mubr.msk.bf16.vlgmr.msra.gmra.mxu0 %vm166_vm1, %v145_v10 }
  0x5f   :  { %3697 = vmatprep.mubr.msk.bf16.mxu1 %vm4437_vm0, %v4436_v0  ;;  %3691 = vmatprep.mubr.msk.bf16.mxu0 %vm4437_vm0, %v4436_v0 }
 0x11e   :  { %v269_v15 = vpop.f32.mrf.mxu1  ;;  %v204_v25 = vpop.f32.mrf.mxu0 }
 0x11f   :  { %v270_v19 = vadd.f32 %v269_v15, %v219_v16  ;;  %v205_v27 = vadd.f32 %v204_v25, %v153_v24 }
 0x120   :  { %v3687_v17 = vpop.f32.mrf.mxu1  ;;  %v3679_v26 = vpop.f32.mrf.mxu0 }
 0x122   :  { %v272_v18 = vpop.f32.mrf.mxu1  ;;  %v207_v28 = vpop.f32.mrf.mxu0 }
 0x123   :  { %v273_v20 = vadd.f32 %v272_v18, %v219_v16  ;;  %v208_v29 = vadd.f32 %v207_v28, %v153_v24 }
 0x124   :  { %v3688_v21 = vpop.f32.mrf.mxu1  ;;  %v3680_v30 = vpop.f32.mrf.mxu0 }
 0x125   :  { %v4591_v22 = vpack.c.bf16 %v273_v20, %v270_v19  ;;  %v4611_v31 = vpack.c.bf16 %v208_v29, %v205_v27 }
 0x127   :  { %407 = vrot.lane.b32.xlu1 %v4591_v22, %s4438_s18  ;;  %282 = vrot.lane.b32.xlu0 %v4591_v22, %s4439_s19 }
 0x12b   :  { %534 = vrot.lane.b32.xlu1 %v4591_v22, %s4440_s20  ;;  %409 = vrot.lane.b32.xlu0 %v4591_v22, %s4441_s21 }
 0x12f   :  { %659 = vrot.lane.b32.xlu1 %v4591_v22, %s4442_s24  ;;  %532 = vrot.lane.b32.xlu0 %v4591_v22, %s4443_s25 }
 0x133   :  { %657 = vrot.lane.b32.xlu0 %v4591_v22, %s4444_s7 }
 0x199   :  { %v283_v32 = vpop.permute.xlu0 %282  ;;  %v408_v35 = vpop.permute.xlu1 %407 }
 0x19a   :  { %v289_v33 = vsel %vm284_vm2, %v283_v32, 0 }
 0x19b   :  { %3690 = vmatpush3.bf16.xpose.msra.mxu0 %v289_v33 }
 0x19c   :  { %3701 = vmatprep.subr.bf16.mxu0 %v4436_v0 }
 0x19d   :  { %v410_v34 = vpop.permute.xlu0 %409  ;;  %v535_v37 = vpop.permute.xlu1 %534 }
 0x19e   :  { %v415_v36 = vsel %vm284_vm2, %v410_v34, 0  ;;  %v540_v38 = vsel %vm284_vm2, %v535_v37, 0 }
 0x1a1   :  { %v660_v39 = vpop.permute.xlu1 %659  ;;  %v533_v40 = vpop.permute.xlu0 %532 }
 0x1a2   :  { %3692 = vmatmul.mubr.msk.bf16.vlgmr.msra.gmra.mxu0 %vm284_vm2, %v4591_v22  ;;  %v665_v41 = vsel %vm284_vm2, %v660_v39, 0 }
 0x1a3   :  { %3702 = vmatpush3.bf16.xpose.msra.mxu0 %v415_v36  ;;  %3703 = vmatprep.mubr.msk.bf16.mxu0 %vm4437_vm0, %v4436_v0 }
 0x1a4   :  { %3713 = vmatprep.subr.bf16.mxu0 %v4436_v0 }
 0x1a5   :  { %v658_v42 = vpop.permute.xlu0 %657 }
 0x1aa   :  { %3704 = vmatmul.mubr.msk.bf16.vlgmr.msra.gmra.mxu0 %vm284_vm2, %v408_v35 }
 0x1ab   :  { %3714 = vmatpush3.bf16.xpose.msra.mxu0 %v540_v38  ;;  %3715 = vmatprep.mubr.msk.bf16.mxu0 %vm4437_vm0, %v4436_v0 }
 0x1ac   :  { %3725 = vmatprep.subr.bf16.mxu0 %v4436_v0 }
 0x1b2   :  { %3716 = vmatmul.mubr.msk.bf16.vlgmr.msra.gmra.mxu0 %vm284_vm2, %v533_v40 }
 0x1b3   :  { %3726 = vmatpush3.bf16.xpose.msra.mxu0 %v665_v41  ;;  %3727 = vmatprep.mubr.msk.bf16.mxu0 %vm4437_vm0, %v4436_v0 }
 0x1b4   :  { %3737 = vmatprep.subr.bf16.mxu0 %v4436_v0 }
 0x1ba   :  { %3728 = vmatmul.mubr.msk.bf16.vlgmr.msra.gmra.mxu0 %vm284_vm2, %v658_v42 }
 0x1bb   :  { %3741 = vmatprep.mubr.msk.bf16.mxu0 %vm4437_vm0, %v4436_v0 }
 0x262   :  { %v325_v43 = vpop.f32.mrf.mxu0 }
 0x263   :  { %v332_v45 = vmul.f32 0.35355338, %v325_v43 }
 0x264   :  { %v3693_v46 = vpop.f32.mrf.mxu0 }
 0x265   :  { %v334_v47 = vadd.f32 %v332_v45, %v4634_v44 }
 0x266   :  { %v328_v48 = vpop.f32.mrf.mxu0 }
 0x267   :  { %v333_v50 = vmul.f32 0.35355338, %v328_v48  ;;  %v337_v51 = vsel %vm336_vm3, %v334_v47, -inf }
 0x268   :  { %338 = vmax.xlane.f32.xlu1 %v337_v51  ;;  %v3694_v52 = vpop.f32.mrf.mxu0 }
 0x269   :  { %v335_v53 = vadd.f32 %v333_v50, %v4637_v49 }
 0x26a   :  { %v451_v54 = vpop.f32.mrf.mxu0 }
 0x26b   :  { %v458_v55 = vmul.f32 0.35355338, %v451_v54  ;;  %v340_v56 = vsel %vm336_vm3, %v335_v53, -inf }
 0x26c   :  { %341 = vmax.xlane.f32.xlu0 %v340_v56  ;;  %v3705_v57 = vpop.f32.mrf.mxu0 }
 0x26d   :  { %v460_v58 = vadd.f32 %v458_v55, %v4634_v44 }
 0x26e   :  { %v454_v59 = vpop.f32.mrf.mxu0 }
 0x26f   :  { %v459_v60 = vmul.f32 0.35355338, %v454_v59  ;;  %v462_v61 = vsel %vm336_vm3, %v460_v58, -inf }
 0x270   :  { %463 = vmax.xlane.f32.xlu0 %v462_v61  ;;  %v3706_v62 = vpop.f32.mrf.mxu0 }
 0x271   :  { %v461_v63 = vadd.f32 %v459_v60, %v4637_v49 }
 0x272   :  { %v576_v1 = vpop.f32.mrf.mxu0 }
 0x273   :  { %v583_v2 = vmul.f32 0.35355338, %v576_v1  ;;  %v465_v5 = vsel %vm336_vm3, %v461_v63, -inf }
 0x274   :  { %466 = vmax.xlane.f32.xlu1 %v465_v5  ;;  %v3717_v6 = vpop.f32.mrf.mxu0 }
 0x275   :  { %v585_v7 = vadd.f32 %v583_v2, %v4634_v44 }
 0x276   :  { %v579_v8 = vpop.f32.mrf.mxu0 }
 0x277   :  { %v584_v9 = vmul.f32 0.35355338, %v579_v8  ;;  %v587_v10 = vsel %vm336_vm3, %v585_v7, -inf }
 0x278   :  { %588 = vmax.xlane.f32.xlu0 %v587_v10  ;;  %v3718_v11 = vpop.f32.mrf.mxu0 }
 0x279   :  { %v586_v14 = vadd.f32 %v584_v9, %v4637_v49 }
 0x27a   :  { %v701_v15 = vpop.f32.mrf.mxu0 }
 0x27b   :  { %v708_v16 = vmul.f32 0.35355338, %v701_v15  ;;  %v590_v17 = vsel %vm336_vm3, %v586_v14, -inf }
 0x27c   :  { %591 = vmax.xlane.f32.xlu1 %v590_v17  ;;  %v3729_v18 = vpop.f32.mrf.mxu0 }
 0x27d   :  { %v710_v19 = vadd.f32 %v708_v16, %v4634_v44 }
 0x27e   :  { %v704_v20 = vpop.f32.mrf.mxu0 }
 0x27f   :  { %v709_v21 = vmul.f32 0.35355338, %v704_v20  ;;  %v712_v24 = vsel %vm336_vm3, %v710_v19, -inf }
 0x280   :  { %713 = vmax.xlane.f32.xlu0 %v712_v24  ;;  %v3730_v25 = vpop.f32.mrf.mxu0 }
 0x281   :  { %v711_v26 = vadd.f32 %v709_v21, %v4637_v49 }
 0x283   :  { %v715_v27 = vsel %vm336_vm3, %v711_v26, -inf }
 0x284   :  { %716 = vmax.xlane.f32.xlu1 %v715_v27 }
 0x2f1   :  { %v339_v28 = vpop.xlane.xlu1 %338 }
 0x2f2   :  { %v343_v29 = vsub.f32 %v334_v47, %v339_v28 }
 0x2f4   :  { %v345_v30 = vmul.f32 1.442695, %v343_v29 }
 0x2f5   :  { %v342_v32 = vpop.xlane.xlu0 %341 }
 0x2f6   :  { %4094 = vpow2.f32 %v345_v30  ;;  %v344_v33 = vsub.f32 %v335_v53, %v342_v32 }
 0x2f8   :  { %v347_v34 = vmul.f32 1.442695, %v344_v33 }
 0x2f9   :  { %v464_v35 = vpop.xlane.xlu0 %463 }
 0x2fa   :  { %4096 = vpow2.f32 %v347_v34  ;;  %v468_v36 = vsub.f32 %v460_v58, %v464_v35 }
 0x2fc   :  { %v470_v37 = vmul.f32 1.442695, %v468_v36 }
 0x2fd   :  { %v467_v45 = vpop.xlane.xlu1 %466 }
 0x2fe   :  { %4098 = vpow2.f32 %v470_v37  ;;  %v469_v46 = vsub.f32 %v461_v63, %v467_v45 }
 0x300   :  { %v472_v51 = vmul.f32 1.442695, %v469_v46 }
 0x301   :  { %v589_v47 = vpop.xlane.xlu0 %588 }
 0x302   :  { %v593_v50 = vsub.f32 %v585_v7, %v589_v47  ;;  %4100 = vpow2.f32 %v472_v51 }
 0x303   :  { %v4095_v38 = vpop.eup %4094 }
 0x304   :  { %v349_v39 = vsel %vm336_vm3, %v4095_v38, 0.0  ;;  %v595_v55 = vmul.f32 1.442695, %v593_v50 }
 0x305   :  { %350 = vadd.xlane.f32.xlu0 %v349_v39  ;;  %v592_v48 = vpop.xlane.xlu1 %591 }
 0x306   :  { %v594_v52 = vsub.f32 %v586_v14, %v592_v48  ;;  %4102 = vpow2.f32 %v595_v55  ;;  %v4068_v55 = vld [vmem:[%s5237_s6 + $0x8] sm:$0xff]  }
 0x307   :  { %v4097_v40 = vpop.eup %4096  ;;  %3738 = vmatpush3.bf16.msra.mxu0 %v4068_v55 }
 0x308   :  { %v352_v41 = vsel %vm336_vm3, %v4097_v40, 0.0  ;;  %v597_v57 = vmul.f32 1.442695, %v594_v52  ;;  %3739 = vmatprep.subr.bf16.mxu0 %v4436_v0 }
 0x309   :  { %353 = vadd.xlane.f32.xlu1 %v352_v41  ;;  %v714_v53 = vpop.xlane.xlu0 %713 }
 0x30a   :  { %v718_v56 = vsub.f32 %v710_v19, %v714_v53  ;;  %4104 = vpow2.f32 %v597_v57 }
 0x30b   :  { %v4656_v42 = vpop.eup %4098 }
 0x30c   :  { %v474_v43 = vsel %vm336_vm3, %v4656_v42, 0.0  ;;  %v720_v59 = vmul.f32 1.442695, %v718_v56 }
 0x30d   :  { %475 = vadd.xlane.f32.xlu0 %v474_v43  ;;  %v717_v54 = vpop.xlane.xlu1 %716 }
 0x30e   :  { %v719_v58 = vsub.f32 %v711_v26, %v717_v54  ;;  %4106 = vpow2.f32 %v720_v59 }
 0x30f   :  { %v4101_v61 = vpop.eup %4100 }
 0x310   :  { %v722_v60 = vmul.f32 1.442695, %v719_v58  ;;  %v477_v63 = vsel %vm336_vm3, %v4101_v61, 0.0 }
 0x312   :  { %4108 = vpow2.f32 %v722_v60  ;;  %v4069_v60 = vld [vmem:[%s5237_s6] sm:$0xff]  }
 0x313   :  { %v4103_v62 = vpop.eup %4102  ;;  %3740 = vmatpush3.bf16.msra.mxu0 %v4069_v60 }
 0x314   :  { %v599_v6 = vsel %vm336_vm3, %v4103_v62, 0.0  ;;  %3753 = vmatprep.subr.bf16.mxu0 %v4436_v0 }
 0x317   :  { %v4105_v1 = vpop.eup %4104 }
 0x318   :  { %v602_v5 = vsel %vm336_vm3, %v4105_v1, 0.0 }
 0x31a   :  { %485 = vrot.lane.b32.xlu1 %v4591_v22, %s4445_s26 }
 0x31b   :  { %v4665_v2 = vpop.eup %4106 }
 0x31c   :  { %v724_v9 = vsel %vm336_vm3, %v4665_v2, 0.0 }
 0x31f   :  { %v4109_v7 = vpop.eup %4108 }
 0x320   :  { %v727_v8 = vsel %vm336_vm3, %v4109_v7, 0.0 }
 0x323   :  { %360 = vrot.lane.b32.xlu0 %v4591_v22, %s4429_s27 }
 0x33e   :  { %478 = vadd.xlane.f32.xlu1 %v477_v63 }
 0x342   :  { %603 = vadd.xlane.f32.xlu1 %v602_v5  ;;  %600 = vadd.xlane.f32.xlu0 %v599_v6 }
 0x346   :  { %728 = vadd.xlane.f32.xlu1 %v727_v8  ;;  %725 = vadd.xlane.f32.xlu0 %v724_v9 }
 0x357   :  { %610 = vrot.lane.b32.xlu1 %v4591_v22, %s4446_s29 }
 0x35c   :  { %735 = vrot.lane.b32.xlu0 %v4591_v22, %s4447_s0 }
 0x38e   :  { %v351_v10 = vpop.xlane.xlu0 %350 }
 0x38f   :  { %4110 = vrcp.f32 %v351_v10 }
 0x392   :  { %v354_v11 = vpop.xlane.xlu1 %353 }
 0x393   :  { %4112 = vrcp.f32 %v354_v11 }
 0x396   :  { %v476_v14 = vpop.xlane.xlu0 %475  ;;  %v486_v21 = vpop.permute.xlu1 %485 }
 0x397   :  { %4114 = vrcp.f32 %v476_v14 }
 0x39a   :  { %v361_v15 = vpop.permute.xlu0 %360 }
 0x39b   :  { %3696 = vmatpush3.bf16.msra.mxu1 %v361_v15 }
 0x39c   :  { %3707 = vmatprep.subr.bf16.mxu1 %v4436_v0  ;;  %v4111_v16 = vpop.eup %4110 }
 0x39d   :  { %v357_v18 = vmul.f32 %v4111_v16, %v4095_v38 }
 0x3a0   :  { %v4113_v17 = vpop.eup %4112 }
 0x3a1   :  { %v358_v19 = vmul.f32 %v4113_v17, %v4097_v40 }
 0x3a3   :  { %v359_v20 = vpack.c.bf16 %v358_v19, %v357_v18 }
 0x3a4   :  { %v4115_v28 = vpop.eup %4114 }
 0x3a5   :  { %3698 = vmatmul.mubr.msk.bf16.vlgmr.msra.gmra.mxu1 %vm336_vm3, %v359_v20  ;;  %v482_v30 = vmul.f32 %v4115_v28, %v4656_v42  ;;  %v4718_v28 = vsub.s32 1, %v4582_v12 }
 0x3a6   :  { %3708 = vmatpush3.bf16.msra.mxu1 %v486_v21  ;;  %3709 = vmatprep.mubr.msk.bf16.mxu1 %vm4437_vm0, %v4436_v0 }
 0x3a7   :  { %3719 = vmatprep.subr.bf16.mxu1 %v4436_v0 }
 0x3c7   :  { %v479_v22 = vpop.xlane.xlu1 %478 }
 0x3c8   :  { %4116 = vrcp.f32 %v479_v22 }
 0x3cb   :  { %v604_v24 = vpop.xlane.xlu1 %603  ;;  %v601_v25 = vpop.xlane.xlu0 %600 }
 0x3cc   :  { %4118 = vrcp.f32 %v604_v24 }
 0x3cd   :  { %4120 = vrcp.f32 %v601_v25 }
 0x3cf   :  { %v729_v26 = vpop.xlane.xlu1 %728  ;;  %v726_v27 = vpop.xlane.xlu0 %725 }
 0x3d0   :  { %4122 = vrcp.f32 %v729_v26 }
 0x3d1   :  { %4124 = vrcp.f32 %v726_v27  ;;  %v991_v27 = vsel %vm284_vm2, %v4611_v31, 0 }
 0x3d3   :  { %v611_v36 = vpop.permute.xlu1 %610  ;;  %v736_v43 = vpop.permute.xlu0 %735 }
 0x3d5   :  { %v4117_v29 = vpop.eup %4116 }
 0x3d6   :  { %v483_v32 = vmul.f32 %v4117_v29, %v4101_v61  ;;  %v4720_v29 = vld [vmem:[#allocation13] sm:$0xff] }
 0x3d8   :  { %v484_v33 = vpack.c.bf16 %v483_v32, %v482_v30  ;;  %v817_v30 = vrot.slane %v4720_v29, %v4718_v28 }
 0x3d9   :  { %v4119_v34 = vpop.eup %4118 }
 0x3da   :  { %v4121_v35 = vpop.eup %4120  ;;  %3710 = vmatmul.mubr.msk.bf16.vlgmr.msra.gmra.mxu1 %vm336_vm3, %v484_v33  ;;  %v608_v38 = vmul.f32 %v4119_v34, %v4105_v1 }
 0x3db   :  { %3720 = vmatpush3.bf16.msra.mxu1 %v611_v36  ;;  %3721 = vmatprep.mubr.msk.bf16.mxu1 %vm4437_vm0, %v4436_v0  ;;  %v607_v37 = vmul.f32 %v4121_v35, %v4103_v62 }
 0x3dc   :  { %3731 = vmatprep.subr.bf16.mxu1 %v4436_v0 }
 0x3dd   :  { %v4123_v39 = vpop.eup %4122  ;;  %v609_v40 = vpack.c.bf16 %v608_v38, %v607_v37 }
 0x3de   :  { %v4125_v41 = vpop.eup %4124  ;;  %v733_v45 = vmul.f32 %v4123_v39, %v4109_v7 }
 0x3df   :  { %v732_v42 = vmul.f32 %v4125_v41, %v4665_v2 }
 0x3e1   :  { %v734_v46 = vpack.c.bf16 %v733_v45, %v732_v42 }
 0x3e2   :  { %3722 = vmatmul.mubr.msk.bf16.vlgmr.msra.gmra.mxu1 %vm336_vm3, %v609_v40 }
 0x3e3   :  { %3732 = vmatpush3.bf16.msra.mxu1 %v736_v43  ;;  %3733 = vmatprep.mubr.msk.bf16.mxu1 %vm4437_vm0, %v4436_v0 }
 0x3e4   :  { %3745 = vmatprep.subr.bf16.mxu1 %v4436_v0 }
 0x3ea   :  { %3734 = vmatmul.mubr.msk.bf16.vlgmr.msra.gmra.mxu1 %vm336_vm3, %v734_v46 }
 0x3eb   :  { %3749 = vmatprep.mubr.msk.bf16.mxu1 %vm4437_vm0, %v4436_v0 }
 0x465   :  { %v400_v47 = vpop.f32.mrf.mxu1 }
 0x467   :  { %v3699_v48 = vpop.f32.mrf.mxu1 }
 0x469   :  { %v403_v50 = vpop.f32.mrf.mxu1 }
 0x46b   :  { %v3700_v51 = vpop.f32.mrf.mxu1 }
 0x49a   :  { %v525_v52 = vpop.f32.mrf.mxu1 }
 0x49c   :  { %v3711_v53 = vpop.f32.mrf.mxu1 }
 0x49d   :  { %v4071_v53 = vld [vmem:[#allocation8] sm:$0xff]  }
 0x49e   :  { %v528_v54 = vpop.f32.mrf.mxu1 }
 0x49f   :  { %v4004_v56 = vpack.i.bf16 %v528_v54, %v525_v52  ;;  %v4070_v52 = vld [vmem:[#allocation8 + $0x8] sm:$0xff]  }
 0x4a0   :  { %v3712_v57 = vpop.f32.mrf.mxu1  ;;  %3746 = vmatpush3.bf16.msra.mxu1 %v4070_v52 }
 0x4a1   :  { %4005 = vrot.lane.b32.xlu1 %v4004_v56, %s4428_s23  ;;  %3747 = vmatprep.subr.bf16.mxu1 %v4436_v0 }
 0x4a2   :  { %v650_v58 = vpop.f32.mrf.mxu1 }
 0x4a4   :  { %v3723_v59 = vpop.f32.mrf.mxu1  ;;  %3748 = vmatpush3.bf16.msra.mxu1 %v4071_v53 }
 0x4a5   :  { %3759 = vmatprep.subr.bf16.mxu1 %v4436_v0 }
 0x4a6   :  { %v653_v61 = vpop.f32.mrf.mxu1 }
 0x4a7   :  { %v4009_v62 = vpack.i.bf16 %v653_v61, %v650_v58 }
 0x4a8   :  { %v3724_v63 = vpop.f32.mrf.mxu1 }
 0x4a9   :  { %4010 = vrot.lane.b32.xlu0 %v4009_v62, %s4448_s1  ;;  %v906_v62 = vrot.slane %v4720_v29, %v4608_v23  ;;  %v4739_v63 = vsub.s32 5, %v4582_v12 }
 0x4aa   :  { %v775_v1 = vpop.f32.mrf.mxu1 }
 0x4ac   :  { %v3735_v2 = vpop.f32.mrf.mxu1 }
 0x4ae   :  { %v778_v5 = vpop.f32.mrf.mxu1 }
 0x4af   :  { %v4014_v6 = vpack.i.bf16 %v778_v5, %v775_v1 }
 0x4b0   :  { %v3736_v7 = vpop.f32.mrf.mxu1 }
 0x4b1   :  { %4015 = vrot.lane.b32.xlu1 %v4014_v6, %s4449_s2  ;;  %v912_v6 = vrot.slane %v4720_v29, %v4739_v63 }
 0x513   :  { %v4006_v8 = vpop.permute.xlu1 %4005 }
 0x514   :  { %v4008_v10 = vunpack.i.h.bf16 %v4006_v8  ;;  %v4007_v11 = vunpack.i.l.bf16 %v4006_v8 }
 0x516   :  { %v807_v17 = vsel %vm284_vm2, %v403_v50, %v4008_v10  ;;  %v806_v18 = vsel %vm284_vm2, %v400_v47, %v4007_v11 }
 0x51b   :  { %v4011_v9 = vpop.permute.xlu0 %4010 }
 0x51c   :  { %v4013_v14 = vunpack.i.h.bf16 %v4011_v9  ;;  %v4012_v15 = vunpack.i.l.bf16 %v4011_v9 }
 0x51e   :  { %v809_v21 = vsel %vm336_vm3, %v807_v17, %v4013_v14  ;;  %v808_v22 = vsel %vm336_vm3, %v806_v18, %v4012_v15  ;;  %v923_v14 = vrot.slane %v4720_v29, %v4585_v13 }
 0x523   :  { %v4016_v16 = vpop.permute.xlu1 %4015 }
 0x524   :  { %v4018_v19 = vunpack.i.h.bf16 %v4016_v16  ;;  %v4017_v20 = vunpack.i.l.bf16 %v4016_v16 }
 0x526   :  { %v812_v24 = vsel %vm810_vm4, %v809_v21, %v4018_v19  ;;  %v811_v25 = vsel %vm810_vm4, %v808_v22, %v4017_v20 }
 0x527   :  { %v813_v26 = vpack.c.bf16 %v812_v24, %v811_v25 }
 0x529   :  { %3742 = vmatmul.mubr.msk.bf16.vlgmr.msra.gmra.mxu0 %vm166_vm1, %v813_v26 }
 0x52a   :  { %3754 = vmatpush3.bf16.xpose.msra.mxu0 %v991_v27  ;;  %3755 = vmatprep.mubr.msk.bf16.mxu0 %vm4437_vm0, %v4436_v0 }
 0x52b   :  { %3765 = vmatprep.subr.bf16.mxu0 %v4436_v0 }
 0x5e9   :  { %v867_v32 = vpop.f32.mrf.mxu0 }
 0x5ea   :  { %v868_v33 = vadd.f32 %v867_v32, %v817_v30 }
 0x5eb   :  { %v3743_v34 = vpop.f32.mrf.mxu0 }
 0x5ec   :  { %v874_v35 = vadd.f32 %v868_v33, %v4566_v3 }
 0x5ed   :  { %v870_v36 = vpop.f32.mrf.mxu0 }
 0x5ee   :  { %v871_v37 = vadd.f32 %v870_v36, %v817_v30  ;;  %v876_v38 = vsel %vm166_vm1, %v874_v35, 0.0 }
 0x5ef   :  { %877 = vadd.xlane.f32.xlu0 %v876_v38  ;;  %v3744_v39 = vpop.f32.mrf.mxu0 }
 0x5f0   :  { %v875_v40 = vadd.f32 %v871_v37, %v4568_v4 }
 0x5f2   :  { %v879_v41 = vsel %vm166_vm1, %v875_v40, 0.0 }
 0x5f3   :  { %880 = vadd.xlane.f32.xlu1 %v879_v41 }
 0x604   :  { %1120 = vrot.lane.b32.xlu1 %v4611_v31, %s4438_s18 }
 0x608   :  { %1245 = vrot.lane.b32.xlu1 %v4611_v31, %s4443_s25 }
 0x678   :  { %v878_v43 = vpop.xlane.xlu0 %877 }
 0x679   :  { %v883_v42 = vmul.f32 0.03125, %v878_v43 }
 0x67b   :  { %v885_v3 = vsub.f32 %v874_v35, %v883_v42 }
 0x67c   :  { %v881_v45 = vpop.xlane.xlu1 %880 }
 0x67d   :  { %v884_v46 = vmul.f32 0.03125, %v881_v45  ;;  %v887_v47 = vmul.f32 %v885_v3, %v885_v3 }
 0x67f   :  { %v886_v48 = vsub.f32 %v875_v40, %v884_v46  ;;  %v889_v50 = vsel %vm166_vm1, %v887_v47, 0.0 }
 0x680   :  { %890 = vadd.xlane.f32.xlu0 %v889_v50  ;;  %v1121_v20 = vpop.permute.xlu1 %1120 }
 0x681   :  { %v888_v4 = vmul.f32 %v886_v48, %v886_v48  ;;  %v1126_v22 = vsel %vm284_vm2, %v1121_v20, 0 }
 0x683   :  { %v892_v51 = vsel %vm166_vm1, %v888_v4, 0.0 }
 0x684   :  { %893 = vadd.xlane.f32.xlu0 %v892_v51  ;;  %v1246_v24 = vpop.permute.xlu1 %1245 }
 0x685   :  { %v1251_v26 = vsel %vm284_vm2, %v1246_v24, 0 }
 0x709   :  { %v891_v54 = vpop.xlane.xlu0 %890 }
 0x70a   :  { %v895_v55 = vmul.f32 0.03125, %v891_v54 }
 0x70c   :  { %v897_v56 = vadd.f32 1e-05, %v895_v55 }
 0x70d   :  { %v894_v57 = vpop.xlane.xlu0 %893 }
 0x70e   :  { %4126 = vrsqrt.f32 %v897_v56  ;;  %v896_v58 = vmul.f32 0.03125, %v894_v57 }
 0x710   :  { %v898_v59 = vadd.f32 1e-05, %v896_v58 }
 0x712   :  { %4128 = vrsqrt.f32 %v898_v59 }
 0x71b   :  { %v4127_v60 = vpop.eup %4126 }
 0x71c   :  { %v901_v61 = vmul.f32 %v4127_v60, %v885_v3 }
 0x71e   :  { %v907_v5 = vmul.f32 %v906_v62, %v901_v61 }
 0x71f   :  { %v4129_v1 = vpop.eup %4128 }
 0x720   :  { %v902_v2 = vmul.f32 %v4129_v1, %v886_v48  ;;  %v4743_v8 = vadd.f32 %v912_v6, %v907_v5 }
 0x722   :  { %v908_v7 = vmul.f32 %v906_v62, %v902_v2 }
 0x724   :  { %v4745_v9 = vadd.f32 %v912_v6, %v908_v7 }
 0x726   :  { %v915_v10 = vpack.c.bf16 %v4745_v9, %v4743_v8 }
 0x728   :  { %3750 = vmatmul.mubr.msk.bf16.vlgmr.msra.gmra.mxu1 %vm166_vm1, %v915_v10 }
 0x729   :  { %3761 = vmatprep.mubr.msk.bf16.mxu1 %vm4437_vm0, %v4436_v0 }
 0x7e8   :  { %v973_v11 = vpop.f32.mrf.mxu1 }
 0x7e9   :  { %v974_v17 = vadd.f32 %v973_v11, %v923_v14 }
 0x7ea   :  { %v3751_v15 = vpop.f32.mrf.mxu1 }
 0x7ec   :  { %v976_v16 = vpop.f32.mrf.mxu1 }
 0x7ed   :  { %v977_v18 = vadd.f32 %v976_v16, %v923_v14 }
 0x7ee   :  { %v3752_v19 = vpop.f32.mrf.mxu1 }
 0x7ef   :  { %v985_v21 = vpack.c.bf16 %v977_v18, %v974_v17 }
 0x7f1   :  { %1243 = vrot.lane.b32.xlu1 %v985_v21, %s4443_s25  ;;  %1118 = vrot.lane.b32.xlu0 %v985_v21, %s4438_s18 }
 0x7f2   :  { %3756 = vmatmul.mubr.msk.bf16.vlgmr.msra.gmra.mxu0 %vm284_vm2, %v985_v21 }
 0x7f3   :  { %3766 = vmatpush3.bf16.xpose.msra.mxu0 %v1126_v22  ;;  %3767 = vmatprep.mubr.msk.bf16.mxu0 %vm4437_vm0, %v4436_v0 }
 0x7f4   :  { %3777 = vmatprep.subr.bf16.mxu0 %v4436_v0 }
 0x7f5   :  { %1368 = vrot.lane.b32.xlu1 %v985_v21, %s4444_s7  ;;  %1370 = vrot.lane.b32.xlu0 %v4611_v31, %s4444_s7 }
 0x7f9   :  { %1038 = vrot.lane.b32.xlu0 %v4634_v44, %s4443_s25  ;;  %1040 = vrot.lane.b32.xlu1 %v4637_v49, %s4443_s25 }
 0x863   :  { %v1119_v25 = vpop.permute.xlu0 %1118  ;;  %v1244_v30 = vpop.permute.xlu1 %1243 }
 0x864   :  { %3768 = vmatmul.mubr.msk.bf16.vlgmr.msra.gmra.mxu0 %vm284_vm2, %v1119_v25 }
 0x865   :  { %3778 = vmatpush3.bf16.xpose.msra.mxu0 %v1251_v26  ;;  %3779 = vmatprep.mubr.msk.bf16.mxu0 %vm4437_vm0, %v4436_v0 }
 0x866   :  { %3789 = vmatprep.subr.bf16.mxu0 %v4436_v0 }
 0x867   :  { %v1371_v27 = vpop.permute.xlu0 %1370  ;;  %v1369_v44 = vpop.permute.xlu1 %1368 }
 0x868   :  { %v1376_v32 = vsel %vm284_vm2, %v1371_v27, 0 }
 0x86b   :  { %v4781_v33 = vpop.permute.xlu0 %1038  ;;  %v4784_v38 = vpop.permute.xlu1 %1040 }
 0x86c   :  { %3780 = vmatmul.mubr.msk.bf16.vlgmr.msra.gmra.mxu0 %vm284_vm2, %v1244_v30 }
 0x86d   :  { %3790 = vmatpush3.bf16.xpose.msra.mxu0 %v1376_v32  ;;  %3791 = vmatprep.mubr.msk.bf16.mxu0 %vm4437_vm0, %v4436_v0 }
 0x86e   :  { %3801 = vmatprep.subr.bf16.mxu0 %v4436_v0 }
 0x874   :  { %3792 = vmatmul.mubr.msk.bf16.vlgmr.msra.gmra.mxu0 %vm284_vm2, %v1369_v44 }
 0x875   :  { %3805 = vmatprep.mubr.msk.bf16.mxu0 %vm4437_vm0, %v4436_v0 }
 0x8b2   :  { %v1027_v49 = vpop.f32.mrf.mxu0 }
 0x8b3   :  { %v1034_v34 = vmul.f32 0.35355338, %v1027_v49 }
 0x8b4   :  { %v3757_v35 = vpop.f32.mrf.mxu0 }
 0x8b5   :  { %v1044_v36 = vadd.f32 %v4781_v33, %v1034_v34 }
 0x8b6   :  { %v1030_v37 = vpop.f32.mrf.mxu0 }
 0x8b7   :  { %v1035_v39 = vmul.f32 0.35355338, %v1030_v37  ;;  %v1046_v40 = vsel %vm336_vm3, %v1044_v36, -inf }
 0x8b8   :  { %1047 = vmax.xlane.f32.xlu0 %v1046_v40  ;;  %v3758_v41 = vpop.f32.mrf.mxu0 }
 0x8b9   :  { %v1045_v43 = vadd.f32 %v4784_v38, %v1035_v39 }
 0x8bb   :  { %v1049_v42 = vsel %vm336_vm3, %v1045_v43, -inf }
 0x8bc   :  { %1050 = vmax.xlane.f32.xlu1 %v1049_v42 }
 0x924   :  { %v1162_v3 = vpop.f32.mrf.mxu0 }
 0x925   :  { %v1169_v45 = vmul.f32 0.35355338, %v1162_v3 }
 0x926   :  { %v3769_v46 = vpop.f32.mrf.mxu0 }
 0x927   :  { %v1171_v47 = vadd.f32 %v1169_v45, %v4781_v33 }
 0x928   :  { %v1165_v48 = vpop.f32.mrf.mxu0 }
 0x929   :  { %v1170_v50 = vmul.f32 0.35355338, %v1165_v48  ;;  %v1173_v4 = vsel %vm336_vm3, %v1171_v47, -inf }
 0x92a   :  { %1174 = vmax.xlane.f32.xlu0 %v1173_v4  ;;  %v3770_v51 = vpop.f32.mrf.mxu0 }
 0x92b   :  { %v1172_v52 = vadd.f32 %v1170_v50, %v4784_v38 }
 0x92c   :  { %v1287_v53 = vpop.f32.mrf.mxu0 }
 0x92d   :  { %v1294_v54 = vmul.f32 0.35355338, %v1287_v53  ;;  %v1176_v55 = vsel %vm336_vm3, %v1172_v52, -inf }
 0x92e   :  { %1177 = vmax.xlane.f32.xlu0 %v1176_v55  ;;  %v3781_v56 = vpop.f32.mrf.mxu0 }
 0x92f   :  { %v1296_v57 = vadd.f32 %v1294_v54, %v4781_v33 }
 0x930   :  { %v1290_v58 = vpop.f32.mrf.mxu0 }
 0x931   :  { %v1295_v59 = vmul.f32 0.35355338, %v1290_v58  ;;  %v1298_v60 = vsel %vm336_vm3, %v1296_v57, -inf }
 0x932   :  { %1299 = vmax.xlane.f32.xlu1 %v1298_v60  ;;  %v3782_v61 = vpop.f32.mrf.mxu0 }
 0x933   :  { %v1297_v62 = vadd.f32 %v1295_v59, %v4784_v38 }
 0x934   :  { %v1412_v1 = vpop.f32.mrf.mxu0 }
 0x935   :  { %v1419_v2 = vmul.f32 0.35355338, %v1412_v1  ;;  %v1301_v5 = vsel %vm336_vm3, %v1297_v62, -inf }
 0x936   :  { %1302 = vmax.xlane.f32.xlu0 %v1301_v5  ;;  %v3793_v6 = vpop.f32.mrf.mxu0 }
 0x937   :  { %v1421_v7 = vadd.f32 %v1419_v2, %v4781_v33 }
 0x938   :  { %v1415_v10 = vpop.f32.mrf.mxu0 }
 0x939   :  { %v1420_v11 = vmul.f32 0.35355338, %v1415_v10  ;;  %v1423_v14 = vsel %vm336_vm3, %v1421_v7, -inf }
 0x93a   :  { %1424 = vmax.xlane.f32.xlu1 %v1423_v14  ;;  %v3794_v15 = vpop.f32.mrf.mxu0 }
 0x93b   :  { %v1422_v16 = vadd.f32 %v1420_v11, %v4784_v38 }
 0x93d   :  { %v1426_v17 = vsel %vm336_vm3, %v1422_v16, -inf }
 0x93e   :  { %1427 = vmax.xlane.f32.xlu0 %v1426_v17 }
 0x941   :  { %v1048_v21 = vpop.xlane.xlu0 %1047 }
 0x942   :  { %v1052_v22 = vsub.f32 %v1044_v36, %v1048_v21 }
 0x944   :  { %v1054_v26 = vmul.f32 1.442695, %v1052_v22 }
 0x945   :  { %v1051_v18 = vpop.xlane.xlu1 %1050 }
 0x946   :  { %v1053_v19 = vsub.f32 %v1045_v43, %v1051_v18 }
 0x948   :  { %v1056_v20 = vmul.f32 1.442695, %v1053_v19 }
 0x94a   :  { %4130 = vpow2.f32 %v1056_v20 }
 0x94b   :  { %1070 = vrot.lane.b32.xlu1 %v4611_v31, %s4439_s19  ;;  %4132 = vpow2.f32 %v1054_v26 }
 0x957   :  { %v4803_v24 = vpop.eup %4130 }
 0x958   :  { %v1061_v25 = vsel %vm336_vm3, %v4803_v24, 0.0  ;;  %v4133_v27 = vpop.eup %4132 }
 0x959   :  { %1062 = vadd.xlane.f32.xlu0 %v1061_v25  ;;  %v1058_v30 = vsel %vm336_vm3, %v4133_v27, 0.0 }
 0x96f   :  { %1059 = vadd.xlane.f32.xlu1 %v1058_v30 }
 0x9b3   :  { %v1175_v32 = vpop.xlane.xlu0 %1174 }
 0x9b4   :  { %v1179_v44 = vsub.f32 %v1171_v47, %v1175_v32 }
 0x9b6   :  { %v1181_v49 = vmul.f32 1.442695, %v1179_v44 }
 0x9b7   :  { %v1178_v34 = vpop.xlane.xlu0 %1177 }
 0x9b8   :  { %4134 = vpow2.f32 %v1181_v49  ;;  %v1180_v35 = vsub.f32 %v1172_v52, %v1178_v34 }
 0x9ba   :  { %v1183_v37 = vmul.f32 1.442695, %v1180_v35 }
 0x9bb   :  { %v1300_v36 = vpop.xlane.xlu1 %1299 }
 0x9bc   :  { %4136 = vpow2.f32 %v1183_v37  ;;  %v1304_v39 = vsub.f32 %v1296_v57, %v1300_v36 }
 0x9be   :  { %v1306_v40 = vmul.f32 1.442695, %v1304_v39 }
 0x9bf   :  { %v1303_v41 = vpop.xlane.xlu0 %1302 }
 0x9c0   :  { %4138 = vpow2.f32 %v1306_v40  ;;  %v1305_v43 = vsub.f32 %v1297_v62, %v1303_v41 }
 0x9c2   :  { %v1308_v42 = vmul.f32 1.442695, %v1305_v43 }
 0x9c3   :  { %v1425_v3 = vpop.xlane.xlu1 %1424 }
 0x9c4   :  { %4140 = vpow2.f32 %v1308_v42  ;;  %v1429_v45 = vsub.f32 %v1421_v7, %v1425_v3 }
 0x9c5   :  { %v4135_v46 = vpop.eup %4134 }
 0x9c6   :  { %v1431_v48 = vmul.f32 1.442695, %v1429_v45  ;;  %v1185_v47 = vsel %vm336_vm3, %v4135_v46, 0.0 }
 0x9c7   :  { %1186 = vadd.xlane.f32.xlu1 %v1185_v47  ;;  %v1071_v50 = vpop.permute.xlu1 %1070  ;;  %v1428_v4 = vpop.xlane.xlu0 %1427 }
 0x9c8   :  { %4142 = vpow2.f32 %v1431_v48  ;;  %v1430_v51 = vsub.f32 %v1422_v16, %v1428_v4  ;;  %3760 = vmatpush3.bf16.msra.mxu1 %v1071_v50  ;;  %v4072_v50 = vld [vmem:[%s5237_s6 + $0x18] sm:$0xff]  }
 0x9c9   :  { %v4137_v52 = vpop.eup %4136  ;;  %3771 = vmatprep.subr.bf16.mxu1 %v4436_v0  ;;  %3802 = vmatpush3.bf16.msra.mxu0 %v4072_v50  ;;  %v4076_v50 = vld [vmem:[%s5239_s8 + $0x18] sm:$0xff]  }
 0x9ca   :  { %v1433_v53 = vmul.f32 1.442695, %v1430_v51  ;;  %v1188_v54 = vsel %vm336_vm3, %v4137_v52, 0.0  ;;  %3803 = vmatprep.subr.bf16.mxu0 %v4436_v0 }
 0x9cb   :  { %1189 = vadd.xlane.f32.xlu0 %v1188_v54 }
 0x9cc   :  { %4144 = vpow2.f32 %v1433_v53 }
 0x9cd   :  { %v4139_v55 = vpop.eup %4138 }
 0x9ce   :  { %v1310_v56 = vsel %vm336_vm3, %v4139_v55, 0.0 }
 0x9cf   :  { %1311 = vadd.xlane.f32.xlu1 %v1310_v56 }
 0x9d1   :  { %v4141_v57 = vpop.eup %4140 }
 0x9d2   :  { %v1313_v58 = vsel %vm336_vm3, %v4141_v57, 0.0 }
 0x9d3   :  { %1314 = vadd.xlane.f32.xlu0 %v1313_v58 }
 0x9d5   :  { %v4143_v59 = vpop.eup %4142 }
 0x9d6   :  { %v1435_v60 = vsel %vm336_vm3, %v4143_v59, 0.0 }
 0x9d7   :  { %1436 = vadd.xlane.f32.xlu1 %v1435_v60 }
 0x9d9   :  { %v4145_v61 = vpop.eup %4144 }
 0x9da   :  { %v1438_v62 = vsel %vm336_vm3, %v4145_v61, 0.0 }
 0x9db   :  { %1439 = vadd.xlane.f32.xlu0 %v1438_v62 }
 0x9e2   :  { %v1063_v1 = vpop.xlane.xlu0 %1062 }
 0x9e3   :  { %4146 = vrcp.f32 %v1063_v1 }
 0x9e8   :  { %1321 = vrot.lane.b32.xlu1 %v4611_v31, %s4440_s20 }
 0x9ec   :  { %1446 = vrot.lane.b32.xlu1 %v4611_v31, %s4442_s24 }
 0x9f0   :  { %v4147_v5 = vpop.eup %4146 }
 0x9f1   :  { %1196 = vrot.lane.b32.xlu0 %v4611_v31, %s4441_s21  ;;  %v1067_v10 = vmul.f32 %v4147_v5, %v4803_v24 }
 0x9f8   :  { %v1060_v2 = vpop.xlane.xlu1 %1059 }
 0x9f9   :  { %4148 = vrcp.f32 %v1060_v2 }
 0xa06   :  { %v4149_v6 = vpop.eup %4148 }
 0xa07   :  { %v1066_v7 = vmul.f32 %v4149_v6, %v4133_v27 }
 0xa09   :  { %v1068_v11 = vpack.c.bf16 %v1067_v10, %v1066_v7 }
 0xa0b   :  { %3762 = vmatmul.mubr.msk.bf16.vlgmr.msra.gmra.mxu1 %vm336_vm3, %v1068_v11 }
 0xa0c   :  { %3773 = vmatprep.mubr.msk.bf16.mxu1 %vm4437_vm0, %v4436_v0 }
 0xa50   :  { %v1187_v15 = vpop.xlane.xlu1 %1186 }
 0xa54   :  { %v1190_v14 = vpop.xlane.xlu0 %1189 }
 0xa55   :  { %4150 = vrcp.f32 %v1190_v14 }
 0xa56   :  { %4152 = vrcp.f32 %v1187_v15 }
 0xa58   :  { %v1312_v17 = vpop.xlane.xlu1 %1311 }
 0xa5c   :  { %v1315_v16 = vpop.xlane.xlu0 %1314 }
 0xa5d   :  { %4154 = vrcp.f32 %v1315_v16 }
 0xa5e   :  { %4156 = vrcp.f32 %v1312_v17 }
 0xa60   :  { %v1437_v21 = vpop.xlane.xlu1 %1436 }
 0xa62   :  { %v4151_v18 = vpop.eup %4150 }
 0xa63   :  { %v4153_v20 = vpop.eup %4152  ;;  %v1194_v22 = vmul.f32 %v4151_v18, %v4137_v52 }
 0xa64   :  { %v1440_v19 = vpop.xlane.xlu0 %1439  ;;  %v1193_v25 = vmul.f32 %v4153_v20, %v4135_v46  ;;  %v1322_v30 = vpop.permute.xlu1 %1321 }
 0xa65   :  { %4158 = vrcp.f32 %v1440_v19 }
 0xa66   :  { %4160 = vrcp.f32 %v1437_v21  ;;  %v1195_v26 = vpack.c.bf16 %v1194_v22, %v1193_v25 }
 0xa68   :  { %v1197_v24 = vpop.permute.xlu0 %1196  ;;  %v1447_v37 = vpop.permute.xlu1 %1446 }
 0xa69   :  { %3772 = vmatpush3.bf16.msra.mxu1 %v1197_v24  ;;  %v4858_v24 = vsub.s32 2, %v4582_v12 }
 0xa6a   :  { %3783 = vmatprep.subr.bf16.mxu1 %v4436_v0  ;;  %v4155_v27 = vpop.eup %4154 }
 0xa6b   :  { %v4157_v32 = vpop.eup %4156  ;;  %v1319_v44 = vmul.f32 %v4155_v27, %v4141_v57  ;;  %v1527_v25 = vrot.slane %v4720_v29, %v4858_v24 }
 0xa6c   :  { %3774 = vmatmul.mubr.msk.bf16.vlgmr.msra.gmra.mxu1 %vm336_vm3, %v1195_v26  ;;  %v1318_v49 = vmul.f32 %v4157_v32, %v4139_v55  ;;  %v4073_v55 = vld [vmem:[%s5237_s6 + $0x10] sm:$0xff]  }
 0xa6d   :  { %3784 = vmatpush3.bf16.msra.mxu1 %v1322_v30  ;;  %3785 = vmatprep.mubr.msk.bf16.mxu1 %vm4437_vm0, %v4436_v0 }
 0xa6e   :  { %3795 = vmatprep.subr.bf16.mxu1 %v4436_v0  ;;  %v1320_v34 = vpack.c.bf16 %v1319_v44, %v1318_v49  ;;  %3804 = vmatpush3.bf16.msra.mxu0 %v4073_v55 }
 0xa6f   :  { %3817 = vmatprep.subr.bf16.mxu0 %v4436_v0 }
 0xa72   :  { %v4159_v35 = vpop.eup %4158 }
 0xa73   :  { %v4161_v36 = vpop.eup %4160  ;;  %v1444_v39 = vmul.f32 %v4159_v35, %v4145_v61 }
 0xa74   :  { %3786 = vmatmul.mubr.msk.bf16.vlgmr.msra.gmra.mxu1 %vm336_vm3, %v1320_v34  ;;  %v1443_v40 = vmul.f32 %v4161_v36, %v4143_v59 }
 0xa75   :  { %3796 = vmatpush3.bf16.msra.mxu1 %v1447_v37  ;;  %3797 = vmatprep.mubr.msk.bf16.mxu1 %vm4437_vm0, %v4436_v0 }
 0xa76   :  { %3809 = vmatprep.subr.bf16.mxu1 %v4436_v0  ;;  %v1445_v41 = vpack.c.bf16 %v1444_v39, %v1443_v40 }
 0xa7c   :  { %3798 = vmatmul.mubr.msk.bf16.vlgmr.msra.gmra.mxu1 %vm336_vm3, %v1445_v41 }
 0xa7d   :  { %3813 = vmatprep.mubr.msk.bf16.mxu1 %vm4437_vm0, %v4436_v0 }
 0xacb   :  { %v1110_v43 = vpop.f32.mrf.mxu1 }
 0xacd   :  { %v3763_v42 = vpop.f32.mrf.mxu1 }
 0xacf   :  { %v1113_v3 = vpop.f32.mrf.mxu1 }
 0xad1   :  { %v3764_v45 = vpop.f32.mrf.mxu1 }
 0xb2c   :  { %v1236_v46 = vpop.f32.mrf.mxu1 }
 0xb2e   :  { %v3775_v48 = vpop.f32.mrf.mxu1 }
 0xb30   :  { %v1239_v47 = vpop.f32.mrf.mxu1 }
 0xb31   :  { %v4019_v4 = vpack.i.bf16 %v1239_v47, %v1236_v46  ;;  %v4074_v47 = vld [vmem:[#allocation11 + $0x8] sm:$0xff]  }
 0xb32   :  { %v3776_v51 = vpop.f32.mrf.mxu1  ;;  %3810 = vmatpush3.bf16.msra.mxu1 %v4074_v47 }
 0xb33   :  { %4020 = vrot.lane.b32.xlu0 %v4019_v4, %s4428_s23  ;;  %3811 = vmatprep.subr.bf16.mxu1 %v4436_v0 }
 0xb34   :  { %v1361_v52 = vpop.f32.mrf.mxu1 }
 0xb36   :  { %v3787_v53 = vpop.f32.mrf.mxu1 }
 0xb38   :  { %v1364_v54 = vpop.f32.mrf.mxu1 }
 0xb39   :  { %v4024_v56 = vpack.i.bf16 %v1364_v54, %v1361_v52 }
 0xb3a   :  { %v3788_v57 = vpop.f32.mrf.mxu1 }
 0xb3b   :  { %4025 = vrot.lane.b32.xlu1 %v4024_v56, %s4448_s1  ;;  %v1614_v56 = vsub.s32 6, %v4582_v12 }
 0xb3c   :  { %v1486_v58 = vpop.f32.mrf.mxu1 }
 0xb3e   :  { %v3799_v59 = vpop.f32.mrf.mxu1 }
 0xb3f   :  { %v1615_v59 = vrot.slane %v4720_v29, %v1614_v56 }
 0xb40   :  { %v1489_v60 = vpop.f32.mrf.mxu1 }
 0xb41   :  { %v4029_v61 = vpack.i.bf16 %v1489_v60, %v1486_v58  ;;  %v1620_v60 = vsub.s32 7, %v4582_v12 }
 0xb42   :  { %v3800_v62 = vpop.f32.mrf.mxu1 }
 0xb43   :  { %4030 = vrot.lane.b32.xlu0 %v4029_v61, %s4449_s2 }
 0xba5   :  { %v4021_v1 = vpop.permute.xlu0 %4020 }
 0xba6   :  { %v4023_v5 = vunpack.i.h.bf16 %v4021_v1  ;;  %v4022_v6 = vunpack.i.l.bf16 %v4021_v1 }
 0xba8   :  { %v1518_v14 = vsel %vm284_vm2, %v1113_v3, %v4023_v5  ;;  %v1517_v15 = vsel %vm284_vm2, %v1110_v43, %v4022_v6 }
 0xbad   :  { %v4026_v2 = vpop.permute.xlu1 %4025 }
 0xbae   :  { %v4028_v7 = vunpack.i.h.bf16 %v4026_v2  ;;  %v4027_v10 = vunpack.i.l.bf16 %v4026_v2  ;;  %v1621_v2 = vrot.slane %v4720_v29, %v1620_v60 }
 0xbb0   :  { %v1520_v18 = vsel %vm336_vm3, %v1518_v14, %v4028_v7  ;;  %v1519_v19 = vsel %vm336_vm3, %v1517_v15, %v4027_v10  ;;  %v4078_v14 = vld [vmem:[%s5239_s8 + $0x8] sm:$0xff]   ;;  %v4079_v15 = vld [vmem:[%s5239_s8] sm:$0xff]  }
 0xbb5   :  { %v4031_v11 = vpop.permute.xlu0 %4030 }
 0xbb6   :  { %v4033_v16 = vunpack.i.h.bf16 %v4031_v11  ;;  %v4032_v17 = vunpack.i.l.bf16 %v4031_v11  ;;  %v4077_v11 = vld [vmem:[%s5239_s8 + $0x10] sm:$0xff]  }
 0xbb8   :  { %v1522_v20 = vsel %vm810_vm4, %v1520_v18, %v4033_v16  ;;  %v1521_v21 = vsel %vm810_vm4, %v1519_v19, %v4032_v17  ;;  %v4900_v16 = vld [vmem:[%s5240_s9] sm:$0x1f] }
 0xbb9   :  { %v1523_v22 = vpack.c.bf16 %v1522_v20, %v1521_v21  ;;  %v1632_v17 = vrot.slane %v4900_v16, %v4858_v24 }
 0xbbb   :  { %3806 = vmatmul.mubr.msk.bf16.vlgmr.msra.gmra.mxu0 %vm166_vm1, %v1523_v22 }
 0xbbc   :  { %3825 = vmatprep.mubr.msk.bf16.mxu0 %vm4437_vm0, %v4436_v0  ;;  %3818 = vmatpush3.bf16.msra.mxu0 %v4076_v50 }
 0xbbd   :  { %3819 = vmatprep.subr.bf16.mxu0 %v4436_v0 }
 0xbc0   :  { %3820 = vmatpush3.bf16.msra.mxu0 %v4077_v11 }
 0xbc1   :  { %3821 = vmatprep.subr.bf16.mxu0 %v4436_v0 }
 0xbc4   :  { %3822 = vmatpush3.bf16.msra.mxu0 %v4078_v14 }
 0xbc5   :  { %3823 = vmatprep.subr.bf16.mxu0 %v4436_v0 }
 0xbc8   :  { %3824 = vmatpush3.bf16.msra.mxu0 %v4079_v15 }
 0xbc9   :  { %3843 = vmatprep.subr.bf16.mxu0 %v4436_v0 }
 0xc7b   :  { %v1577_v26 = vpop.f32.mrf.mxu0 }
 0xc7c   :  { %v1578_v27 = vadd.f32 %v1577_v26, %v1527_v25 }
 0xc7d   :  { %v3807_v30 = vpop.f32.mrf.mxu0 }
 0xc7e   :  { %v1584_v32 = vadd.f32 %v1578_v27, %v4743_v8 }
 0xc7f   :  { %v1580_v44 = vpop.f32.mrf.mxu0 }
 0xc80   :  { %v1581_v49 = vadd.f32 %v1580_v44, %v1527_v25  ;;  %v1586_v34 = vsel %vm166_vm1, %v1584_v32, 0.0 }
 0xc81   :  { %1587 = vadd.xlane.f32.xlu1 %v1586_v34  ;;  %v3808_v35 = vpop.f32.mrf.mxu0 }
 0xc82   :  { %v1585_v37 = vadd.f32 %v1581_v49, %v4745_v9  ;;  %v4075_v9 = vld [vmem:[#allocation11] sm:$0xff]  }
 0xc83   :  { %3812 = vmatpush3.bf16.msra.mxu1 %v4075_v9 }
 0xc84   :  { %v1589_v36 = vsel %vm166_vm1, %v1585_v37, 0.0  ;;  %3829 = vmatprep.subr.bf16.mxu1 %v4436_v0 }
 0xc85   :  { %1590 = vadd.xlane.f32.xlu0 %v1589_v36 }
 0xd0a   :  { %v1588_v39 = vpop.xlane.xlu1 %1587 }
 0xd0b   :  { %v1592_v40 = vmul.f32 0.03125, %v1588_v39 }
 0xd0d   :  { %v1594_v41 = vsub.f32 %v1584_v32, %v1592_v40  ;;  %v4908_v32 = vsub.s32 3, %v4582_v12 }
 0xd0e   :  { %v1591_v43 = vpop.xlane.xlu0 %1590 }
 0xd0f   :  { %v1593_v42 = vmul.f32 0.03125, %v1591_v43  ;;  %v1596_v3 = vmul.f32 %v1594_v41, %v1594_v41  ;;  %v1703_v44 = vrot.slane %v4720_v29, %v4908_v32 }
 0xd11   :  { %v1595_v45 = vsub.f32 %v1585_v37, %v1593_v42  ;;  %v1598_v8 = vsel %vm166_vm1, %v1596_v3, 0.0 }
 0xd12   :  { %1599 = vadd.xlane.f32.xlu0 %v1598_v8 }
 0xd13   :  { %v1597_v46 = vmul.f32 %v1595_v45, %v1595_v45 }
 0xd15   :  { %v1601_v48 = vsel %vm166_vm1, %v1597_v46, 0.0 }
 0xd16   :  { %1602 = vadd.xlane.f32.xlu1 %v1601_v48 }
 0xd9b   :  { %v1600_v4 = vpop.xlane.xlu0 %1599 }
 0xd9c   :  { %v1604_v51 = vmul.f32 0.03125, %v1600_v4 }
 0xd9e   :  { %v1606_v52 = vadd.f32 1e-05, %v1604_v51  ;;  %v4080_v51 = vld [vmem:[%s5234_s3 + $0x18] sm:$0xff]  }
 0xd9f   :  { %v1603_v53 = vpop.xlane.xlu1 %1602 }
 0xda0   :  { %4162 = vrsqrt.f32 %v1606_v52  ;;  %v1605_v54 = vmul.f32 0.03125, %v1603_v53  ;;  %v4081_v52 = vld [vmem:[%s5234_s3 + $0x10] sm:$0xff]  }
 0xda2   :  { %v1607_v55 = vadd.f32 1e-05, %v1605_v54 }
 0xda4   :  { %4164 = vrsqrt.f32 %v1607_v55 }
 0xdad   :  { %v4163_v57 = vpop.eup %4162 }
 0xdae   :  { %v1610_v58 = vmul.f32 %v4163_v57, %v1594_v41 }
 0xdb0   :  { %v1616_v1 = vmul.f32 %v1615_v59, %v1610_v58 }
 0xdb1   :  { %v4165_v61 = vpop.eup %4164 }
 0xdb2   :  { %v1611_v62 = vmul.f32 %v4165_v61, %v1595_v45  ;;  %v1622_v6 = vadd.f32 %v1621_v2, %v1616_v1  ;;  %v4924_v61 = vld [vmem:[#allocation13 + $0x8] sm:$0xff] }
 0xdb4   :  { %v1617_v5 = vmul.f32 %v1615_v59, %v1611_v62 }
 0xdb6   :  { %v1623_v7 = vadd.f32 %v1621_v2, %v1617_v5  ;;  %v1804_v2 = vrot.slane %v4924_v61, %v4585_v13 }
 0xdb8   :  { %v1624_v10 = vpack.c.bf16 %v1623_v7, %v1622_v6 }
 0xdba   :  { %3814 = vmatmul.mubr.msk.bf16.vlgmr.msra.gmra.mxu1 %vm166_vm1, %v1624_v10  ;;  %v1810_v10 = vrot.slane %v4924_v61, %v4718_v28 }
 0xdbb   :  { %3833 = vmatprep.mubr.msk.bf16.mxu1 %vm4437_vm0, %v4436_v0  ;;  %3830 = vmatpush3.bf16.msra.mxu1 %v4080_v51 }
 0xdbc   :  { %3831 = vmatprep.subr.bf16.mxu1 %v4436_v0 }
 0xdbf   :  { %3832 = vmatpush3.bf16.msra.mxu1 %v4081_v52 }
 0xdc0   :  { %3837 = vmatprep.subr.bf16.mxu1 %v4436_v0 }
 0xe7a   :  { %v1682_v18 = vpop.f32.mrf.mxu1 }
 0xe7b   :  { %v1683_v20 = vadd.f32 %v1682_v18, %v1632_v17 }
 0xe7c   :  { %v3815_v19 = vpop.f32.mrf.mxu1 }
 0xe7d   :  { %v1689_v26 = vmax.f32 %v1683_v20, 0.0  ;;  %v1822_v19 = vrot.slane %v4900_v16, %v4718_v28 }
 0xe7e   :  { %v1685_v21 = vpop.f32.mrf.mxu1 }
 0xe7f   :  { %v1686_v22 = vadd.f32 %v1685_v21, %v1632_v17 }
 0xe80   :  { %v3816_v25 = vpop.f32.mrf.mxu1 }
 0xe81   :  { %v1690_v27 = vmax.f32 %v1686_v22, 0.0 }
 0xe83   :  { %v1691_v30 = vpack.c.bf16 %v1690_v27, %v1689_v26 }
 0xe85   :  { %3826 = vmatmul.mubr.msk.bf16.vlgmr.msra.gmra.mxu0 %vm1728_vm5, %v1691_v30 }
 0xe86   :  { %3845 = vmatprep.mubr.msk.bf16.mxu0 %vm4437_vm0, %v4436_v0 }
 0xf45   :  { %v1766_v49 = vpop.f32.mrf.mxu0 }
 0xf46   :  { %v1767_v34 = vadd.f32 %v1766_v49, %v1703_v44 }
 0xf47   :  { %v3827_v35 = vpop.f32.mrf.mxu0 }
 0xf48   :  { %v1773_v37 = vadd.f32 %v1767_v34, %v1622_v6 }
 0xf49   :  { %v1769_v36 = vpop.f32.mrf.mxu0 }
 0xf4a   :  { %v1770_v39 = vadd.f32 %v1769_v36, %v1703_v44  ;;  %v1775_v40 = vsel %vm166_vm1, %v1773_v37, 0.0 }
 0xf4b   :  { %1776 = vadd.xlane.f32.xlu0 %v1775_v40  ;;  %v3828_v41 = vpop.f32.mrf.mxu0 }
 0xf4c   :  { %v1774_v43 = vadd.f32 %v1770_v39, %v1623_v7 }
 0xf4e   :  { %v1778_v42 = vsel %vm166_vm1, %v1774_v43, 0.0 }
 0xf4f   :  { %1779 = vadd.xlane.f32.xlu1 %v1778_v42 }
 0xfd4   :  { %v1777_v3 = vpop.xlane.xlu0 %1776 }
 0xfd5   :  { %v1781_v45 = vmul.f32 0.03125, %v1777_v3 }
 0xfd7   :  { %v1783_v8 = vsub.f32 %v1773_v37, %v1781_v45  ;;  %v4251_v45 = vld [vmem:[#allocation7] sm:$0xff] }
 0xfd8   :  { %v1780_v46 = vpop.xlane.xlu1 %1779 }
 0xfd9   :  { %v1782_v48 = vmul.f32 0.03125, %v1780_v46  ;;  %v1785_v29 = vmul.f32 %v1783_v8, %v1783_v8 }
 0xfdb   :  { %v1784_v47 = vsub.f32 %v1774_v43, %v1782_v48  ;;  %v1787_v9 = vsel %vm166_vm1, %v1785_v29, 0.0 }
 0xfdc   :  { %1788 = vadd.xlane.f32.xlu0 %v1787_v9  ;;  %v4252_v9 = vld [vmem:[#allocation7 + $0x8] sm:$0xff] }
 0xfdd   :  { %v1786_v50 = vmul.f32 %v1784_v47, %v1784_v47 }
 0xfdf   :  { %v1790_v4 = vsel %vm166_vm1, %v1786_v50, 0.0 }
 0xfe0   :  { %1791 = vadd.xlane.f32.xlu1 %v1790_v4 }
0x1065   :  { %v1789_v53 = vpop.xlane.xlu0 %1788 }
0x1066   :  { %v1793_v54 = vmul.f32 0.03125, %v1789_v53 }
0x1068   :  { %v1795_v55 = vadd.f32 1e-05, %v1793_v54 }
0x1069   :  { %v1792_v57 = vpop.xlane.xlu1 %1791 }
0x106a   :  { %4166 = vrsqrt.f32 %v1795_v55  ;;  %v1794_v58 = vmul.f32 0.03125, %v1792_v57 }
0x106c   :  { %v1796_v59 = vadd.f32 1e-05, %v1794_v58 }
0x106e   :  { %4168 = vrsqrt.f32 %v1796_v59 }
0x1077   :  { %v4167_v62 = vpop.eup %4166 }
0x1078   :  { %v1799_v1 = vmul.f32 %v4167_v62, %v1783_v8 }
0x107a   :  { %v1805_v7 = vmul.f32 %v1804_v2, %v1799_v1 }
0x107b   :  { %v4169_v5 = vpop.eup %4168 }
0x107c   :  { %v1800_v6 = vmul.f32 %v4169_v5, %v1784_v47  ;;  %v4930_v14 = vadd.f32 %v1810_v10, %v1805_v7 }
0x107e   :  { %v1806_v11 = vmul.f32 %v1804_v2, %v1800_v6 }
0x1080   :  { %v4932_v15 = vadd.f32 %v1810_v10, %v1806_v11 }
0x1082   :  { %v1813_v17 = vpack.c.bf16 %v4932_v15, %v4930_v14 }
0x1084   :  { %3834 = vmatmul.mubr.msk.bf16.vlgmr.msra.gmra.mxu1 %vm166_vm1, %v1813_v17 }
0x1085   :  { %3839 = vmatprep.mubr.msk.bf16.mxu1 %vm4437_vm0, %v4436_v0 }
0x1144   :  { %v1872_v18 = vpop.f32.mrf.mxu1 }
0x1145   :  { %v1873_v22 = vadd.f32 %v1872_v18, %v1822_v19 }
0x1146   :  { %v3835_v20 = vpop.f32.mrf.mxu1 }
0x1148   :  { %v1875_v21 = vpop.f32.mrf.mxu1 }
0x1149   :  { %v1876_v25 = vadd.f32 %v1875_v21, %v1822_v19 }
0x114a   :  { %v3836_v26 = vpop.f32.mrf.mxu1 }
0x114b   :  { %v4941_v27 = vpack.c.bf16 %v1876_v25, %v1873_v22 }
0x114d   :  { %2011 = vrot.lane.b32.xlu1 %v4941_v27, %s4441_s21  ;;  %1886 = vrot.lane.b32.xlu0 %v4941_v27, %s4439_s19 }
0x1151   :  { %2009 = vrot.lane.b32.xlu1 %v4941_v27, %s4438_s18  ;;  %2136 = vrot.lane.b32.xlu0 %v4941_v27, %s4440_s20 }
0x1155   :  { %2134 = vrot.lane.b32.xlu1 %v4941_v27, %s4443_s25  ;;  %2261 = vrot.lane.b32.xlu0 %v4941_v27, %s4442_s24 }
0x1159   :  { %2259 = vrot.lane.b32.xlu1 %v4941_v27, %s4444_s7 }
0x11bf   :  { %v1887_v16 = vpop.permute.xlu0 %1886  ;;  %v2012_v44 = vpop.permute.xlu1 %2011 }
0x11c0   :  { %v1892_v30 = vsel %vm284_vm2, %v1887_v16, 0  ;;  %v2017_v49 = vsel %vm284_vm2, %v2012_v44, 0 }
0x11c1   :  { %3838 = vmatpush3.bf16.xpose.msra.mxu1 %v1892_v30 }
0x11c2   :  { %3849 = vmatprep.subr.bf16.mxu1 %v4436_v0 }
0x11c3   :  { %v2137_v34 = vpop.permute.xlu0 %2136  ;;  %v2010_v35 = vpop.permute.xlu1 %2009 }
0x11c4   :  { %v2142_v37 = vsel %vm284_vm2, %v2137_v34, 0 }
0x11c7   :  { %v2262_v36 = vpop.permute.xlu0 %2261  ;;  %v2135_v39 = vpop.permute.xlu1 %2134 }
0x11c8   :  { %3840 = vmatmul.mubr.msk.bf16.vlgmr.msra.gmra.mxu1 %vm284_vm2, %v4941_v27  ;;  %v2267_v40 = vsel %vm284_vm2, %v2262_v36, 0 }
0x11c9   :  { %3850 = vmatpush3.bf16.xpose.msra.mxu1 %v2017_v49  ;;  %3851 = vmatprep.mubr.msk.bf16.mxu1 %vm4437_vm0, %v4436_v0 }
0x11ca   :  { %3861 = vmatprep.subr.bf16.mxu1 %v4436_v0 }
0x11cb   :  { %v2260_v41 = vpop.permute.xlu1 %2259 }
0x11d0   :  { %3852 = vmatmul.mubr.msk.bf16.vlgmr.msra.gmra.mxu1 %vm284_vm2, %v2010_v35 }
0x11d1   :  { %3862 = vmatpush3.bf16.xpose.msra.mxu1 %v2142_v37  ;;  %3863 = vmatprep.mubr.msk.bf16.mxu1 %vm4437_vm0, %v4436_v0 }
0x11d2   :  { %3873 = vmatprep.subr.bf16.mxu1 %v4436_v0 }
0x11d8   :  { %3864 = vmatmul.mubr.msk.bf16.vlgmr.msra.gmra.mxu1 %vm284_vm2, %v2135_v39 }
0x11d9   :  { %3874 = vmatpush3.bf16.xpose.msra.mxu1 %v2267_v40  ;;  %3875 = vmatprep.mubr.msk.bf16.mxu1 %vm4437_vm0, %v4436_v0 }
0x11da   :  { %3885 = vmatprep.subr.bf16.mxu1 %v4436_v0 }
0x11e0   :  { %3876 = vmatmul.mubr.msk.bf16.vlgmr.msra.gmra.mxu1 %vm284_vm2, %v2260_v41 }
0x11e1   :  { %3889 = vmatprep.mubr.msk.bf16.mxu1 %vm4437_vm0, %v4436_v0 }
0x1288   :  { %v1928_v43 = vpop.f32.mrf.mxu1 }
0x1289   :  { %v1935_v42 = vmul.f32 0.35355338, %v1928_v43 }
0x128a   :  { %v3841_v3 = vpop.f32.mrf.mxu1 }
0x128b   :  { %v1937_v8 = vadd.f32 %v4251_v45, %v1935_v42 }
0x128c   :  { %v1931_v46 = vpop.f32.mrf.mxu1 }
0x128d   :  { %v1936_v48 = vmul.f32 0.35355338, %v1931_v46  ;;  %v1939_v29 = vsel %vm336_vm3, %v1937_v8, -inf }
0x128e   :  { %1940 = vmax.xlane.f32.xlu0 %v1939_v29  ;;  %v3842_v47 = vpop.f32.mrf.mxu1 }
0x128f   :  { %v1938_v50 = vadd.f32 %v4252_v9, %v1936_v48 }
0x1290   :  { %v2053_v4 = vpop.f32.mrf.mxu1 }
0x1291   :  { %v2060_v51 = vmul.f32 0.35355338, %v2053_v4  ;;  %v1942_v52 = vsel %vm336_vm3, %v1938_v50, -inf }
0x1292   :  { %1943 = vmax.xlane.f32.xlu1 %v1942_v52  ;;  %v3853_v53 = vpop.f32.mrf.mxu1 }
0x1293   :  { %v2062_v54 = vadd.f32 %v4251_v45, %v2060_v51 }
0x1294   :  { %v2056_v55 = vpop.f32.mrf.mxu1 }
0x1295   :  { %v2061_v57 = vmul.f32 0.35355338, %v2056_v55  ;;  %v2064_v58 = vsel %vm336_vm3, %v2062_v54, -inf }
0x1296   :  { %2065 = vmax.xlane.f32.xlu0 %v2064_v58  ;;  %v3854_v59 = vpop.f32.mrf.mxu1 }
0x1297   :  { %v2063_v62 = vadd.f32 %v4252_v9, %v2061_v57 }
0x1298   :  { %v2178_v1 = vpop.f32.mrf.mxu1 }
0x1299   :  { %v2185_v2 = vmul.f32 0.35355338, %v2178_v1  ;;  %v2067_v5 = vsel %vm336_vm3, %v2063_v62, -inf }
0x129a   :  { %2068 = vmax.xlane.f32.xlu0 %v2067_v5  ;;  %v3865_v6 = vpop.f32.mrf.mxu1 }
0x129b   :  { %v2187_v7 = vadd.f32 %v4251_v45, %v2185_v2 }
0x129c   :  { %v2181_v10 = vpop.f32.mrf.mxu1 }
0x129d   :  { %v2186_v11 = vmul.f32 0.35355338, %v2181_v10  ;;  %v2189_v17 = vsel %vm336_vm3, %v2187_v7, -inf }
0x129e   :  { %2190 = vmax.xlane.f32.xlu1 %v2189_v17  ;;  %v3866_v18 = vpop.f32.mrf.mxu1 }
0x129f   :  { %v2188_v19 = vadd.f32 %v4252_v9, %v2186_v11 }
0x12a0   :  { %v2303_v20 = vpop.f32.mrf.mxu1 }
0x12a1   :  { %v2310_v21 = vmul.f32 0.35355338, %v2303_v20  ;;  %v2192_v22 = vsel %vm336_vm3, %v2188_v19, -inf }
0x12a2   :  { %2193 = vmax.xlane.f32.xlu0 %v2192_v22  ;;  %v3877_v25 = vpop.f32.mrf.mxu1 }
0x12a3   :  { %v2312_v26 = vadd.f32 %v4251_v45, %v2310_v21 }
0x12a4   :  { %v2306_v16 = vpop.f32.mrf.mxu1 }
0x12a5   :  { %v2311_v30 = vmul.f32 0.35355338, %v2306_v16  ;;  %v2314_v44 = vsel %vm336_vm3, %v2312_v26, -inf }
0x12a6   :  { %2315 = vmax.xlane.f32.xlu1 %v2314_v44  ;;  %v3878_v49 = vpop.f32.mrf.mxu1 }
0x12a7   :  { %v2313_v34 = vadd.f32 %v4252_v9, %v2311_v30 }
0x12a9   :  { %v2317_v35 = vsel %vm336_vm3, %v2313_v34, -inf }
0x12aa   :  { %2318 = vmax.xlane.f32.xlu0 %v2317_v35 }
0x12b7   :  { %1962 = vrot.lane.b32.xlu1 %v4941_v27, %s4429_s27 }
0x1317   :  { %v1941_v37 = vpop.xlane.xlu0 %1940 }
0x1318   :  { %v1945_v36 = vsub.f32 %v1937_v8, %v1941_v37 }
0x131a   :  { %v1947_v39 = vmul.f32 1.442695, %v1945_v36 }
0x131b   :  { %v1944_v40 = vpop.xlane.xlu1 %1943 }
0x131c   :  { %4170 = vpow2.f32 %v1947_v39  ;;  %v1946_v41 = vsub.f32 %v1938_v50, %v1944_v40 }
0x131e   :  { %v1949_v43 = vmul.f32 1.442695, %v1946_v41 }
0x131f   :  { %v2066_v42 = vpop.xlane.xlu0 %2065 }
0x1320   :  { %4172 = vpow2.f32 %v1949_v43  ;;  %v2070_v3 = vsub.f32 %v2062_v54, %v2066_v42 }
0x1322   :  { %v2072_v45 = vmul.f32 1.442695, %v2070_v3 }
0x1323   :  { %v2069_v46 = vpop.xlane.xlu0 %2068 }
0x1324   :  { %4174 = vpow2.f32 %v2072_v45  ;;  %v2071_v48 = vsub.f32 %v2063_v62, %v2069_v46 }
0x1326   :  { %v2074_v29 = vmul.f32 1.442695, %v2071_v48 }
0x1327   :  { %v2191_v47 = vpop.xlane.xlu1 %2190 }
0x1328   :  { %4176 = vpow2.f32 %v2074_v29  ;;  %v2195_v9 = vsub.f32 %v2187_v7, %v2191_v47 }
0x1329   :  { %v4171_v4 = vpop.eup %4170 }
0x132a   :  { %v2197_v51 = vmul.f32 1.442695, %v2195_v9  ;;  %v1951_v8 = vsel %vm336_vm3, %v4171_v4, 0.0 }
0x132b   :  { %v2194_v52 = vpop.xlane.xlu0 %2193  ;;  %1952 = vadd.xlane.f32.xlu1 %v1951_v8 }
0x132c   :  { %4178 = vpow2.f32 %v2197_v51  ;;  %v2196_v50 = vsub.f32 %v2188_v19, %v2194_v52 }
0x132d   :  { %v4173_v53 = vpop.eup %4172 }
0x132e   :  { %v2199_v55 = vmul.f32 1.442695, %v2196_v50  ;;  %v1954_v54 = vsel %vm336_vm3, %v4173_v53, 0.0 }
0x132f   :  { %v2316_v57 = vpop.xlane.xlu1 %2315  ;;  %1955 = vadd.xlane.f32.xlu0 %v1954_v54 }
0x1330   :  { %4180 = vpow2.f32 %v2199_v55  ;;  %v2320_v58 = vsub.f32 %v2312_v26, %v2316_v57 }
0x1331   :  { %v4175_v59 = vpop.eup %4174 }
0x1332   :  { %v2322_v62 = vmul.f32 1.442695, %v2320_v58  ;;  %v2076_v1 = vsel %vm336_vm3, %v4175_v59, 0.0 }
0x1333   :  { %2077 = vadd.xlane.f32.xlu1 %v2076_v1  ;;  %v1963_v2 = vpop.permute.xlu1 %1962  ;;  %v2319_v5 = vpop.xlane.xlu0 %2318 }
0x1334   :  { %4182 = vpow2.f32 %v2322_v62  ;;  %v2321_v6 = vsub.f32 %v2313_v34, %v2319_v5  ;;  %3844 = vmatpush3.bf16.msra.mxu0 %v1963_v2 }
0x1335   :  { %v4177_v7 = vpop.eup %4176  ;;  %3855 = vmatprep.subr.bf16.mxu0 %v4436_v0 }
0x1336   :  { %v2324_v10 = vmul.f32 1.442695, %v2321_v6  ;;  %v2079_v11 = vsel %vm336_vm3, %v4177_v7, 0.0 }
0x1337   :  { %2080 = vadd.xlane.f32.xlu0 %v2079_v11 }
0x1338   :  { %4184 = vpow2.f32 %v2324_v10  ;;  %v4082_v10 = vld [vmem:[%s5237_s6 + $0x28] sm:$0xff]  }
0x1339   :  { %v4179_v17 = vpop.eup %4178  ;;  %3886 = vmatpush3.bf16.msra.mxu1 %v4082_v10 }
0x133a   :  { %v2201_v18 = vsel %vm336_vm3, %v4179_v17, 0.0  ;;  %3887 = vmatprep.subr.bf16.mxu1 %v4436_v0 }
0x133b   :  { %2202 = vadd.xlane.f32.xlu1 %v2201_v18 }
0x133d   :  { %v4181_v19 = vpop.eup %4180 }
0x133e   :  { %v2204_v20 = vsel %vm336_vm3, %v4181_v19, 0.0 }
0x133f   :  { %2205 = vadd.xlane.f32.xlu0 %v2204_v20 }
0x1341   :  { %v4183_v21 = vpop.eup %4182 }
0x1342   :  { %v2326_v22 = vsel %vm336_vm3, %v4183_v21, 0.0 }
0x1343   :  { %2327 = vadd.xlane.f32.xlu1 %v2326_v22 }
0x1345   :  { %v4185_v25 = vpop.eup %4184 }
0x1346   :  { %v2329_v26 = vsel %vm336_vm3, %v4185_v25, 0.0 }
0x1347   :  { %2330 = vadd.xlane.f32.xlu0 %v2329_v26 }
0x1354   :  { %2212 = vrot.lane.b32.xlu1 %v4941_v27, %s4446_s29 }
0x1358   :  { %2337 = vrot.lane.b32.xlu1 %v4941_v27, %s4447_s0 }
0x135d   :  { %2087 = vrot.lane.b32.xlu0 %v4941_v27, %s4445_s26 }
0x13b4   :  { %v1953_v16 = vpop.xlane.xlu1 %1952 }
0x13b5   :  { %4186 = vrcp.f32 %v1953_v16 }
0x13b8   :  { %v1956_v30 = vpop.xlane.xlu0 %1955 }
0x13b9   :  { %4188 = vrcp.f32 %v1956_v30 }
0x13bc   :  { %v2078_v49 = vpop.xlane.xlu1 %2077 }
0x13c0   :  { %v2081_v44 = vpop.xlane.xlu0 %2080 }
0x13c1   :  { %4190 = vrcp.f32 %v2081_v44 }
0x13c2   :  { %v4187_v34 = vpop.eup %4186  ;;  %4192 = vrcp.f32 %v2078_v49 }
0x13c3   :  { %v1959_v37 = vmul.f32 %v4187_v34, %v4171_v4 }
0x13c4   :  { %v2203_v40 = vpop.xlane.xlu1 %2202 }
0x13c6   :  { %v4189_v35 = vpop.eup %4188 }
0x13c7   :  { %v1960_v36 = vmul.f32 %v4189_v35, %v4173_v53 }
0x13c8   :  { %v2206_v39 = vpop.xlane.xlu0 %2205 }
0x13c9   :  { %v1961_v41 = vpack.c.bf16 %v1960_v36, %v1959_v37  ;;  %4194 = vrcp.f32 %v2206_v39 }
0x13ca   :  { %4196 = vrcp.f32 %v2203_v40 }
0x13cb   :  { %3846 = vmatmul.mubr.msk.bf16.vlgmr.msra.gmra.mxu0 %vm336_vm3, %v1961_v41 }
0x13cc   :  { %3857 = vmatprep.mubr.msk.bf16.mxu0 %vm4437_vm0, %v4436_v0  ;;  %v2328_v3 = vpop.xlane.xlu1 %2327 }
0x13ce   :  { %v4191_v27 = vpop.eup %4190 }
0x13cf   :  { %v4193_v42 = vpop.eup %4192  ;;  %v2085_v45 = vmul.f32 %v4191_v27, %v4177_v7 }
0x13d0   :  { %v2331_v43 = vpop.xlane.xlu0 %2330  ;;  %v2084_v48 = vmul.f32 %v4193_v42, %v4175_v59  ;;  %v2213_v9 = vpop.permute.xlu1 %2212 }
0x13d1   :  { %4198 = vrcp.f32 %v2331_v43 }
0x13d2   :  { %4200 = vrcp.f32 %v2328_v3  ;;  %v2086_v29 = vpack.c.bf16 %v2085_v45, %v2084_v48 }
0x13d4   :  { %v2088_v46 = vpop.permute.xlu0 %2087  ;;  %v2338_v53 = vpop.permute.xlu1 %2337 }
0x13d5   :  { %3856 = vmatpush3.bf16.msra.mxu0 %v2088_v46 }
0x13d6   :  { %3867 = vmatprep.subr.bf16.mxu0 %v4436_v0  ;;  %v4195_v47 = vpop.eup %4194 }
0x13d7   :  { %v4197_v4 = vpop.eup %4196  ;;  %v2210_v51 = vmul.f32 %v4195_v47, %v4181_v19 }
0x13d8   :  { %3858 = vmatmul.mubr.msk.bf16.vlgmr.msra.gmra.mxu0 %vm336_vm3, %v2086_v29  ;;  %v2209_v8 = vmul.f32 %v4197_v4, %v4179_v17 }
0x13d9   :  { %3868 = vmatpush3.bf16.msra.mxu0 %v2213_v9  ;;  %3869 = vmatprep.mubr.msk.bf16.mxu0 %vm4437_vm0, %v4436_v0  ;;  %v2418_v9 = vrot.slane %v4924_v61, %v4908_v32 }
0x13da   :  { %3879 = vmatprep.subr.bf16.mxu0 %v4436_v0  ;;  %v2211_v52 = vpack.c.bf16 %v2210_v51, %v2209_v8 }
0x13de   :  { %v4199_v50 = vpop.eup %4198 }
0x13df   :  { %v4201_v55 = vpop.eup %4200  ;;  %v2335_v54 = vmul.f32 %v4199_v50, %v4185_v25 }
0x13e0   :  { %3870 = vmatmul.mubr.msk.bf16.vlgmr.msra.gmra.mxu0 %vm336_vm3, %v2211_v52  ;;  %v2334_v57 = vmul.f32 %v4201_v55, %v4183_v21  ;;  %v4083_v21 = vld [vmem:[%s5237_s6 + $0x20] sm:$0xff]  }
0x13e1   :  { %3880 = vmatpush3.bf16.msra.mxu0 %v2338_v53  ;;  %3881 = vmatprep.mubr.msk.bf16.mxu0 %vm4437_vm0, %v4436_v0 }
0x13e2   :  { %3893 = vmatprep.subr.bf16.mxu0 %v4436_v0  ;;  %v2336_v58 = vpack.c.bf16 %v2335_v54, %v2334_v57  ;;  %3888 = vmatpush3.bf16.msra.mxu1 %v4083_v21 }
0x13e3   :  { %3901 = vmatprep.subr.bf16.mxu1 %v4436_v0 }
0x13e8   :  { %3882 = vmatmul.mubr.msk.bf16.vlgmr.msra.gmra.mxu0 %vm336_vm3, %v2336_v58 }
0x13e9   :  { %3897 = vmatprep.mubr.msk.bf16.mxu0 %vm4437_vm0, %v4436_v0 }
0x148b   :  { %v2002_v59 = vpop.f32.mrf.mxu0 }
0x148d   :  { %v3847_v62 = vpop.f32.mrf.mxu0 }
0x148f   :  { %v2005_v1 = vpop.f32.mrf.mxu0 }
0x1491   :  { %v3848_v2 = vpop.f32.mrf.mxu0 }
0x1498   :  { %v2127_v5 = vpop.f32.mrf.mxu0 }
0x149a   :  { %v3859_v6 = vpop.f32.mrf.mxu0 }
0x149c   :  { %v2130_v7 = vpop.f32.mrf.mxu0 }
0x149d   :  { %v4034_v11 = vpack.i.bf16 %v2130_v7, %v2127_v5 }
0x149e   :  { %v3860_v17 = vpop.f32.mrf.mxu0 }
0x149f   :  { %4035 = vrot.lane.b32.xlu0 %v4034_v11, %s4428_s23  ;;  %v4085_v17 = vld [vmem:[#allocation8 + $0x10] sm:$0xff]  }
0x14a0   :  { %v2252_v18 = vpop.f32.mrf.mxu0 }
0x14a2   :  { %v3871_v19 = vpop.f32.mrf.mxu0 }
0x14a4   :  { %v2255_v20 = vpop.f32.mrf.mxu0 }
0x14a5   :  { %v4039_v22 = vpack.i.bf16 %v2255_v20, %v2252_v18 }
0x14a6   :  { %v3872_v25 = vpop.f32.mrf.mxu0 }
0x14a7   :  { %4040 = vrot.lane.b32.xlu1 %v4039_v22, %s4448_s1 }
0x14a8   :  { %v2377_v26 = vpop.f32.mrf.mxu0 }
0x14aa   :  { %v3883_v16 = vpop.f32.mrf.mxu0 }
0x14ac   :  { %v2380_v30 = vpop.f32.mrf.mxu0 }
0x14ad   :  { %v4044_v44 = vpack.i.bf16 %v2380_v30, %v2377_v26 }
0x14ae   :  { %v3884_v49 = vpop.f32.mrf.mxu0 }
0x14af   :  { %4045 = vrot.lane.b32.xlu0 %v4044_v44, %s4449_s2  ;;  %v2506_v49 = vrot.slane %v4924_v61, %v1614_v56 }
0x1511   :  { %v4036_v34 = vpop.permute.xlu0 %4035 }
0x1512   :  { %v4038_v37 = vunpack.i.h.bf16 %v4036_v34  ;;  %v4037_v36 = vunpack.i.l.bf16 %v4036_v34 }
0x1514   :  { %v2409_v27 = vsel %vm284_vm2, %v2005_v1, %v4038_v37  ;;  %v2408_v43 = vsel %vm284_vm2, %v2002_v59, %v4037_v36  ;;  %v2512_v36 = vrot.slane %v4924_v61, %v1620_v60 }
0x1519   :  { %v4041_v35 = vpop.permute.xlu1 %4040 }
0x151a   :  { %v4043_v39 = vunpack.i.h.bf16 %v4041_v35  ;;  %v4042_v40 = vunpack.i.l.bf16 %v4041_v35 }
0x151c   :  { %v2411_v45 = vsel %vm336_vm3, %v2409_v27, %v4043_v39  ;;  %v2410_v46 = vsel %vm336_vm3, %v2408_v43, %v4042_v40  ;;  %v2524_v43 = vrot.slane %v4924_v61, %v4858_v24 }
0x1521   :  { %v4046_v41 = vpop.permute.xlu0 %4045 }
0x1522   :  { %v4048_v42 = vunpack.i.h.bf16 %v4046_v41  ;;  %v4047_v3 = vunpack.i.l.bf16 %v4046_v41 }
0x1524   :  { %v2413_v48 = vsel %vm810_vm4, %v2411_v45, %v4048_v42  ;;  %v2412_v29 = vsel %vm810_vm4, %v2410_v46, %v4047_v3 }
0x1525   :  { %v2414_v47 = vpack.c.bf16 %v2413_v48, %v2412_v29 }
0x1527   :  { %3890 = vmatmul.mubr.msk.bf16.vlgmr.msra.gmra.mxu1 %vm166_vm1, %v2414_v47 }
0x1528   :  { %3903 = vmatprep.mubr.msk.bf16.mxu1 %vm4437_vm0, %v4436_v0 }
0x15e7   :  { %v2468_v4 = vpop.f32.mrf.mxu1 }
0x15e8   :  { %v2469_v51 = vadd.f32 %v2468_v4, %v2418_v9 }
0x15e9   :  { %v3891_v8 = vpop.f32.mrf.mxu1 }
0x15ea   :  { %v2475_v52 = vadd.f32 %v2469_v51, %v4930_v14 }
0x15eb   :  { %v2471_v50 = vpop.f32.mrf.mxu1 }
0x15ec   :  { %v2472_v53 = vadd.f32 %v2471_v50, %v2418_v9  ;;  %v2477_v55 = vsel %vm166_vm1, %v2475_v52, 0.0 }
0x15ed   :  { %2478 = vadd.xlane.f32.xlu1 %v2477_v55  ;;  %v3892_v54 = vpop.f32.mrf.mxu1 }
0x15ee   :  { %v2476_v57 = vadd.f32 %v2472_v53, %v4932_v15  ;;  %v4084_v15 = vld [vmem:[#allocation8 + $0x18] sm:$0xff]  }
0x15ef   :  { %3894 = vmatpush3.bf16.msra.mxu0 %v4084_v15 }
0x15f0   :  { %v2480_v58 = vsel %vm166_vm1, %v2476_v57, 0.0  ;;  %3895 = vmatprep.subr.bf16.mxu0 %v4436_v0 }
0x15f1   :  { %2481 = vadd.xlane.f32.xlu0 %v2480_v58 }
0x15f3   :  { %3896 = vmatpush3.bf16.msra.mxu0 %v4085_v17 }
0x15f4   :  { %3907 = vmatprep.subr.bf16.mxu0 %v4436_v0 }
0x1676   :  { %v2479_v59 = vpop.xlane.xlu1 %2478 }
0x1677   :  { %v2483_v62 = vmul.f32 0.03125, %v2479_v59 }
0x1679   :  { %v2485_v1 = vsub.f32 %v2475_v52, %v2483_v62 }
0x167a   :  { %v2482_v2 = vpop.xlane.xlu0 %2481 }
0x167b   :  { %v2484_v5 = vmul.f32 0.03125, %v2482_v2  ;;  %v2487_v6 = vmul.f32 %v2485_v1, %v2485_v1 }
0x167d   :  { %v2486_v7 = vsub.f32 %v2476_v57, %v2484_v5  ;;  %v2489_v14 = vsel %vm166_vm1, %v2487_v6, 0.0 }
0x167e   :  { %2490 = vadd.xlane.f32.xlu0 %v2489_v14 }
0x167f   :  { %v2488_v10 = vmul.f32 %v2486_v7, %v2486_v7 }
0x1681   :  { %v2492_v11 = vsel %vm166_vm1, %v2488_v10, 0.0 }
0x1682   :  { %2493 = vadd.xlane.f32.xlu1 %v2492_v11 }
0x1693   :  { %2713 = vrot.lane.b32.xlu1 %v4611_v31, %s4445_s26 }
0x1694   :  { %2587 = vrot.lane.b32.xlu0 %v4611_v31, %s4429_s27  ;;  %s4450_s27 = smov 32  }
0x1698   :  { %2838 = vrot.lane.b32.xlu0 %v4611_v31, %s4446_s29 }
0x169c   :  { %2963 = vrot.lane.b32.xlu0 %v4611_v31, %s4447_s0 }
0x1707   :  { %v2491_v18 = vpop.xlane.xlu0 %2490 }
0x1708   :  { %v2495_v19 = vmul.f32 0.03125, %v2491_v18 }
0x170a   :  { %v2497_v20 = vadd.f32 1e-05, %v2495_v19 }
0x170b   :  { %v2494_v21 = vpop.xlane.xlu1 %2493  ;;  %v2588_v22 = vpop.permute.xlu0 %2587 }
0x170c   :  { %4202 = vrsqrt.f32 %v2497_v20  ;;  %v2496_v25 = vmul.f32 0.03125, %v2494_v21  ;;  %v2593_v26 = vsel %vm284_vm2, %v2588_v22, 0 }
0x170d   :  { %3902 = vmatpush3.bf16.xpose.msra.mxu1 %v2593_v26 }
0x170e   :  { %v2498_v16 = vadd.f32 1e-05, %v2496_v25  ;;  %3913 = vmatprep.subr.bf16.mxu1 %v4436_v0 }
0x170f   :  { %v2714_v45 = vpop.permute.xlu1 %2713  ;;  %v2839_v61 = vpop.permute.xlu0 %2838 }
0x1710   :  { %4204 = vrsqrt.f32 %v2498_v16  ;;  %v2719_v29 = vsel %vm284_vm2, %v2714_v45, 0  ;;  %v2844_v9 = vsel %vm284_vm2, %v2839_v61, 0 }
0x1713   :  { %v2964_v4 = vpop.permute.xlu0 %2963 }
0x1714   :  { %v2969_v8 = vsel %vm284_vm2, %v2964_v4, 0 }
0x1719   :  { %v4203_v30 = vpop.eup %4202 }
0x171a   :  { %v2501_v44 = vmul.f32 %v4203_v30, %v2485_v1 }
0x171c   :  { %v2507_v37 = vmul.f32 %v2506_v49, %v2501_v44 }
0x171d   :  { %v4205_v34 = vpop.eup %4204 }
0x171e   :  { %v2502_v35 = vmul.f32 %v4205_v34, %v2486_v7  ;;  %v5064_v40 = vadd.f32 %v2512_v36, %v2507_v37 }
0x1720   :  { %v2508_v39 = vmul.f32 %v2506_v49, %v2502_v35 }
0x1722   :  { %v5066_v41 = vadd.f32 %v2512_v36, %v2508_v39 }
0x1724   :  { %v2515_v27 = vpack.c.bf16 %v5066_v41, %v5064_v40 }
0x1726   :  { %3898 = vmatmul.mubr.msk.bf16.vlgmr.msra.gmra.mxu0 %vm166_vm1, %v2515_v27 }
0x1727   :  { %3909 = vmatprep.mubr.msk.bf16.mxu0 %vm4437_vm0, %v4436_v0 }
0x17e6   :  { %v2574_v56 = vpop.f32.mrf.mxu0 }
0x17e7   :  { %v2575_v60 = vadd.f32 %v2574_v56, %v2524_v43 }
0x17e8   :  { %v3899_v12 = vpop.f32.mrf.mxu0 }
0x17ea   :  { %v2577_v42 = vpop.f32.mrf.mxu0 }
0x17eb   :  { %v2578_v3 = vadd.f32 %v2577_v42, %v2524_v43 }
0x17ec   :  { %v3900_v46 = vpop.f32.mrf.mxu0 }
0x17ed   :  { %v2586_v48 = vpack.c.bf16 %v2578_v3, %v2575_v60 }
0x17ef   :  { %2711 = vrot.lane.b32.xlu1 %v2586_v48, %s4438_s18  ;;  %3904 = vmatmul.mubr.msk.bf16.vlgmr.msra.gmra.mxu1 %vm284_vm2, %v2586_v48 }
0x17f0   :  { %3914 = vmatpush3.bf16.xpose.msra.mxu1 %v2719_v29  ;;  %3915 = vmatprep.mubr.msk.bf16.mxu1 %vm4437_vm0, %v4436_v0 }
0x17f1   :  { %3925 = vmatprep.subr.bf16.mxu1 %v4436_v0 }
0x17f3   :  { %2836 = vrot.lane.b32.xlu1 %v2586_v48, %s4443_s25 }
0x17f7   :  { %2961 = vrot.lane.b32.xlu1 %v2586_v48, %s4444_s7 }
0x1861   :  { %v2712_v47 = vpop.permute.xlu1 %2711 }
0x1862   :  { %3916 = vmatmul.mubr.msk.bf16.vlgmr.msra.gmra.mxu1 %vm284_vm2, %v2712_v47 }
0x1863   :  { %3926 = vmatpush3.bf16.xpose.msra.mxu1 %v2844_v9  ;;  %3927 = vmatprep.mubr.msk.bf16.mxu1 %vm4437_vm0, %v4436_v0 }
0x1864   :  { %3937 = vmatprep.subr.bf16.mxu1 %v4436_v0 }
0x1865   :  { %v2837_v51 = vpop.permute.xlu1 %2836 }
0x1869   :  { %v2962_v52 = vpop.permute.xlu1 %2961 }
0x186a   :  { %3928 = vmatmul.mubr.msk.bf16.vlgmr.msra.gmra.mxu1 %vm284_vm2, %v2837_v51 }
0x186b   :  { %3938 = vmatpush3.bf16.xpose.msra.mxu1 %v2969_v8  ;;  %3939 = vmatprep.mubr.msk.bf16.mxu1 %vm4437_vm0, %v4436_v0 }
0x186c   :  { %3949 = vmatprep.subr.bf16.mxu1 %v4436_v0 }
0x1872   :  { %3940 = vmatmul.mubr.msk.bf16.vlgmr.msra.gmra.mxu1 %vm284_vm2, %v2962_v52 }
0x1873   :  { %3953 = vmatprep.mubr.msk.bf16.mxu1 %vm4437_vm0, %v4436_v0 }
0x18af   :  { %v2629_v50 = vpop.f32.mrf.mxu1 }
0x18b0   :  { %v2636_v53 = vmul.f32 0.35355338, %v2629_v50 }
0x18b1   :  { %v3905_v55 = vpop.f32.mrf.mxu1 }
0x18b2   :  { %v2638_v54 = vadd.f32 %v2636_v53, %v4781_v33 }
0x18b3   :  { %v2632_v57 = vpop.f32.mrf.mxu1 }
0x18b4   :  { %v2637_v58 = vmul.f32 0.35355338, %v2632_v57  ;;  %v2640_v59 = vsel %vm336_vm3, %v2638_v54, -inf }
0x18b5   :  { %2641 = vmax.xlane.f32.xlu0 %v2640_v59  ;;  %v3906_v62 = vpop.f32.mrf.mxu1 }
0x18b6   :  { %v2639_v1 = vadd.f32 %v2637_v58, %v4784_v38 }
0x18b8   :  { %v2643_v2 = vsel %vm336_vm3, %v2639_v1, -inf }
0x18b9   :  { %2644 = vmax.xlane.f32.xlu1 %v2643_v2 }
0x1922   :  { %v2755_v5 = vpop.f32.mrf.mxu1 }
0x1923   :  { %v2762_v6 = vmul.f32 0.35355338, %v2755_v5 }
0x1924   :  { %v3917_v7 = vpop.f32.mrf.mxu1 }
0x1925   :  { %v2764_v14 = vadd.f32 %v2762_v6, %v4781_v33 }
0x1926   :  { %v2758_v10 = vpop.f32.mrf.mxu1 }
0x1927   :  { %v2763_v11 = vmul.f32 0.35355338, %v2758_v10  ;;  %v2766_v15 = vsel %vm336_vm3, %v2764_v14, -inf }
0x1928   :  { %2767 = vmax.xlane.f32.xlu0 %v2766_v15  ;;  %v3918_v17 = vpop.f32.mrf.mxu1 }
0x1929   :  { %v2765_v18 = vadd.f32 %v2763_v11, %v4784_v38 }
0x192a   :  { %v2880_v19 = vpop.f32.mrf.mxu1 }
0x192b   :  { %v2887_v20 = vmul.f32 0.35355338, %v2880_v19  ;;  %v2769_v21 = vsel %vm336_vm3, %v2765_v18, -inf }
0x192c   :  { %2770 = vmax.xlane.f32.xlu0 %v2769_v21  ;;  %v3929_v22 = vpop.f32.mrf.mxu1 }
0x192d   :  { %v2889_v25 = vadd.f32 %v2887_v20, %v4781_v33 }
0x192e   :  { %v2883_v26 = vpop.f32.mrf.mxu1 }
0x192f   :  { %v2888_v16 = vmul.f32 0.35355338, %v2883_v26  ;;  %v2891_v30 = vsel %vm336_vm3, %v2889_v25, -inf }
0x1930   :  { %2892 = vmax.xlane.f32.xlu1 %v2891_v30  ;;  %v3930_v44 = vpop.f32.mrf.mxu1 }
0x1931   :  { %v2890_v49 = vadd.f32 %v2888_v16, %v4784_v38 }
0x1932   :  { %v3005_v34 = vpop.f32.mrf.mxu1 }
0x1933   :  { %v3012_v35 = vmul.f32 0.35355338, %v3005_v34  ;;  %v2894_v37 = vsel %vm336_vm3, %v2890_v49, -inf }
0x1934   :  { %2895 = vmax.xlane.f32.xlu0 %v2894_v37  ;;  %v3941_v36 = vpop.f32.mrf.mxu1 }
0x1935   :  { %v3014_v39 = vadd.f32 %v3012_v35, %v4781_v33 }
0x1936   :  { %v3008_v27 = vpop.f32.mrf.mxu1 }
0x1937   :  { %v3013_v56 = vmul.f32 0.35355338, %v3008_v27  ;;  %v3016_v43 = vsel %vm336_vm3, %v3014_v39, -inf }
0x1938   :  { %3017 = vmax.xlane.f32.xlu1 %v3016_v43  ;;  %v3942_v12 = vpop.f32.mrf.mxu1 }
0x1939   :  { %v3015_v42 = vadd.f32 %v3013_v56, %v4784_v38 }
0x193b   :  { %v3019_v60 = vsel %vm336_vm3, %v3015_v42, -inf }
0x193c   :  { %3020 = vmax.xlane.f32.xlu0 %v3019_v60 }
0x193e   :  { %v2642_v48 = vpop.xlane.xlu0 %2641 }
0x193f   :  { %v2646_v29 = vsub.f32 %v2638_v54, %v2642_v48 }
0x1941   :  { %v2648_v47 = vmul.f32 1.442695, %v2646_v29 }
0x1942   :  { %v2645_v3 = vpop.xlane.xlu1 %2644 }
0x1943   :  { %v2647_v45 = vsub.f32 %v2639_v1, %v2645_v3 }
0x1945   :  { %v2650_v46 = vmul.f32 1.442695, %v2647_v45 }
0x1947   :  { %4206 = vpow2.f32 %v2650_v46 }
0x1948   :  { %4208 = vpow2.f32 %v2648_v47 }
0x1949   :  { %2663 = vrot.lane.b32.xlu1 %v4611_v31, %s4450_s27 }
0x1954   :  { %v5113_v33 = vpop.eup %4206 }
0x1955   :  { %v2655_v61 = vsel %vm336_vm3, %v5113_v33, 0.0  ;;  %v4209_v38 = vpop.eup %4208 }
0x1956   :  { %2656 = vadd.xlane.f32.xlu0 %v2655_v61  ;;  %v2652_v9 = vsel %vm336_vm3, %v4209_v38, 0.0 }
0x196d   :  { %2653 = vadd.xlane.f32.xlu1 %v2652_v9 }
0x19b1   :  { %v2768_v4 = vpop.xlane.xlu0 %2767 }
0x19b2   :  { %v2772_v51 = vsub.f32 %v2764_v14, %v2768_v4 }
0x19b4   :  { %v2774_v8 = vmul.f32 1.442695, %v2772_v51 }
0x19b5   :  { %v2771_v52 = vpop.xlane.xlu0 %2770 }
0x19b6   :  { %4210 = vpow2.f32 %v2774_v8  ;;  %v2773_v50 = vsub.f32 %v2765_v18, %v2771_v52 }
0x19b8   :  { %v2776_v53 = vmul.f32 1.442695, %v2773_v50 }
0x19b9   :  { %v2893_v55 = vpop.xlane.xlu1 %2892 }
0x19ba   :  { %4212 = vpow2.f32 %v2776_v53  ;;  %v2897_v54 = vsub.f32 %v2889_v25, %v2893_v55 }
0x19bc   :  { %v2899_v57 = vmul.f32 1.442695, %v2897_v54 }
0x19bd   :  { %v2896_v58 = vpop.xlane.xlu0 %2895 }
0x19be   :  { %4214 = vpow2.f32 %v2899_v57  ;;  %v2898_v59 = vsub.f32 %v2890_v49, %v2896_v58 }
0x19c0   :  { %v2901_v62 = vmul.f32 1.442695, %v2898_v59 }
0x19c1   :  { %v3018_v1 = vpop.xlane.xlu1 %3017 }
0x19c2   :  { %4216 = vpow2.f32 %v2901_v62  ;;  %v3022_v2 = vsub.f32 %v3014_v39, %v3018_v1 }
0x19c3   :  { %v4211_v5 = vpop.eup %4210 }
0x19c4   :  { %v3024_v6 = vmul.f32 1.442695, %v3022_v2  ;;  %v2778_v7 = vsel %vm336_vm3, %v4211_v5, 0.0 }
0x19c5   :  { %2779 = vadd.xlane.f32.xlu1 %v2778_v7  ;;  %v2664_v14 = vpop.permute.xlu1 %2663  ;;  %v3021_v10 = vpop.xlane.xlu0 %3020 }
0x19c6   :  { %4218 = vpow2.f32 %v3024_v6  ;;  %v3023_v11 = vsub.f32 %v3015_v42, %v3021_v10  ;;  %3908 = vmatpush3.bf16.msra.mxu0 %v2664_v14 }
0x19c7   :  { %v4213_v15 = vpop.eup %4212  ;;  %3919 = vmatprep.subr.bf16.mxu0 %v4436_v0 }
0x19c8   :  { %v3026_v17 = vmul.f32 1.442695, %v3023_v11  ;;  %v2781_v18 = vsel %vm336_vm3, %v4213_v15, 0.0 }
0x19c9   :  { %2782 = vadd.xlane.f32.xlu0 %v2781_v18 }
0x19ca   :  { %4220 = vpow2.f32 %v3026_v17 }
0x19cb   :  { %v4215_v19 = vpop.eup %4214 }
0x19cc   :  { %v2903_v20 = vsel %vm336_vm3, %v4215_v19, 0.0 }
0x19cd   :  { %2904 = vadd.xlane.f32.xlu1 %v2903_v20 }
0x19cf   :  { %v4217_v21 = vpop.eup %4216 }
0x19d0   :  { %v2906_v22 = vsel %vm336_vm3, %v4217_v21, 0.0 }
0x19d1   :  { %2907 = vadd.xlane.f32.xlu0 %v2906_v22 }
0x19d3   :  { %v4219_v25 = vpop.eup %4218 }
0x19d4   :  { %v3028_v26 = vsel %vm336_vm3, %v4219_v25, 0.0 }
0x19d5   :  { %3029 = vadd.xlane.f32.xlu1 %v3028_v26 }
0x19d7   :  { %v4221_v16 = vpop.eup %4220 }
0x19d8   :  { %v3031_v30 = vsel %vm336_vm3, %v4221_v16, 0.0 }
0x19d9   :  { %3032 = vadd.xlane.f32.xlu0 %v3031_v30 }
0x19df   :  { %v2657_v44 = vpop.xlane.xlu0 %2656 }
0x19e0   :  { %4222 = vrcp.f32 %v2657_v44 }
0x19e6   :  { %2914 = vrot.lane.b32.xlu1 %v4611_v31, %s4448_s1 }
0x19ea   :  { %3039 = vrot.lane.b32.xlu1 %v4611_v31, %s4428_s23 }
0x19ed   :  { %v4223_v34 = vpop.eup %4222 }
0x19ee   :  { %v2661_v36 = vmul.f32 %v4223_v34, %v5113_v33 }
0x19ef   :  { %2789 = vrot.lane.b32.xlu0 %v4611_v31, %s4449_s2 }
0x19f6   :  { %v2654_v49 = vpop.xlane.xlu1 %2653 }
0x19f7   :  { %4224 = vrcp.f32 %v2654_v49 }
0x1a04   :  { %v4225_v35 = vpop.eup %4224 }
0x1a05   :  { %v2660_v37 = vmul.f32 %v4225_v35, %v4209_v38 }
0x1a07   :  { %v2662_v39 = vpack.c.bf16 %v2661_v36, %v2660_v37 }
0x1a09   :  { %3910 = vmatmul.mubr.msk.bf16.vlgmr.msra.gmra.mxu0 %vm336_vm3, %v2662_v39 }
0x1a0a   :  { %3921 = vmatprep.mubr.msk.bf16.mxu0 %vm4437_vm0, %v4436_v0 }
0x1a4e   :  { %v2780_v56 = vpop.xlane.xlu1 %2779 }
0x1a52   :  { %v2783_v27 = vpop.xlane.xlu0 %2782 }
0x1a53   :  { %4226 = vrcp.f32 %v2783_v27 }
0x1a54   :  { %4228 = vrcp.f32 %v2780_v56 }
0x1a56   :  { %v2905_v43 = vpop.xlane.xlu1 %2904 }
0x1a5a   :  { %v2908_v31 = vpop.xlane.xlu0 %2907 }
0x1a5b   :  { %4230 = vrcp.f32 %v2908_v31 }
0x1a5c   :  { %4232 = vrcp.f32 %v2905_v43 }
0x1a5e   :  { %v3030_v3 = vpop.xlane.xlu1 %3029 }
0x1a60   :  { %v4227_v12 = vpop.eup %4226 }
0x1a61   :  { %v4229_v60 = vpop.eup %4228  ;;  %v2787_v45 = vmul.f32 %v4227_v12, %v4213_v15  ;;  %v4087_v15 = vld [vmem:[%s5237_s6 + $0x30] sm:$0xff]  }
0x1a62   :  { %v3033_v42 = vpop.xlane.xlu0 %3032  ;;  %v2786_v48 = vmul.f32 %v4229_v60, %v4211_v5  ;;  %v2915_v61 = vpop.permute.xlu1 %2914  ;;  %v4086_v5 = vld [vmem:[%s5237_s6 + $0x38] sm:$0xff]   ;;  %v5167_v60 = vld [vmem:[#allocation13 + $0x8] sm:$0xff] }
0x1a63   :  { %4234 = vrcp.f32 %v3033_v42  ;;  %3950 = vmatpush3.bf16.msra.mxu1 %v4086_v5 }
0x1a64   :  { %4236 = vrcp.f32 %v3030_v3  ;;  %v2788_v33 = vpack.c.bf16 %v2787_v45, %v2786_v48  ;;  %3951 = vmatprep.subr.bf16.mxu1 %v4436_v0  ;;  %v3120_v3 = vrot.slane %v5167_v60, %v4608_v23 }
0x1a66   :  { %v2790_v46 = vpop.permute.xlu0 %2789  ;;  %v3040_v8 = vpop.permute.xlu1 %3039 }
0x1a67   :  { %3920 = vmatpush3.bf16.msra.mxu0 %v2790_v46  ;;  %3952 = vmatpush3.bf16.msra.mxu1 %v4087_v15 }
0x1a68   :  { %3931 = vmatprep.subr.bf16.mxu0 %v4436_v0  ;;  %v4231_v29 = vpop.eup %4230  ;;  %3965 = vmatprep.subr.bf16.mxu1 %v4436_v0 }
0x1a69   :  { %v4233_v47 = vpop.eup %4232  ;;  %v2912_v38 = vmul.f32 %v4231_v29, %v4217_v21 }
0x1a6a   :  { %3922 = vmatmul.mubr.msk.bf16.vlgmr.msra.gmra.mxu0 %vm336_vm3, %v2788_v33  ;;  %v2911_v9 = vmul.f32 %v4233_v47, %v4215_v19 }
0x1a6b   :  { %3932 = vmatpush3.bf16.msra.mxu0 %v2915_v61  ;;  %3933 = vmatprep.mubr.msk.bf16.mxu0 %vm4437_vm0, %v4436_v0 }
0x1a6c   :  { %3943 = vmatprep.subr.bf16.mxu0 %v4436_v0  ;;  %v2913_v4 = vpack.c.bf16 %v2912_v38, %v2911_v9 }
0x1a70   :  { %v4235_v51 = vpop.eup %4234 }
0x1a71   :  { %v4237_v52 = vpop.eup %4236  ;;  %v3037_v50 = vmul.f32 %v4235_v51, %v4221_v16 }
0x1a72   :  { %3934 = vmatmul.mubr.msk.bf16.vlgmr.msra.gmra.mxu0 %vm336_vm3, %v2913_v4  ;;  %v3036_v53 = vmul.f32 %v4237_v52, %v4219_v25 }
0x1a73   :  { %3944 = vmatpush3.bf16.msra.mxu0 %v3040_v8  ;;  %3945 = vmatprep.mubr.msk.bf16.mxu0 %vm4437_vm0, %v4436_v0 }
0x1a74   :  { %3957 = vmatprep.subr.bf16.mxu0 %v4436_v0  ;;  %v3038_v55 = vpack.c.bf16 %v3037_v50, %v3036_v53 }
0x1a7a   :  { %3946 = vmatmul.mubr.msk.bf16.vlgmr.msra.gmra.mxu0 %vm336_vm3, %v3038_v55 }
0x1a7b   :  { %3961 = vmatprep.mubr.msk.bf16.mxu0 %vm4437_vm0, %v4436_v0 }
0x1ac9   :  { %v2703_v54 = vpop.f32.mrf.mxu0 }
0x1acb   :  { %v3911_v57 = vpop.f32.mrf.mxu0 }
0x1acd   :  { %v2706_v58 = vpop.f32.mrf.mxu0 }
0x1acf   :  { %v3912_v59 = vpop.f32.mrf.mxu0 }
0x1ad0   :  { %v4088_v59 = vld [vmem:[#allocation11 + $0x18] sm:$0xff]  }
0x1ad1   :  { %3958 = vmatpush3.bf16.msra.mxu0 %v4088_v59 }
0x1ad2   :  { %3959 = vmatprep.subr.bf16.mxu0 %v4436_v0 }
0x1b2a   :  { %v2829_v62 = vpop.f32.mrf.mxu0 }
0x1b2c   :  { %v3923_v1 = vpop.f32.mrf.mxu0 }
0x1b2e   :  { %v2832_v2 = vpop.f32.mrf.mxu0 }
0x1b2f   :  { %v4049_v6 = vpack.i.bf16 %v2832_v2, %v2829_v62  ;;  %v4090_v62 = vld [vmem:[%s5239_s8 + $0x38] sm:$0xff]  }
0x1b30   :  { %v3924_v7 = vpop.f32.mrf.mxu0 }
0x1b31   :  { %4050 = vrot.lane.b32.xlu0 %v4049_v6, %s4428_s23 }
0x1b32   :  { %v2954_v14 = vpop.f32.mrf.mxu0 }
0x1b34   :  { %v3935_v10 = vpop.f32.mrf.mxu0 }
0x1b35   :  { %v5182_v10 = vld [vmem:[#allocation13 + $0x10] sm:$0x3f] }
0x1b36   :  { %v2957_v11 = vpop.f32.mrf.mxu0 }
0x1b37   :  { %v4054_v17 = vpack.i.bf16 %v2957_v11, %v2954_v14 }
0x1b38   :  { %v3936_v18 = vpop.f32.mrf.mxu0 }
0x1b39   :  { %4055 = vrot.lane.b32.xlu1 %v4054_v17, %s4448_s1  ;;  %v3208_v17 = vrot.slane %v5182_v10, %v4585_v13  ;;  %v4092_v13 = vld [vmem:[%s5239_s8 + $0x28] sm:$0xff]  }
0x1b3a   :  { %v3079_v19 = vpop.f32.mrf.mxu0 }
0x1b3c   :  { %v3947_v20 = vpop.f32.mrf.mxu0 }
0x1b3e   :  { %v3082_v21 = vpop.f32.mrf.mxu0 }
0x1b3f   :  { %v4059_v22 = vpack.i.bf16 %v3082_v21, %v3079_v19  ;;  %v3214_v21 = vrot.slane %v5182_v10, %v4718_v28  ;;  %v4093_v28 = vld [vmem:[%s5239_s8 + $0x20] sm:$0xff]  }
0x1b40   :  { %v3948_v25 = vpop.f32.mrf.mxu0 }
0x1b41   :  { %4060 = vrot.lane.b32.xlu0 %v4059_v22, %s4449_s2 }
0x1ba3   :  { %v4051_v26 = vpop.permute.xlu0 %4050 }
0x1ba4   :  { %v4053_v30 = vunpack.i.h.bf16 %v4051_v26  ;;  %v4052_v44 = vunpack.i.l.bf16 %v4051_v26 }
0x1ba6   :  { %v3111_v37 = vsel %vm284_vm2, %v2706_v58, %v4053_v30  ;;  %v3110_v36 = vsel %vm284_vm2, %v2703_v54, %v4052_v44  ;;  %v4091_v30 = vld [vmem:[%s5239_s8 + $0x30] sm:$0xff]   ;;  %v4254_v44 = vld [vmem:[%s5240_s9] sm:$0x1f]  ;;  %s4451_s8 = smov [#allocation14]  }
0x1ba7   :  { %s3452_s9 = sshll.u32 %s4451_s8, 4  ;;  %s3453_s9 = int_to_ptr.vmem [resolvable:$true] %s3452_s9 }
0x1ba8   :  { %s4395_s15 = scalar_lea.vmem %s3453_s9, 256  ;;  %p4400_p8 = scmp.lt.s32.totalorder %s3453_s9, %s3453_s9 }
0x1ba9   :  { %p4396_p7 = scmp.ne.s32.totalorder %s3453_s9, %s4395_s15  ;;  %p4401_p9 = scmp.lt.s32.totalorder %s4395_s15, %s4395_s15 }
0x1bab   :  { %v4056_v16 = vpop.permute.xlu1 %4055  ;;  %p4402_p10 = por %p4401_p9, %p4400_p8 }
0x1bac   :  { %v4058_v49 = vunpack.i.h.bf16 %v4056_v16  ;;  %v4057_v34 = vunpack.i.l.bf16 %v4056_v16 }
0x1bad   :  { %p4403_p11 = pnand %p4402_p10, %p4396_p7 }
0x1bae   :  { %v3113_v56 = vsel %vm336_vm3, %v3111_v37, %v4058_v49  ;;  %v3112_v31 = vsel %vm336_vm3, %v3110_v36, %v4057_v34  ;;  %v3226_v49 = vrot.slane %v4254_v44, %v4908_v32 }
0x1bb3   :  { %v4061_v35 = vpop.permute.xlu0 %4060 }
0x1bb4   :  { %v4063_v39 = vunpack.i.h.bf16 %v4061_v35  ;;  %v4062_v27 = vunpack.i.l.bf16 %v4061_v35 }
0x1bb6   :  { %v3115_v43 = vsel %vm810_vm4, %v3113_v56, %v4063_v39  ;;  %v3114_v12 = vsel %vm810_vm4, %v3112_v31, %v4062_v27 }
0x1bb7   :  { %v3116_v42 = vpack.c.bf16 %v3115_v43, %v3114_v12  ;;  %v3298_v43 = vrot.slane %v5167_v60, %v4739_v63 }
0x1bb9   :  { %3954 = vmatmul.mubr.msk.bf16.vlgmr.msra.gmra.mxu1 %vm166_vm1, %v3116_v42 }
0x1bba   :  { %3973 = vmatprep.mubr.msk.bf16.mxu1 %vm4437_vm0, %v4436_v0  ;;  %3966 = vmatpush3.bf16.msra.mxu1 %v4090_v62  ;;  %v3398_v62 = vrot.slane %v5182_v10, %v4858_v24 }
0x1bbb   :  { %3967 = vmatprep.subr.bf16.mxu1 %v4436_v0 }
0x1bbe   :  { %3968 = vmatpush3.bf16.msra.mxu1 %v4091_v30 }
0x1bbf   :  { %3969 = vmatprep.subr.bf16.mxu1 %v4436_v0 }
0x1bc2   :  { %3970 = vmatpush3.bf16.msra.mxu1 %v4092_v13 }
0x1bc3   :  { %3971 = vmatprep.subr.bf16.mxu1 %v4436_v0 }
0x1bc6   :  { %3972 = vmatpush3.bf16.msra.mxu1 %v4093_v28 }
0x1c79   :  { %v3170_v45 = vpop.f32.mrf.mxu1 }
0x1c7a   :  { %v3171_v46 = vadd.f32 %v3170_v45, %v3120_v3 }
0x1c7b   :  { %v3955_v48 = vpop.f32.mrf.mxu1 }
0x1c7c   :  { %v3177_v33 = vadd.f32 %v3171_v46, %v5064_v40 }
0x1c7d   :  { %v3173_v29 = vpop.f32.mrf.mxu1 }
0x1c7e   :  { %v3174_v61 = vadd.f32 %v3173_v29, %v3120_v3  ;;  %v3179_v47 = vsel %vm166_vm1, %v3177_v33, 0.0 }
0x1c7f   :  { %3180 = vadd.xlane.f32.xlu1 %v3179_v47  ;;  %v3956_v38 = vpop.f32.mrf.mxu1 }
0x1c80   :  { %v3178_v9 = vadd.f32 %v3174_v61, %v5066_v41  ;;  %v4089_v41 = vld [vmem:[#allocation11 + $0x10] sm:$0xff]  }
0x1c81   :  { %3960 = vmatpush3.bf16.msra.mxu0 %v4089_v41 }
0x1c82   :  { %v3182_v4 = vsel %vm166_vm1, %v3178_v9, 0.0 }
0x1c83   :  { %3183 = vadd.xlane.f32.xlu0 %v3182_v4 }
0x1d08   :  { %v3181_v51 = vpop.xlane.xlu1 %3180 }
0x1d09   :  { %v3185_v8 = vmul.f32 0.03125, %v3181_v51 }
0x1d0b   :  { %v3187_v52 = vsub.f32 %v3177_v33, %v3185_v8 }
0x1d0c   :  { %v3184_v50 = vpop.xlane.xlu0 %3183 }
0x1d0d   :  { %v3186_v53 = vmul.f32 0.03125, %v3184_v50  ;;  %v3189_v55 = vmul.f32 %v3187_v52, %v3187_v52 }
0x1d0f   :  { %v3188_v54 = vsub.f32 %v3178_v9, %v3186_v53  ;;  %v3191_v40 = vsel %vm166_vm1, %v3189_v55, 0.0 }
0x1d10   :  { %3192 = vadd.xlane.f32.xlu0 %v3191_v40 }
0x1d11   :  { %v3190_v57 = vmul.f32 %v3188_v54, %v3188_v54 }
0x1d13   :  { %v3194_v58 = vsel %vm166_vm1, %v3190_v57, 0.0 }
0x1d14   :  { %3195 = vadd.xlane.f32.xlu1 %v3194_v58 }
0x1d99   :  { %v3193_v1 = vpop.xlane.xlu0 %3192 }
0x1d9a   :  { %v3197_v2 = vmul.f32 0.03125, %v3193_v1 }
0x1d9c   :  { %v3199_v5 = vadd.f32 1e-05, %v3197_v2 }
0x1d9d   :  { %v3196_v6 = vpop.xlane.xlu1 %3195 }
0x1d9e   :  { %4238 = vrsqrt.f32 %v3199_v5  ;;  %v3198_v7 = vmul.f32 0.03125, %v3196_v6  ;;  %v3404_v5 = vrot.slane %v5182_v10, %v4908_v32 }
0x1da0   :  { %v3200_v14 = vadd.f32 1e-05, %v3198_v7 }
0x1da2   :  { %4240 = vrsqrt.f32 %v3200_v14 }
0x1dab   :  { %v4239_v11 = vpop.eup %4238 }
0x1dac   :  { %v3203_v15 = vmul.f32 %v4239_v11, %v3187_v52 }
0x1dae   :  { %v3209_v20 = vmul.f32 %v3208_v17, %v3203_v15 }
0x1daf   :  { %v4241_v18 = vpop.eup %4240 }
0x1db0   :  { %v3204_v19 = vmul.f32 %v4241_v18, %v3188_v54  ;;  %v3215_v25 = vadd.f32 %v3214_v21, %v3209_v20 }
0x1db2   :  { %v3210_v22 = vmul.f32 %v3208_v17, %v3204_v19 }
0x1db4   :  { %v3216_v26 = vadd.f32 %v3214_v21, %v3210_v22 }
0x1db6   :  { %v3217_v16 = vpack.c.bf16 %v3216_v26, %v3215_v25 }
0x1db8   :  { %3962 = vmatmul.mubr.msk.bf16.vlgmr.msra.gmra.mxu0 %vm166_vm1, %v3217_v16 }
0x1e78   :  { %v3276_v34 = vpop.f32.mrf.mxu0 }
0x1e79   :  { %v3277_v37 = vadd.f32 %v3276_v34, %v3226_v49 }
0x1e7a   :  { %v3963_v35 = vpop.f32.mrf.mxu0 }
0x1e7b   :  { %v3283_v56 = vmax.f32 %v3277_v37, 0.0 }
0x1e7c   :  { %v3279_v36 = vpop.f32.mrf.mxu0 }
0x1e7d   :  { %v3280_v39 = vadd.f32 %v3279_v36, %v3226_v49  ;;  %v3436_v36 = vrot.slane %v5182_v10, %v4608_v23 }
0x1e7e   :  { %v3964_v27 = vpop.f32.mrf.mxu0 }
0x1e7f   :  { %v3284_v31 = vmax.f32 %v3280_v39, 0.0 }
0x1e81   :  { %v3285_v0 = vpack.c.bf16 %v3284_v31, %v3283_v56  ;;  %v3442_v56 = vrot.slane %v5182_v10, %v4739_v63 }
0x1e83   :  { %3974 = vmatmul.mubr.msk.bf16.vlgmr.msra.gmra.mxu1 %vm1728_vm5, %v3285_v0 }
0x1f43   :  { %v3360_v12 = vpop.f32.mrf.mxu1 }
0x1f44   :  { %v3361_v42 = vadd.f32 %v3360_v12, %v3298_v43 }
0x1f45   :  { %v3975_v3 = vpop.f32.mrf.mxu1 }
0x1f46   :  { %v3367_v45 = vadd.f32 %v3361_v42, %v3215_v25 }
0x1f47   :  { %v3363_v46 = vpop.f32.mrf.mxu1 }
0x1f48   :  { %v3364_v48 = vadd.f32 %v3363_v46, %v3298_v43  ;;  %v3369_v33 = vsel %vm166_vm1, %v3367_v45, 0.0 }
0x1f49   :  { %3370 = vadd.xlane.f32.xlu0 %v3369_v33  ;;  %v3976_v29 = vpop.f32.mrf.mxu1 }
0x1f4a   :  { %v3368_v61 = vadd.f32 %v3364_v48, %v3216_v26 }
0x1f4c   :  { %v3372_v47 = vsel %vm166_vm1, %v3368_v61, 0.0 }
0x1f4d   :  { %3373 = vadd.xlane.f32.xlu1 %v3372_v47 }
0x1fd2   :  { %v3371_v38 = vpop.xlane.xlu0 %3370 }
0x1fd3   :  { %v3375_v9 = vmul.f32 0.03125, %v3371_v38 }
0x1fd5   :  { %v3377_v4 = vsub.f32 %v3367_v45, %v3375_v9 }
0x1fd6   :  { %v3374_v51 = vpop.xlane.xlu1 %3373 }
0x1fd7   :  { %v3376_v8 = vmul.f32 0.03125, %v3374_v51  ;;  %v3379_v60 = vmul.f32 %v3377_v4, %v3377_v4 }
0x1fd9   :  { %v3378_v52 = vsub.f32 %v3368_v61, %v3376_v8  ;;  %v3381_v50 = vsel %vm166_vm1, %v3379_v60, 0.0 }
0x1fda   :  { %3382 = vadd.xlane.f32.xlu0 %v3381_v50 }
0x1fdb   :  { %v3380_v53 = vmul.f32 %v3378_v52, %v3378_v52 }
0x1fdd   :  { %v3384_v55 = vsel %vm166_vm1, %v3380_v53, 0.0 }
0x1fde   :  { %3385 = vadd.xlane.f32.xlu1 %v3384_v55 }
0x2063   :  { %v3383_v54 = vpop.xlane.xlu0 %3382 }
0x2064   :  { %v3387_v40 = vmul.f32 0.03125, %v3383_v54 }
0x2066   :  { %v3389_v57 = vadd.f32 1e-05, %v3387_v40 }
0x2067   :  { %v3386_v58 = vpop.xlane.xlu1 %3385 }
0x2068   :  { %4242 = vrsqrt.f32 %v3389_v57  ;;  %v3388_v59 = vmul.f32 0.03125, %v3386_v58 }
0x206a   :  { %v3390_v41 = vadd.f32 1e-05, %v3388_v59 }
0x206c   :  { %4244 = vrsqrt.f32 %v3390_v41 }
0x2075   :  { %v4243_v1 = vpop.eup %4242 }
0x2076   :  { %v3393_v2 = vmul.f32 %v4243_v1, %v3377_v4 }
0x2078   :  { %v3399_v6 = vmul.f32 %v3398_v62, %v3393_v2 }
0x2079   :  { %v4245_v7 = vpop.eup %4244 }
0x207a   :  { %v3405_v14 = vadd.f32 %v3404_v5, %v3399_v6  ;;  %v3394_v11 = vmul.f32 %v4245_v7, %v3378_v52 }
0x207c   :  { %v3407_v15 = vsel %vm166_vm1, %v3405_v14, 0.0  ;;  %v3400_v17 = vmul.f32 %v3398_v62, %v3394_v11 }
0x207d   :  { %3408 = vadd.xlane.f32.xlu0 %v3407_v15 }
0x207e   :  { %v3406_v18 = vadd.f32 %v3404_v5, %v3400_v17 }
0x2080   :  { %v3410_v19 = vsel %vm166_vm1, %v3406_v18, 0.0 }
0x2081   :  { %3411 = vadd.xlane.f32.xlu1 %v3410_v19 }
0x2106   :  { %v3409_v20 = vpop.xlane.xlu0 %3408 }
0x2107   :  { %v3413_v21 = vmul.f32 0.03125, %v3409_v20 }
0x2109   :  { %v3415_v24 = vsub.f32 %v3405_v14, %v3413_v21 }
0x210a   :  { %v3412_v22 = vpop.xlane.xlu1 %3411 }
0x210b   :  { %v3414_v25 = vmul.f32 0.03125, %v3412_v22  ;;  %v3417_v26 = vmul.f32 %v3415_v24, %v3415_v24 }
0x210d   :  { %v3416_v16 = vsub.f32 %v3406_v18, %v3414_v25  ;;  %v3419_v32 = vsel %vm166_vm1, %v3417_v26, 0.0 }
0x210e   :  { %3420 = vadd.xlane.f32.xlu0 %v3419_v32 }
0x210f   :  { %v3418_v30 = vmul.f32 %v3416_v16, %v3416_v16 }
0x2111   :  { %v3422_v13 = vsel %vm166_vm1, %v3418_v30, 0.0 }
0x2112   :  { %3423 = vadd.xlane.f32.xlu1 %v3422_v13 }
0x2197   :  { %v3421_v28 = vpop.xlane.xlu0 %3420 }
0x2198   :  { %v3425_v44 = vmul.f32 0.03125, %v3421_v28 }
0x219a   :  { %v3427_v49 = vadd.f32 1e-05, %v3425_v44 }
0x219b   :  { %v3424_v34 = vpop.xlane.xlu1 %3423 }
0x219c   :  { %4246 = vrsqrt.f32 %v3427_v49  ;;  %v3426_v35 = vmul.f32 0.03125, %v3424_v34 }
0x219e   :  { %v3428_v37 = vadd.f32 1e-05, %v3426_v35 }
0x21a0   :  { %4248 = vrsqrt.f32 %v3428_v37 }
0x21a9   :  { %v4247_v39 = vpop.eup %4246 }
0x21aa   :  { %v3431_v27 = vmul.f32 %v4247_v39, %v3415_v24 }
0x21ac   :  { %v3437_v31 = vmul.f32 %v3436_v36, %v3431_v27 }
0x21ad   :  { %v4249_v0 = vpop.eup %4248 }
0x21ae   :  { %v3432_v43 = vmul.f32 %v4249_v0, %v3416_v16  ;;  %v3443_v12 = vadd.f32 %v3442_v56, %v3437_v31 }
0x21b0   :  { %v3438_v42 = vmul.f32 %v3436_v36, %v3432_v43  ;;  %3445 = vst.msk [vmem:[#allocation14] sm:$0xff] %vm166_vm1, %v3443_v12 }
0x21b2   :  { %v3444_v3 = vadd.f32 %v3442_v56, %v3438_v42 }
0x21b4   :  { %3446 = vst.msk [vmem:[#allocation14 + $0x8] sm:$0xff] %vm166_vm1, %v3444_v3 }
0x21b5   :  { %4406 = shalt.err (!%p4403_p11)
}
0x21b6   :  { %3458 = dma.vmem_to_hbm [thread:$0]  %s3453_s9, 256, %s5242_s11, [#allocation4], %s4427_s22, %s4427_s22, %s4428_s23  }
0x21b7   :  { %4423 = dma.done.wait [#allocation4], 256  }
0x21b8   :  { %4424 = vsyncadd [#allocation4], 4294967040 }
0x21b9   :  { %3462 = vsyncpa [#allocation3], 1 }
0x21ba   :  { %3463 = vsyncpa [#allocation6], 1 }
0x21bb   :  { %3464 = vsyncpa [#allocation9], 1 }
0x21bc   :  { %3465 = vsyncpa [#allocation12], 1 }
0x21bd   :  { %3466 = vsyncpa [#allocation4], 1 }

</bundles_post_ra>
